<compile_context>
chip_gen: v7x
topology: tpu7x:2x2x1
jax: 0.10.0
libtpu: 0.0.40
codegen_flags: <defaults>
</compile_context>

<pallas_src>
import functools

import jax
import jax.numpy as jnp
from jax.experimental import pallas as pl
from jax.experimental.pallas import tpu as pltpu


def _layer_norm(x, gamma, beta, eps=1e-12):
    # single-pass variance: E[x^2] - E[x]^2 (two independent reductions, no
    # (x - mu) pass feeding the variance reduction)
    mu = jnp.mean(x, axis=-1, keepdims=True)
    ms = jnp.mean(x * x, axis=-1, keepdims=True)
    var = ms - mu * mu
    return (x - mu) * jax.lax.rsqrt(var + eps) * gamma + beta


def _tpu_vmem_capacity_bytes():
    try:
        return int(pltpu.get_tpu_info().vmem_capacity_bytes)
    except Exception:
        return 128 * 1024 * 1024


def _pick_block_batch(B, S, target_rows):
    """Sequences per grid step so bt*S is MXU-filling, while keeping >= 2 steps
    on the batch grid axis (so both v7x TensorCores get work)."""
    bt = min(B, max(1, -(-target_rows // S)))
    if B >= 2:
        bt = min(bt, max(1, B // 2))
    while B % bt:
        bt -= 1
    return bt


def _layer_index_map(b, l, *, rank):
    return (l,) + (0,) * (rank - 1)


def _const_index_map(b, l, *, rank):
    return (0,) * rank


# ----------------------------------------------------------------------------
# Single Pallas kernel: full BERT encoder + fused 'bert_cnn' head.
# grid = (batch_blocks, n_layers); the (bt,S,H) f32 residual stream lives in a
# VMEM scratch across the layer axis; the only HBM output is the padded logits.
# ----------------------------------------------------------------------------
def bert_ner_kernel(x_ref, negmask_ref,
                    wq_ref, bq_ref, wk_ref, bk_ref, wv_ref, bv_ref,
                    wo_ref, bo_ref, g1_ref, b1_ref,
                    wf1_ref, bf1_ref, wf2_ref, bf2_ref, g2_ref, b2_ref,
                    convw_ref, convb_ref, wfc_ref, bfc_ref,
                    o_ref, carry_ref, *, num_heads):
    layer = pl.program_id(1)
    n_layers = pl.num_programs(1)

    bt, S, H = carry_ref.shape
    nh = num_heads
    hd = H // nh
    M = bt * S
    scale = 1.0 / (hd ** 0.5)

    @pl.when(layer == 0)
    def _():                                   # seed the carry with the embeddings
        carry_ref[...] = x_ref[...].astype(jnp.float32)

    # ----------------------------- encoder layer -----------------------------
    x = carry_ref[...].reshape(M, H)           # f32 residual stream
    xb = x.astype(jnp.bfloat16)

    q = jnp.dot(xb, wq_ref[...], preferred_element_type=jnp.float32) + bq_ref[...]
    k = jnp.dot(xb, wk_ref[...], preferred_element_type=jnp.float32) + bk_ref[...]
    v = jnp.dot(xb, wv_ref[...], preferred_element_type=jnp.float32) + bv_ref[...]

    # single bf16 cast for q/k/v (1/sqrt(hd) folded into q), no f32 copies kept
    qb = (q * scale).astype(jnp.bfloat16).reshape(bt, S, H)
    kb = k.astype(jnp.bfloat16).reshape(bt, S, H)
    vb = v.astype(jnp.bfloat16).reshape(bt, S, H)

    # additive mask precomputed on host; broadcast hoisted out of the head loop
    neg = jnp.broadcast_to(negmask_ref[...], (bt, S, S))

    ctxs = []
    for h in range(nh):                        # static unroll over heads
        lo, hi = h * hd, (h + 1) * hd
        s = jnp.einsum('bqd,bkd->bqk', qb[:, :, lo:hi], kb[:, :, lo:hi],
                       preferred_element_type=jnp.float32) + neg      # (bt,S,S)
        s = s - jnp.max(s, axis=-1, keepdims=True)
        p = jnp.exp(s)
        p = p * pl.reciprocal(jnp.sum(p, axis=-1, keepdims=True), approx=True)
        ctx = jnp.einsum('bqk,bkd->bqd', p.astype(jnp.bfloat16), vb[:, :, lo:hi],
                         preferred_element_type=jnp.float32)          # (bt,S,hd)
        ctxs.append(ctx.astype(jnp.bfloat16))

    # lane-concat heads -> ONE full-depth (K=H) output-projection matmul
    ctx_all = jnp.concatenate(ctxs, axis=-1).reshape(M, H)
    attn = jnp.dot(ctx_all, wo_ref[...], preferred_element_type=jnp.float32)

    y = _layer_norm(x + attn + bo_ref[...], g1_ref[...], b1_ref[...])

    f1 = jnp.dot(y.astype(jnp.bfloat16), wf1_ref[...],
                 preferred_element_type=jnp.float32) + bf1_ref[...]
    f1 = jax.nn.gelu(f1)   # TODO(synk): HF BERT uses exact erf GELU; tanh approx here.
    f2 = jnp.dot(f1.astype(jnp.bfloat16), wf2_ref[...],
                 preferred_element_type=jnp.float32) + bf2_ref[...]
    carry_ref[...] = _layer_norm(y + f2, g2_ref[...], b2_ref[...]).reshape(bt, S, H)

    # -------------------- fused 'bert_cnn' head (last layer) -----------------
    #   Conv2d(1, F, (3, H), padding=1) -> relu -> adaptive_avg_pool2d(.., (S,1))
    #   -> squeeze/permute -> dropout(0.5, identity in eval) -> Linear(F, L).
    @pl.when(layer == n_layers - 1)
    def _():
        xf = carry_ref[...]                                   # (bt,S,H) f32
        zrow = jnp.zeros((bt, 1, H), xf.dtype)
        x_up = jnp.concatenate([zrow, xf[:, :-1, :]], axis=1)  # conv tap k=0: x[s-1]
        x_dn = jnp.concatenate([xf[:, 1:, :], zrow], axis=1)   # conv tap k=2: x[s+1]
        xs = jnp.concatenate([x_up, xf, x_dn], axis=-1)        # (bt,S,3H)
        xs = xs.reshape(M, 3 * H).astype(jnp.bfloat16)

        # one wide matmul over all 3 conv output-width positions (N = 3*Fpad)
        acc = jnp.dot(xs, convw_ref[...], preferred_element_type=jnp.float32)
        acc = jnp.maximum(acc + convb_ref[...], 0.0)            # relu, (M, 3*Fpad)
        Fp = wfc_ref.shape[0]
        pooled = acc[:, 0:Fp] + acc[:, Fp:2 * Fp] + acc[:, 2 * Fp:3 * Fp]
        # avg-pool /3 folded into wfc (host); dropout(0.5) identity in eval.
        logits = jnp.dot(pooled.astype(jnp.bfloat16), wfc_ref[...],
                         preferred_element_type=jnp.float32) + bfc_ref[...]
        o_ref[...] = logits.reshape(bt, S, o_ref.shape[-1])


def run_bert_ner(x_bf16, negmask, params, *, num_heads):
    B, S, H = x_bf16.shape
    n_layers = params['wq'].shape[0]
    n_pad = params['fc_w'].shape[-1]

    cap = _tpu_vmem_capacity_bytes()
    target_rows = 512 if cap > 96 * 1024 * 1024 else 256   # v5e/v6e vs v7x
    vmem_limit = min(int(cap * 0.85), 100 * 1024 * 1024)
    bt = _pick_block_batch(B, S, target_rows)

    layer_names = ['wq', 'bq', 'wk', 'bk', 'wv', 'bv', 'wo', 'bo', 'ln1_g', 'ln1_b',
                   'wf1', 'bf1', 'wf2', 'bf2', 'ln2_g', 'ln2_b']
    layer_w = [params[n] for n in layer_names]
    layer_specs = [pl.BlockSpec((None,) + w.shape[1:],
                                functools.partial(_layer_index_map, rank=w.ndim))
                   for w in layer_w]

    head_names = ['conv_w', 'conv_b', 'fc_w', 'fc_b']
    head_w = [params[n] for n in head_names]
    head_specs = [pl.BlockSpec(w.shape,
                               functools.partial(_const_index_map, rank=w.ndim))
                  for w in head_w]

    return pl.pallas_call(
        functools.partial(bert_ner_kernel, num_heads=num_heads),
        out_shape=jax.ShapeDtypeStruct((B, S, n_pad), jnp.float32),
        grid=(B // bt, n_layers),
        in_specs=[pl.BlockSpec((bt, S, H), lambda b, l: (b, 0, 0)),
                  pl.BlockSpec((bt, 1, S), lambda b, l: (b, 0, 0))]
                 + layer_specs + head_specs,
        out_specs=pl.BlockSpec((bt, S, n_pad), lambda b, l: (b, 0, 0)),
        scratch_shapes=[pltpu.VMEM((bt, S, H), jnp.float32)],
        compiler_params=pltpu.CompilerParams(
            dimension_semantics=("parallel", "arbitrary"),
            vmem_limit_bytes=vmem_limit),
    )(x_bf16, negmask, *layer_w, *head_w)


# ----------------------------------------------------------------------------
# Host-side weight preprocessing, parameter init, forward wrapper.
# ----------------------------------------------------------------------------
def _build_conv_head(conv_w, conv_b, fc_w, fc_b, num_labels):
    """conv_w: (3, H, F) [kernel-height tap, input col, filter].
    Returns:
      conv_wide (3H, 3*Fpad): width (lane) shift moved onto the weight rows and
        the 3 conv output-width positions concatenated along N,
      conv_b_wide (1, 3*Fpad), fc_w_pad (Fpad, n_pad) with 1/3 pooling folded in,
      fc_b_pad (1, n_pad)."""
    _, H, F = conv_w.shape
    Fpad = max(128, ((F + 127) // 128) * 128)
    zero = jnp.zeros((1, F), conv_w.dtype)

    def shift_rows(w, d):      # equivalent weight for col_shift(x, d) @ w
        if d == -1:
            return jnp.concatenate([w[1:], zero], axis=0)
        if d == 1:
            return jnp.concatenate([zero, w[:-1]], axis=0)
        return w

    stacks = []
    for w_pos in range(3):
        s = jnp.concatenate([shift_rows(conv_w[dk], w_pos - 1) for dk in range(3)],
                            axis=0)                              # (3H, F)
        stacks.append(jnp.pad(s, ((0, 0), (0, Fpad - F))))       # (3H, Fpad)
    conv_wide = jnp.concatenate(stacks, axis=1)                  # (3H, 3*Fpad)

    conv_b_pad = jnp.pad(conv_b, ((0, 0), (0, Fpad - F)))
    conv_b_wide = jnp.tile(conv_b_pad, (1, 3))                   # (1, 3*Fpad)

    n_pad = max(128, ((num_labels + 127) // 128) * 128)
    fc_w_pad = jnp.zeros((Fpad, n_pad), jnp.float32).at[:F, :num_labels].set(fc_w / 3.0)
    fc_b_pad = jnp.zeros((1, n_pad), jnp.float32).at[:, :num_labels].set(fc_b)
    return conv_wide, conv_b_wide, fc_w_pad, fc_b_pad


def init_params(key, *, vocab, max_seq, hidden, n_layers, ffn, num_heads,
                num_filters, num_labels):
    H, L, F = hidden, n_layers, num_filters
    bf16 = jnp.bfloat16

    def nrm(k, shape, scale=0.02):
        return scale * jax.random.normal(k, shape, jnp.float32)

    ks = iter(jax.random.split(key, 12))
    wq = nrm(next(ks), (L, H, H));  wk = nrm(next(ks), (L, H, H))
    wv = nrm(next(ks), (L, H, H));  wo = nrm(next(ks), (L, H, H))
    wf1 = nrm(next(ks), (L, H, ffn)); wf2 = nrm(next(ks), (L, ffn, H))
    conv_w = nrm(next(ks), (3, H, F))                 # (tap, col, filter)
    conv_b = nrm(next(ks), (1, F))
    fc_w = nrm(next(ks), (F, num_labels))
    fc_b = nrm(next(ks), (1, num_labels))
    word_emb = nrm(next(ks), (vocab, H))
    pos_emb = nrm(next(ks), (max_seq, H))

    conv_wide, conv_b_wide, fc_w_pad, fc_b_pad = _build_conv_head(
        conv_w, conv_b, fc_w, fc_b, num_labels)

    zH = jnp.zeros((L, 1, H), jnp.float32)
    return {
        'word_emb': word_emb, 'pos_emb': pos_emb,
        'wq': wq.astype(bf16), 'bq': zH,
        'wk': wk.astype(bf16), 'bk': zH,
        'wv': wv.astype(bf16), 'bv': zH,
        'wo': wo.astype(bf16), 'bo': zH,                         # kept un-split
        'ln1_g': jnp.ones((L, 1, H), jnp.float32), 'ln1_b': zH,
        'wf1': wf1.astype(bf16), 'bf1': jnp.zeros((L, 1, ffn), jnp.float32),
        'wf2': wf2.astype(bf16), 'bf2': zH,
        'ln2_g': jnp.ones((L, 1, H), jnp.float32), 'ln2_b': zH,
        'conv_w': conv_wide.astype(bf16),     # (3H, 3*Fpad)
        'conv_b': conv_b_wide,                # (1, 3*Fpad) f32
        'fc_w': fc_w_pad.astype(bf16),        # (Fpad, n_pad), 1/3 pooling folded
        'fc_b': fc_b_pad,                     # (1, n_pad) f32
    }


def bert_ner_forward(input_ids, attention_mask, params, *, num_heads, num_labels):
    """model_type='bert_cnn', labels=None path of BertNer.forward."""
    B, S = input_ids.shape
    # glue: embedding lookup (word + position) in plain JAX; bf16 handoff (the x
    # block is only read at layer 0 and cast back to f32 when seeding the carry)
    x = (params['word_emb'][input_ids] + params['pos_emb'][:S][None, :, :]
         ).astype(jnp.bfloat16)
    # additive attention mask precomputed on host: 0 keep, -1e9 masked
    negmask = ((1.0 - attention_mask.astype(jnp.float32)) * -1e9).reshape(B, 1, S)

    logits_pad = run_bert_ner(x, negmask, params, num_heads=num_heads)  # (B,S,n_pad)
    logits = logits_pad[..., :num_labels]                               # (B,S,L)

    # TODO(synk): torchcrf CRF log-likelihood (sequential DP) not implemented;
    # labels=None path only, so loss stays None as in the reference.
    return {'logits': logits, 'loss': None}


if __name__ == "__main__":
    B, S, H = 2, 8, 32
    NUM_HEADS, N_LAYERS, FFN = 4, 2, 64
    NUM_FILTERS, NUM_LABELS, VOCAB = 8, 5, 100

    key = jax.random.PRNGKey(0)
    pkey, ikey = jax.random.split(key)
    params = init_params(pkey, vocab=VOCAB, max_seq=64, hidden=H,
                         n_layers=N_LAYERS, ffn=FFN, num_heads=NUM_HEADS,
                         num_filters=NUM_FILTERS, num_labels=NUM_LABELS)

    input_ids = jax.random.randint(ikey, (B, S), 0, VOCAB, dtype=jnp.int32)
    attention_mask = jnp.ones((B, S), jnp.float32).at[1, 6:].set(0.0)

    out = bert_ner_forward(input_ids, attention_mask, params,
                           num_heads=NUM_HEADS, num_labels=NUM_LABELS)
    logits = jax.block_until_ready(out['logits'])
    assert logits.shape == (B, S, NUM_LABELS)
    assert bool(jnp.all(jnp.isfinite(logits)))
    print("KERNEL_OK")
</pallas_src>

<mosaic_0001>
module attributes {stable_mosaic.version = 11 : i64} {
  func.func @bert_ner_kernel(%arg0: i32, %arg1: i32, %arg2: memref<1x8x32xbf16, #tpu.memory_space<vmem>>, %arg3: memref<1x1x8xf32, #tpu.memory_space<vmem>>, %arg4: memref<1x32x32xbf16, #tpu.memory_space<vmem>>, %arg5: memref<1x1x32xf32, #tpu.memory_space<vmem>>, %arg6: memref<1x32x32xbf16, #tpu.memory_space<vmem>>, %arg7: memref<1x1x32xf32, #tpu.memory_space<vmem>>, %arg8: memref<1x32x32xbf16, #tpu.memory_space<vmem>>, %arg9: memref<1x1x32xf32, #tpu.memory_space<vmem>>, %arg10: memref<1x32x32xbf16, #tpu.memory_space<vmem>>, %arg11: memref<1x1x32xf32, #tpu.memory_space<vmem>>, %arg12: memref<1x1x32xf32, #tpu.memory_space<vmem>>, %arg13: memref<1x1x32xf32, #tpu.memory_space<vmem>>, %arg14: memref<1x32x64xbf16, #tpu.memory_space<vmem>>, %arg15: memref<1x1x64xf32, #tpu.memory_space<vmem>>, %arg16: memref<1x64x32xbf16, #tpu.memory_space<vmem>>, %arg17: memref<1x1x32xf32, #tpu.memory_space<vmem>>, %arg18: memref<1x1x32xf32, #tpu.memory_space<vmem>>, %arg19: memref<1x1x32xf32, #tpu.memory_space<vmem>>, %arg20: memref<96x384xbf16, #tpu.memory_space<vmem>>, %arg21: memref<1x384xf32, #tpu.memory_space<vmem>>, %arg22: memref<128x128xbf16, #tpu.memory_space<vmem>>, %arg23: memref<1x128xf32, #tpu.memory_space<vmem>>, %arg24: memref<1x8x128xf32, #tpu.memory_space<vmem>>, %arg25: memref<1x8x32xf32, #tpu.memory_space<vmem>>) attributes {dimension_semantics = [#tpu.dimension_semantics<parallel>, #tpu.dimension_semantics<arbitrary>], iteration_bounds = array<i64: 2, 2>, scalar_prefetch = 0 : i64, scratch_operands = 1 : i64, tpu.core_type = #tpu.core_type<tc>, window_params = [{transform_indices = @transform_0, window_bounds = array<i64: 1, 8, 32>}, {transform_indices = @transform_1, window_bounds = array<i64: 1, 1, 8>}, {transform_indices = @transform_2, window_bounds = array<i64: 1, 32, 32>}, {transform_indices = @transform_3, window_bounds = array<i64: 1, 1, 32>}, {transform_indices = @transform_4, window_bounds = array<i64: 1, 32, 32>}, {transform_indices = @transform_5, window_bounds = array<i64: 1, 1, 32>}, {transform_indices = @transform_6, window_bounds = array<i64: 1, 32, 32>}, {transform_indices = @transform_7, window_bounds = array<i64: 1, 1, 32>}, {transform_indices = @transform_8, window_bounds = array<i64: 1, 32, 32>}, {transform_indices = @transform_9, window_bounds = array<i64: 1, 1, 32>}, {transform_indices = @transform_10, window_bounds = array<i64: 1, 1, 32>}, {transform_indices = @transform_11, window_bounds = array<i64: 1, 1, 32>}, {transform_indices = @transform_12, window_bounds = array<i64: 1, 32, 64>}, {transform_indices = @transform_13, window_bounds = array<i64: 1, 1, 64>}, {transform_indices = @transform_14, window_bounds = array<i64: 1, 64, 32>}, {transform_indices = @transform_15, window_bounds = array<i64: 1, 1, 32>}, {transform_indices = @transform_16, window_bounds = array<i64: 1, 1, 32>}, {transform_indices = @transform_17, window_bounds = array<i64: 1, 1, 32>}, {pipeline_mode = #tpu.pipeline_mode<synchronous>, transform_indices = @transform_18, window_bounds = array<i64: 96, 384>}, {pipeline_mode = #tpu.pipeline_mode<synchronous>, transform_indices = @transform_19, window_bounds = array<i64: 1, 384>}, {pipeline_mode = #tpu.pipeline_mode<synchronous>, transform_indices = @transform_20, window_bounds = array<i64: 128, 128>}, {pipeline_mode = #tpu.pipeline_mode<synchronous>, transform_indices = @transform_21, window_bounds = array<i64: 1, 128>}, {transform_indices = @transform_22, window_bounds = array<i64: 1, 8, 128>}]} {
    %c0_i32 = arith.constant 0 : i32
    %0 = arith.cmpi eq, %arg1, %c0_i32 : i32
    %1 = arith.extui %0 : i1 to i32
    %c0_i32_0 = arith.constant 0 : i32
    %2 = arith.cmpi ne, %1, %c0_i32_0 : i32
    scf.if %2 {
      %c0_94 = arith.constant 0 : index
      %c0_95 = arith.constant 0 : index
      %c0_96 = arith.constant 0 : index
      %207 = vector.load %arg2[%c0_94, %c0_95, %c0_96] : memref<1x8x32xbf16, #tpu.memory_space<vmem>>, vector<1x8x32xbf16>
      %208 = arith.extf %207 : vector<1x8x32xbf16> to vector<1x8x32xf32>
      %c0_97 = arith.constant 0 : index
      %c0_98 = arith.constant 0 : index
      %c0_99 = arith.constant 0 : index
      %209 = vector.load %arg25[%c0_97, %c0_98, %c0_99] : memref<1x8x32xf32, #tpu.memory_space<vmem>>, vector<1x8x32xf32>
      tpu.vector_store %arg25[%c0_97, %c0_98, %c0_99], %208 {strides = array<i32>} : memref<1x8x32xf32, #tpu.memory_space<vmem>>, vector<1x8x32xf32>,
    } else {
    }
    %c0 = arith.constant 0 : index
    %c0_1 = arith.constant 0 : index
    %c0_2 = arith.constant 0 : index
    %3 = vector.load %arg25[%c0, %c0_1, %c0_2] : memref<1x8x32xf32, #tpu.memory_space<vmem>>, vector<1x8x32xf32>
    %4 = vector.shape_cast %3 : vector<1x8x32xf32> to vector<8x32xf32>
    %5 = arith.truncf %4 : vector<8x32xf32> to vector<8x32xbf16>
    %c0_3 = arith.constant 0 : index
    %c0_4 = arith.constant 0 : index
    %c0_5 = arith.constant 0 : index
    %6 = vector.load %arg4[%c0_3, %c0_4, %c0_5] : memref<1x32x32xbf16, #tpu.memory_space<vmem>>, vector<1x32x32xbf16>
    %7 = vector.shape_cast %6 : vector<1x32x32xbf16> to vector<32x32xbf16>
    %cst = arith.constant dense<0.000000e+00> : vector<8x32xf32>
    %8 = tpu.matmul %5, %7, %cst {dimension_numbers = #tpu.dot_dimension_numbers<[1], [0], [0], [1], [0, 0, 1, 1], [], []>} : vector<8x32xbf16>, vector<32x32xbf16>, vector<8x32xf32> -> vector<8x32xf32>
    %c0_6 = arith.constant 0 : index
    %c0_7 = arith.constant 0 : index
    %c0_8 = arith.constant 0 : index
    %9 = vector.load %arg5[%c0_6, %c0_7, %c0_8] : memref<1x1x32xf32, #tpu.memory_space<vmem>>, vector<1x1x32xf32>
    %10 = vector.shape_cast %9 : vector<1x1x32xf32> to vector<1x32xf32>
    %11 = vector.broadcast %10 : vector<1x32xf32> to vector<8x32xf32>
    %12 = arith.addf %8, %11 : vector<8x32xf32>
    %c0_9 = arith.constant 0 : index
    %c0_10 = arith.constant 0 : index
    %c0_11 = arith.constant 0 : index
    %13 = vector.load %arg6[%c0_9, %c0_10, %c0_11] : memref<1x32x32xbf16, #tpu.memory_space<vmem>>, vector<1x32x32xbf16>
    %14 = vector.shape_cast %13 : vector<1x32x32xbf16> to vector<32x32xbf16>
    %cst_12 = arith.constant dense<0.000000e+00> : vector<8x32xf32>
    %15 = tpu.matmul %5, %14, %cst_12 {dimension_numbers = #tpu.dot_dimension_numbers<[1], [0], [0], [1], [0, 0, 1, 1], [], []>} : vector<8x32xbf16>, vector<32x32xbf16>, vector<8x32xf32> -> vector<8x32xf32>
    %c0_13 = arith.constant 0 : index
    %c0_14 = arith.constant 0 : index
    %c0_15 = arith.constant 0 : index
    %16 = vector.load %arg7[%c0_13, %c0_14, %c0_15] : memref<1x1x32xf32, #tpu.memory_space<vmem>>, vector<1x1x32xf32>
    %17 = vector.shape_cast %16 : vector<1x1x32xf32> to vector<1x32xf32>
    %18 = vector.broadcast %17 : vector<1x32xf32> to vector<8x32xf32>
    %19 = arith.addf %15, %18 : vector<8x32xf32>
    %c0_16 = arith.constant 0 : index
    %c0_17 = arith.constant 0 : index
    %c0_18 = arith.constant 0 : index
    %20 = vector.load %arg8[%c0_16, %c0_17, %c0_18] : memref<1x32x32xbf16, #tpu.memory_space<vmem>>, vector<1x32x32xbf16>
    %21 = vector.shape_cast %20 : vector<1x32x32xbf16> to vector<32x32xbf16>
    %cst_19 = arith.constant dense<0.000000e+00> : vector<8x32xf32>
    %22 = tpu.matmul %5, %21, %cst_19 {dimension_numbers = #tpu.dot_dimension_numbers<[1], [0], [0], [1], [0, 0, 1, 1], [], []>} : vector<8x32xbf16>, vector<32x32xbf16>, vector<8x32xf32> -> vector<8x32xf32>
    %c0_20 = arith.constant 0 : index
    %c0_21 = arith.constant 0 : index
    %c0_22 = arith.constant 0 : index
    %23 = vector.load %arg9[%c0_20, %c0_21, %c0_22] : memref<1x1x32xf32, #tpu.memory_space<vmem>>, vector<1x1x32xf32>
    %24 = vector.shape_cast %23 : vector<1x1x32xf32> to vector<1x32xf32>
    %25 = vector.broadcast %24 : vector<1x32xf32> to vector<8x32xf32>
    %26 = arith.addf %22, %25 : vector<8x32xf32>
    %cst_23 = arith.constant 0.353553385 : f32
    %27 = vector.broadcast %cst_23 : f32 to vector<8x32xf32>
    %28 = arith.mulf %12, %27 : vector<8x32xf32>
    %29 = arith.truncf %28 : vector<8x32xf32> to vector<8x32xbf16>
    %30 = vector.shape_cast %29 : vector<8x32xbf16> to vector<1x8x32xbf16>
    %31 = arith.truncf %19 : vector<8x32xf32> to vector<8x32xbf16>
    %32 = vector.shape_cast %31 : vector<8x32xbf16> to vector<1x8x32xbf16>
    %33 = arith.truncf %26 : vector<8x32xf32> to vector<8x32xbf16>
    %34 = vector.shape_cast %33 : vector<8x32xbf16> to vector<1x8x32xbf16>
    %c0_24 = arith.constant 0 : index
    %c0_25 = arith.constant 0 : index
    %c0_26 = arith.constant 0 : index
    %35 = vector.load %arg3[%c0_24, %c0_25, %c0_26] : memref<1x1x8xf32, #tpu.memory_space<vmem>>, vector<1x1x8xf32>
    %36 = vector.shape_cast %35 : vector<1x1x8xf32> to vector<1x1x8xf32>
    %37 = vector.broadcast %36 : vector<1x1x8xf32> to vector<1x8x8xf32>
    %38 = vector.extract_strided_slice %30 {offsets = [0, 0, 0], sizes = [1, 8, 8], strides = [1, 1, 1]} : vector<1x8x32xbf16> to vector<1x8x8xbf16>
    %39 = vector.extract_strided_slice %32 {offsets = [0, 0, 0], sizes = [1, 8, 8], strides = [1, 1, 1]} : vector<1x8x32xbf16> to vector<1x8x8xbf16>
    "tpu.trace_start"() <{level = 10 : i32, message = "bqd,bkd->bqk"}> : () -> ()
    %cst_27 = arith.constant dense<0.000000e+00> : vector<1x8x8xf32>
    %40 = tpu.matmul %38, %39, %cst_27 {dimension_numbers = #tpu.dot_dimension_numbers<[2], [2], [1], [1], [0, 0, 0, 1, 1, 1], [0], [0]>} : vector<1x8x8xbf16>, vector<1x8x8xbf16>, vector<1x8x8xf32> -> vector<1x8x8xf32>
    "tpu.trace_stop"() : () -> ()
    %41 = arith.addf %40, %37 : vector<1x8x8xf32>
    %cst_28 = arith.constant dense<0xFF800000> : vector<1x8xf32>
    %42 = vector.multi_reduction <maximumf>, %41, %cst_28 [2] : vector<1x8x8xf32> to vector<1x8xf32>
    %43 = vector.shape_cast %42 : vector<1x8xf32> to vector<1x8x1xf32>
    %44 = vector.broadcast %43 : vector<1x8x1xf32> to vector<1x8x8xf32>
    %45 = arith.subf %41, %44 : vector<1x8x8xf32>
    %46 = math.exp %45 : vector<1x8x8xf32>
    %cst_29 = arith.constant dense<0.000000e+00> : vector<1x8xf32>
    %47 = vector.multi_reduction <add>, %46, %cst_29 [2] : vector<1x8x8xf32> to vector<1x8xf32>
    %48 = vector.shape_cast %47 : vector<1x8xf32> to vector<1x8x1xf32>
    %49 = tpu.reciprocal %48 {approx = true} : vector<1x8x1xf32> -> vector<1x8x1xf32>
    %50 = vector.broadcast %49 : vector<1x8x1xf32> to vector<1x8x8xf32>
    %51 = arith.mulf %46, %50 : vector<1x8x8xf32>
    %52 = arith.truncf %51 : vector<1x8x8xf32> to vector<1x8x8xbf16>
    %53 = vector.extract_strided_slice %34 {offsets = [0, 0, 0], sizes = [1, 8, 8], strides = [1, 1, 1]} : vector<1x8x32xbf16> to vector<1x8x8xbf16>
    "tpu.trace_start"() <{level = 10 : i32, message = "bqk,bkd->bqd"}> : () -> ()
    %cst_30 = arith.constant dense<0.000000e+00> : vector<1x8x8xf32>
    %54 = tpu.matmul %52, %53, %cst_30 {dimension_numbers = #tpu.dot_dimension_numbers<[2], [1], [1], [2], [0, 0, 0, 1, 1, 2], [0], [0]>} : vector<1x8x8xbf16>, vector<1x8x8xbf16>, vector<1x8x8xf32> -> vector<1x8x8xf32>
    "tpu.trace_stop"() : () -> ()
    %55 = arith.truncf %54 : vector<1x8x8xf32> to vector<1x8x8xbf16>
    %56 = vector.extract_strided_slice %30 {offsets = [0, 0, 8], sizes = [1, 8, 8], strides = [1, 1, 1]} : vector<1x8x32xbf16> to vector<1x8x8xbf16>
    %57 = vector.extract_strided_slice %32 {offsets = [0, 0, 8], sizes = [1, 8, 8], strides = [1, 1, 1]} : vector<1x8x32xbf16> to vector<1x8x8xbf16>
    "tpu.trace_start"() <{level = 10 : i32, message = "bqd,bkd->bqk"}> : () -> ()
    %cst_31 = arith.constant dense<0.000000e+00> : vector<1x8x8xf32>
    %58 = tpu.matmul %56, %57, %cst_31 {dimension_numbers = #tpu.dot_dimension_numbers<[2], [2], [1], [1], [0, 0, 0, 1, 1, 1], [0], [0]>} : vector<1x8x8xbf16>, vector<1x8x8xbf16>, vector<1x8x8xf32> -> vector<1x8x8xf32>
    "tpu.trace_stop"() : () -> ()
    %59 = arith.addf %58, %37 : vector<1x8x8xf32>
    %cst_32 = arith.constant dense<0xFF800000> : vector<1x8xf32>
    %60 = vector.multi_reduction <maximumf>, %59, %cst_32 [2] : vector<1x8x8xf32> to vector<1x8xf32>
    %61 = vector.shape_cast %60 : vector<1x8xf32> to vector<1x8x1xf32>
    %62 = vector.broadcast %61 : vector<1x8x1xf32> to vector<1x8x8xf32>
    %63 = arith.subf %59, %62 : vector<1x8x8xf32>
    %64 = math.exp %63 : vector<1x8x8xf32>
    %cst_33 = arith.constant dense<0.000000e+00> : vector<1x8xf32>
    %65 = vector.multi_reduction <add>, %64, %cst_33 [2] : vector<1x8x8xf32> to vector<1x8xf32>
    %66 = vector.shape_cast %65 : vector<1x8xf32> to vector<1x8x1xf32>
    %67 = tpu.reciprocal %66 {approx = true} : vector<1x8x1xf32> -> vector<1x8x1xf32>
    %68 = vector.broadcast %67 : vector<1x8x1xf32> to vector<1x8x8xf32>
    %69 = arith.mulf %64, %68 : vector<1x8x8xf32>
    %70 = arith.truncf %69 : vector<1x8x8xf32> to vector<1x8x8xbf16>
    %71 = vector.extract_strided_slice %34 {offsets = [0, 0, 8], sizes = [1, 8, 8], strides = [1, 1, 1]} : vector<1x8x32xbf16> to vector<1x8x8xbf16>
    "tpu.trace_start"() <{level = 10 : i32, message = "bqk,bkd->bqd"}> : () -> ()
    %cst_34 = arith.constant dense<0.000000e+00> : vector<1x8x8xf32>
    %72 = tpu.matmul %70, %71, %cst_34 {dimension_numbers = #tpu.dot_dimension_numbers<[2], [1], [1], [2], [0, 0, 0, 1, 1, 2], [0], [0]>} : vector<1x8x8xbf16>, vector<1x8x8xbf16>, vector<1x8x8xf32> -> vector<1x8x8xf32>
    "tpu.trace_stop"() : () -> ()
    %73 = arith.truncf %72 : vector<1x8x8xf32> to vector<1x8x8xbf16>
    %74 = vector.extract_strided_slice %30 {offsets = [0, 0, 16], sizes = [1, 8, 8], strides = [1, 1, 1]} : vector<1x8x32xbf16> to vector<1x8x8xbf16>
    %75 = vector.extract_strided_slice %32 {offsets = [0, 0, 16], sizes = [1, 8, 8], strides = [1, 1, 1]} : vector<1x8x32xbf16> to vector<1x8x8xbf16>
    "tpu.trace_start"() <{level = 10 : i32, message = "bqd,bkd->bqk"}> : () -> ()
    %cst_35 = arith.constant dense<0.000000e+00> : vector<1x8x8xf32>
    %76 = tpu.matmul %74, %75, %cst_35 {dimension_numbers = #tpu.dot_dimension_numbers<[2], [2], [1], [1], [0, 0, 0, 1, 1, 1], [0], [0]>} : vector<1x8x8xbf16>, vector<1x8x8xbf16>, vector<1x8x8xf32> -> vector<1x8x8xf32>
    "tpu.trace_stop"() : () -> ()
    %77 = arith.addf %76, %37 : vector<1x8x8xf32>
    %cst_36 = arith.constant dense<0xFF800000> : vector<1x8xf32>
    %78 = vector.multi_reduction <maximumf>, %77, %cst_36 [2] : vector<1x8x8xf32> to vector<1x8xf32>
    %79 = vector.shape_cast %78 : vector<1x8xf32> to vector<1x8x1xf32>
    %80 = vector.broadcast %79 : vector<1x8x1xf32> to vector<1x8x8xf32>
    %81 = arith.subf %77, %80 : vector<1x8x8xf32>
    %82 = math.exp %81 : vector<1x8x8xf32>
    %cst_37 = arith.constant dense<0.000000e+00> : vector<1x8xf32>
    %83 = vector.multi_reduction <add>, %82, %cst_37 [2] : vector<1x8x8xf32> to vector<1x8xf32>
    %84 = vector.shape_cast %83 : vector<1x8xf32> to vector<1x8x1xf32>
    %85 = tpu.reciprocal %84 {approx = true} : vector<1x8x1xf32> -> vector<1x8x1xf32>
    %86 = vector.broadcast %85 : vector<1x8x1xf32> to vector<1x8x8xf32>
    %87 = arith.mulf %82, %86 : vector<1x8x8xf32>
    %88 = arith.truncf %87 : vector<1x8x8xf32> to vector<1x8x8xbf16>
    %89 = vector.extract_strided_slice %34 {offsets = [0, 0, 16], sizes = [1, 8, 8], strides = [1, 1, 1]} : vector<1x8x32xbf16> to vector<1x8x8xbf16>
    "tpu.trace_start"() <{level = 10 : i32, message = "bqk,bkd->bqd"}> : () -> ()
    %cst_38 = arith.constant dense<0.000000e+00> : vector<1x8x8xf32>
    %90 = tpu.matmul %88, %89, %cst_38 {dimension_numbers = #tpu.dot_dimension_numbers<[2], [1], [1], [2], [0, 0, 0, 1, 1, 2], [0], [0]>} : vector<1x8x8xbf16>, vector<1x8x8xbf16>, vector<1x8x8xf32> -> vector<1x8x8xf32>
    "tpu.trace_stop"() : () -> ()
    %91 = arith.truncf %90 : vector<1x8x8xf32> to vector<1x8x8xbf16>
    %92 = vector.extract_strided_slice %30 {offsets = [0, 0, 24], sizes = [1, 8, 8], strides = [1, 1, 1]} : vector<1x8x32xbf16> to vector<1x8x8xbf16>
    %93 = vector.extract_strided_slice %32 {offsets = [0, 0, 24], sizes = [1, 8, 8], strides = [1, 1, 1]} : vector<1x8x32xbf16> to vector<1x8x8xbf16>
    "tpu.trace_start"() <{level = 10 : i32, message = "bqd,bkd->bqk"}> : () -> ()
    %cst_39 = arith.constant dense<0.000000e+00> : vector<1x8x8xf32>
    %94 = tpu.matmul %92, %93, %cst_39 {dimension_numbers = #tpu.dot_dimension_numbers<[2], [2], [1], [1], [0, 0, 0, 1, 1, 1], [0], [0]>} : vector<1x8x8xbf16>, vector<1x8x8xbf16>, vector<1x8x8xf32> -> vector<1x8x8xf32>
    "tpu.trace_stop"() : () -> ()
    %95 = arith.addf %94, %37 : vector<1x8x8xf32>
    %cst_40 = arith.constant dense<0xFF800000> : vector<1x8xf32>
    %96 = vector.multi_reduction <maximumf>, %95, %cst_40 [2] : vector<1x8x8xf32> to vector<1x8xf32>
    %97 = vector.shape_cast %96 : vector<1x8xf32> to vector<1x8x1xf32>
    %98 = vector.broadcast %97 : vector<1x8x1xf32> to vector<1x8x8xf32>
    %99 = arith.subf %95, %98 : vector<1x8x8xf32>
    %100 = math.exp %99 : vector<1x8x8xf32>
    %cst_41 = arith.constant dense<0.000000e+00> : vector<1x8xf32>
    %101 = vector.multi_reduction <add>, %100, %cst_41 [2] : vector<1x8x8xf32> to vector<1x8xf32>
    %102 = vector.shape_cast %101 : vector<1x8xf32> to vector<1x8x1xf32>
    %103 = tpu.reciprocal %102 {approx = true} : vector<1x8x1xf32> -> vector<1x8x1xf32>
    %104 = vector.broadcast %103 : vector<1x8x1xf32> to vector<1x8x8xf32>
    %105 = arith.mulf %100, %104 : vector<1x8x8xf32>
    %106 = arith.truncf %105 : vector<1x8x8xf32> to vector<1x8x8xbf16>
    %107 = vector.extract_strided_slice %34 {offsets = [0, 0, 24], sizes = [1, 8, 8], strides = [1, 1, 1]} : vector<1x8x32xbf16> to vector<1x8x8xbf16>
    "tpu.trace_start"() <{level = 10 : i32, message = "bqk,bkd->bqd"}> : () -> ()
    %cst_42 = arith.constant dense<0.000000e+00> : vector<1x8x8xf32>
    %108 = tpu.matmul %106, %107, %cst_42 {dimension_numbers = #tpu.dot_dimension_numbers<[2], [1], [1], [2], [0, 0, 0, 1, 1, 2], [0], [0]>} : vector<1x8x8xbf16>, vector<1x8x8xbf16>, vector<1x8x8xf32> -> vector<1x8x8xf32>
    "tpu.trace_stop"() : () -> ()
    %109 = arith.truncf %108 : vector<1x8x8xf32> to vector<1x8x8xbf16>
    %110 = tpu.concatenate %55, %73, %91, %109 in 2 : vector<1x8x8xbf16>, vector<1x8x8xbf16>, vector<1x8x8xbf16>, vector<1x8x8xbf16> -> vector<1x8x32xbf16>
    %111 = vector.shape_cast %110 : vector<1x8x32xbf16> to vector<8x32xbf16>
    %c0_43 = arith.constant 0 : index
    %c0_44 = arith.constant 0 : index
    %c0_45 = arith.constant 0 : index
    %112 = vector.load %arg10[%c0_43, %c0_44, %c0_45] : memref<1x32x32xbf16, #tpu.memory_space<vmem>>, vector<1x32x32xbf16>
    %113 = vector.shape_cast %112 : vector<1x32x32xbf16> to vector<32x32xbf16>
    %cst_46 = arith.constant dense<0.000000e+00> : vector<8x32xf32>
    %114 = tpu.matmul %111, %113, %cst_46 {dimension_numbers = #tpu.dot_dimension_numbers<[1], [0], [0], [1], [0, 0, 1, 1], [], []>} : vector<8x32xbf16>, vector<32x32xbf16>, vector<8x32xf32> -> vector<8x32xf32>
    %115 = arith.addf %4, %114 : vector<8x32xf32>
    %c0_47 = arith.constant 0 : index
    %c0_48 = arith.constant 0 : index
    %c0_49 = arith.constant 0 : index
    %116 = vector.load %arg11[%c0_47, %c0_48, %c0_49] : memref<1x1x32xf32, #tpu.memory_space<vmem>>, vector<1x1x32xf32>
    %117 = vector.shape_cast %116 : vector<1x1x32xf32> to vector<1x32xf32>
    %118 = vector.broadcast %117 : vector<1x32xf32> to vector<8x32xf32>
    %119 = arith.addf %115, %118 : vector<8x32xf32>
    %c0_50 = arith.constant 0 : index
    %c0_51 = arith.constant 0 : index
    %c0_52 = arith.constant 0 : index
    %120 = vector.load %arg12[%c0_50, %c0_51, %c0_52] : memref<1x1x32xf32, #tpu.memory_space<vmem>>, vector<1x1x32xf32>
    %121 = vector.shape_cast %120 : vector<1x1x32xf32> to vector<1x32xf32>
    %c0_53 = arith.constant 0 : index
    %c0_54 = arith.constant 0 : index
    %c0_55 = arith.constant 0 : index
    %122 = vector.load %arg13[%c0_53, %c0_54, %c0_55] : memref<1x1x32xf32, #tpu.memory_space<vmem>>, vector<1x1x32xf32>
    %123 = vector.shape_cast %122 : vector<1x1x32xf32> to vector<1x32xf32>
    %cst_56 = arith.constant dense<0.000000e+00> : vector<8xf32>
    %124 = vector.multi_reduction <add>, %119, %cst_56 [1] : vector<8x32xf32> to vector<8xf32>
    %125 = vector.shape_cast %124 : vector<8xf32> to vector<8x1xf32>
    %cst_57 = arith.constant 3.200000e+01 : f32
    %126 = vector.broadcast %cst_57 : f32 to vector<8x1xf32>
    %127 = arith.divf %125, %126 : vector<8x1xf32>
    %128 = arith.mulf %119, %119 : vector<8x32xf32>
    %cst_58 = arith.constant dense<0.000000e+00> : vector<8xf32>
    %129 = vector.multi_reduction <add>, %128, %cst_58 [1] : vector<8x32xf32> to vector<8xf32>
    %130 = vector.shape_cast %129 : vector<8xf32> to vector<8x1xf32>
    %cst_59 = arith.constant 3.200000e+01 : f32
    %131 = vector.broadcast %cst_59 : f32 to vector<8x1xf32>
    %132 = arith.divf %130, %131 : vector<8x1xf32>
    %133 = arith.mulf %127, %127 : vector<8x1xf32>
    %134 = arith.subf %132, %133 : vector<8x1xf32>
    %135 = vector.broadcast %127 : vector<8x1xf32> to vector<8x32xf32>
    %136 = arith.subf %119, %135 : vector<8x32xf32>
    %cst_60 = arith.constant 9.99999996E-13 : f32
    %137 = vector.broadcast %cst_60 : f32 to vector<8x1xf32>
    %138 = arith.addf %134, %137 : vector<8x1xf32>
    %139 = math.rsqrt %138 : vector<8x1xf32>
    %140 = vector.broadcast %139 : vector<8x1xf32> to vector<8x32xf32>
    %141 = arith.mulf %136, %140 : vector<8x32xf32>
    %142 = vector.broadcast %121 : vector<1x32xf32> to vector<8x32xf32>
    %143 = arith.mulf %141, %142 : vector<8x32xf32>
    %144 = vector.broadcast %123 : vector<1x32xf32> to vector<8x32xf32>
    %145 = arith.addf %143, %144 : vector<8x32xf32>
    %146 = arith.truncf %145 : vector<8x32xf32> to vector<8x32xbf16>
    %c0_61 = arith.constant 0 : index
    %c0_62 = arith.constant 0 : index
    %c0_63 = arith.constant 0 : index
    %147 = vector.load %arg14[%c0_61, %c0_62, %c0_63] : memref<1x32x64xbf16, #tpu.memory_space<vmem>>, vector<1x32x64xbf16>
    %148 = vector.shape_cast %147 : vector<1x32x64xbf16> to vector<32x64xbf16>
    %cst_64 = arith.constant dense<0.000000e+00> : vector<8x64xf32>
    %149 = tpu.matmul %146, %148, %cst_64 {dimension_numbers = #tpu.dot_dimension_numbers<[1], [0], [0], [1], [0, 0, 1, 1], [], []>} : vector<8x32xbf16>, vector<32x64xbf16>, vector<8x64xf32> -> vector<8x64xf32>
    %c0_65 = arith.constant 0 : index
    %c0_66 = arith.constant 0 : index
    %c0_67 = arith.constant 0 : index
    %150 = vector.load %arg15[%c0_65, %c0_66, %c0_67] : memref<1x1x64xf32, #tpu.memory_space<vmem>>, vector<1x1x64xf32>
    %151 = vector.shape_cast %150 : vector<1x1x64xf32> to vector<1x64xf32>
    %152 = vector.broadcast %151 : vector<1x64xf32> to vector<8x64xf32>
    %153 = arith.addf %149, %152 : vector<8x64xf32>
    %154 = arith.mulf %153, %153 : vector<8x64xf32>
    %155 = arith.mulf %153, %154 : vector<8x64xf32>
    %cst_68 = arith.constant 4.471500e-02 : f32
    %156 = vector.broadcast %cst_68 : f32 to vector<8x64xf32>
    %157 = arith.mulf %156, %155 : vector<8x64xf32>
    %158 = arith.addf %153, %157 : vector<8x64xf32>
    %cst_69 = arith.constant 0.797884583 : f32
    %159 = vector.broadcast %cst_69 : f32 to vector<8x64xf32>
    %160 = arith.mulf %159, %158 : vector<8x64xf32>
    %161 = math.tanh %160 : vector<8x64xf32>
    %cst_70 = arith.constant 1.000000e+00 : f32
    %162 = vector.broadcast %cst_70 : f32 to vector<8x64xf32>
    %163 = arith.addf %162, %161 : vector<8x64xf32>
    %cst_71 = arith.constant 5.000000e-01 : f32
    %164 = vector.broadcast %cst_71 : f32 to vector<8x64xf32>
    %165 = arith.mulf %164, %163 : vector<8x64xf32>
    %166 = arith.mulf %153, %165 : vector<8x64xf32>
    %167 = arith.truncf %166 : vector<8x64xf32> to vector<8x64xbf16>
    %c0_72 = arith.constant 0 : index
    %c0_73 = arith.constant 0 : index
    %c0_74 = arith.constant 0 : index
    %168 = vector.load %arg16[%c0_72, %c0_73, %c0_74] : memref<1x64x32xbf16, #tpu.memory_space<vmem>>, vector<1x64x32xbf16>
    %169 = vector.shape_cast %168 : vector<1x64x32xbf16> to vector<64x32xbf16>
    %cst_75 = arith.constant dense<0.000000e+00> : vector<8x32xf32>
    %170 = tpu.matmul %167, %169, %cst_75 {dimension_numbers = #tpu.dot_dimension_numbers<[1], [0], [0], [1], [0, 0, 1, 1], [], []>} : vector<8x64xbf16>, vector<64x32xbf16>, vector<8x32xf32> -> vector<8x32xf32>
    %c0_76 = arith.constant 0 : index
    %c0_77 = arith.constant 0 : index
    %c0_78 = arith.constant 0 : index
    %171 = vector.load %arg17[%c0_76, %c0_77, %c0_78] : memref<1x1x32xf32, #tpu.memory_space<vmem>>, vector<1x1x32xf32>
    %172 = vector.shape_cast %171 : vector<1x1x32xf32> to vector<1x32xf32>
    %173 = vector.broadcast %172 : vector<1x32xf32> to vector<8x32xf32>
    %174 = arith.addf %170, %173 : vector<8x32xf32>
    %175 = arith.addf %145, %174 : vector<8x32xf32>
    %c0_79 = arith.constant 0 : index
    %c0_80 = arith.constant 0 : index
    %c0_81 = arith.constant 0 : index
    %176 = vector.load %arg18[%c0_79, %c0_80, %c0_81] : memref<1x1x32xf32, #tpu.memory_space<vmem>>, vector<1x1x32xf32>
    %177 = vector.shape_cast %176 : vector<1x1x32xf32> to vector<1x32xf32>
    %c0_82 = arith.constant 0 : index
    %c0_83 = arith.constant 0 : index
    %c0_84 = arith.constant 0 : index
    %178 = vector.load %arg19[%c0_82, %c0_83, %c0_84] : memref<1x1x32xf32, #tpu.memory_space<vmem>>, vector<1x1x32xf32>
    %179 = vector.shape_cast %178 : vector<1x1x32xf32> to vector<1x32xf32>
    %cst_85 = arith.constant dense<0.000000e+00> : vector<8xf32>
    %180 = vector.multi_reduction <add>, %175, %cst_85 [1] : vector<8x32xf32> to vector<8xf32>
    %181 = vector.shape_cast %180 : vector<8xf32> to vector<8x1xf32>
    %cst_86 = arith.constant 3.200000e+01 : f32
    %182 = vector.broadcast %cst_86 : f32 to vector<8x1xf32>
    %183 = arith.divf %181, %182 : vector<8x1xf32>
    %184 = arith.mulf %175, %175 : vector<8x32xf32>
    %cst_87 = arith.constant dense<0.000000e+00> : vector<8xf32>
    %185 = vector.multi_reduction <add>, %184, %cst_87 [1] : vector<8x32xf32> to vector<8xf32>
    %186 = vector.shape_cast %185 : vector<8xf32> to vector<8x1xf32>
    %cst_88 = arith.constant 3.200000e+01 : f32
    %187 = vector.broadcast %cst_88 : f32 to vector<8x1xf32>
    %188 = arith.divf %186, %187 : vector<8x1xf32>
    %189 = arith.mulf %183, %183 : vector<8x1xf32>
    %190 = arith.subf %188, %189 : vector<8x1xf32>
    %191 = vector.broadcast %183 : vector<8x1xf32> to vector<8x32xf32>
    %192 = arith.subf %175, %191 : vector<8x32xf32>
    %cst_89 = arith.constant 9.99999996E-13 : f32
    %193 = vector.broadcast %cst_89 : f32 to vector<8x1xf32>
    %194 = arith.addf %190, %193 : vector<8x1xf32>
    %195 = math.rsqrt %194 : vector<8x1xf32>
    %196 = vector.broadcast %195 : vector<8x1xf32> to vector<8x32xf32>
    %197 = arith.mulf %192, %196 : vector<8x32xf32>
    %198 = vector.broadcast %177 : vector<1x32xf32> to vector<8x32xf32>
    %199 = arith.mulf %197, %198 : vector<8x32xf32>
    %200 = vector.broadcast %179 : vector<1x32xf32> to vector<8x32xf32>
    %201 = arith.addf %199, %200 : vector<8x32xf32>
    %202 = vector.shape_cast %201 : vector<8x32xf32> to vector<1x8x32xf32>
    %c0_90 = arith.constant 0 : index
    %c0_91 = arith.constant 0 : index
    %c0_92 = arith.constant 0 : index
    %203 = vector.load %arg25[%c0_90, %c0_91, %c0_92] : memref<1x8x32xf32, #tpu.memory_space<vmem>>, vector<1x8x32xf32>
    tpu.vector_store %arg25[%c0_90, %c0_91, %c0_92], %202 {strides = array<i32>} : memref<1x8x32xf32, #tpu.memory_space<vmem>>, vector<1x8x32xf32>,
    %c1_i32 = arith.constant 1 : i32
    %204 = arith.cmpi eq, %arg1, %c1_i32 : i32
    %205 = arith.extui %204 : i1 to i32
    %c0_i32_93 = arith.constant 0 : i32
    %206 = arith.cmpi ne, %205, %c0_i32_93 : i32
    scf.if %206 {
      %c0_94 = arith.constant 0 : index
      %c0_95 = arith.constant 0 : index
      %c0_96 = arith.constant 0 : index
      %207 = vector.load %arg25[%c0_94, %c0_95, %c0_96] : memref<1x8x32xf32, #tpu.memory_space<vmem>>, vector<1x8x32xf32>
      %cst_97 = arith.constant 0.000000e+00 : f32
      %208 = vector.broadcast %cst_97 : f32 to vector<1x1x32xf32>
      %209 = vector.extract_strided_slice %207 {offsets = [0, 0, 0], sizes = [1, 7, 32], strides = [1, 1, 1]} : vector<1x8x32xf32> to vector<1x7x32xf32>
      %210 = tpu.concatenate %208, %209 in 1 : vector<1x1x32xf32>, vector<1x7x32xf32> -> vector<1x8x32xf32>
      %211 = vector.extract_strided_slice %207 {offsets = [0, 1, 0], sizes = [1, 7, 32], strides = [1, 1, 1]} : vector<1x8x32xf32> to vector<1x7x32xf32>
      %212 = tpu.concatenate %211, %208 in 1 : vector<1x7x32xf32>, vector<1x1x32xf32> -> vector<1x8x32xf32>
      %213 = tpu.concatenate %210, %207, %212 in 2 : vector<1x8x32xf32>, vector<1x8x32xf32>, vector<1x8x32xf32> -> vector<1x8x96xf32>
      %214 = vector.shape_cast %213 : vector<1x8x96xf32> to vector<8x96xf32>
      %215 = arith.truncf %214 : vector<8x96xf32> to vector<8x96xbf16>
      %c0_98 = arith.constant 0 : index
      %c0_99 = arith.constant 0 : index
      %216 = vector.load %arg20[%c0_98, %c0_99] : memref<96x384xbf16, #tpu.memory_space<vmem>>, vector<96x384xbf16>
      %cst_100 = arith.constant dense<0.000000e+00> : vector<8x384xf32>
      %217 = tpu.matmul %215, %216, %cst_100 {dimension_numbers = #tpu.dot_dimension_numbers<[1], [0], [0], [1], [0, 0, 1, 1], [], []>} : vector<8x96xbf16>, vector<96x384xbf16>, vector<8x384xf32> -> vector<8x384xf32>
      %c0_101 = arith.constant 0 : index
      %c0_102 = arith.constant 0 : index
      %218 = vector.load %arg21[%c0_101, %c0_102] : memref<1x384xf32, #tpu.memory_space<vmem>>, vector<1x384xf32>
      %219 = vector.broadcast %218 : vector<1x384xf32> to vector<8x384xf32>
      %220 = arith.addf %217, %219 : vector<8x384xf32>
      %cst_103 = arith.constant 0.000000e+00 : f32
      %221 = vector.broadcast %cst_103 : f32 to vector<8x384xf32>
      %222 = arith.maximumf %220, %221 : vector<8x384xf32>
      %223 = vector.extract_strided_slice %222 {offsets = [0, 0], sizes = [8, 128], strides = [1, 1]} : vector<8x384xf32> to vector<8x128xf32>
      %224 = vector.extract_strided_slice %222 {offsets = [0, 128], sizes = [8, 128], strides = [1, 1]} : vector<8x384xf32> to vector<8x128xf32>
      %225 = arith.addf %223, %224 : vector<8x128xf32>
      %226 = vector.extract_strided_slice %222 {offsets = [0, 256], sizes = [8, 128], strides = [1, 1]} : vector<8x384xf32> to vector<8x128xf32>
      %227 = arith.addf %225, %226 : vector<8x128xf32>
      %228 = arith.truncf %227 : vector<8x128xf32> to vector<8x128xbf16>
      %c0_104 = arith.constant 0 : index
      %c0_105 = arith.constant 0 : index
      %229 = vector.load %arg22[%c0_104, %c0_105] : memref<128x128xbf16, #tpu.memory_space<vmem>>, vector<128x128xbf16>
      %cst_106 = arith.constant dense<0.000000e+00> : vector<8x128xf32>
      %230 = tpu.matmul %228, %229, %cst_106 {dimension_numbers = #tpu.dot_dimension_numbers<[1], [0], [0], [1], [0, 0, 1, 1], [], []>} : vector<8x128xbf16>, vector<128x128xbf16>, vector<8x128xf32> -> vector<8x128xf32>
      %c0_107 = arith.constant 0 : index
      %c0_108 = arith.constant 0 : index
      %231 = vector.load %arg23[%c0_107, %c0_108] : memref<1x128xf32, #tpu.memory_space<vmem>>, vector<1x128xf32>
      %232 = vector.broadcast %231 : vector<1x128xf32> to vector<8x128xf32>
      %233 = arith.addf %230, %232 : vector<8x128xf32>
      %234 = vector.shape_cast %233 : vector<8x128xf32> to vector<1x8x128xf32>
      %c0_109 = arith.constant 0 : index
      %c0_110 = arith.constant 0 : index
      %c0_111 = arith.constant 0 : index
      %235 = vector.load %arg24[%c0_109, %c0_110, %c0_111] : memref<1x8x128xf32, #tpu.memory_space<vmem>>, vector<1x8x128xf32>
      tpu.vector_store %arg24[%c0_109, %c0_110, %c0_111], %234 {strides = array<i32>} : memref<1x8x128xf32, #tpu.memory_space<vmem>>, vector<1x8x128xf32>,
    } else {
    }
    return
  }
  func.func @transform_0(%arg0: i32, %arg1: i32) -> (i32, i32, i32) {
    %c0_i32 = arith.constant 0 : i32
    %c0_i32_0 = arith.constant 0 : i32
    %c0_i32_1 = arith.constant 0 : i32
    return %arg0, %c0_i32, %c0_i32_0 : i32, i32, i32
  }
  func.func @transform_1(%arg0: i32, %arg1: i32) -> (i32, i32, i32) {
    %c0_i32 = arith.constant 0 : i32
    %c0_i32_0 = arith.constant 0 : i32
    %c0_i32_1 = arith.constant 0 : i32
    return %arg0, %c0_i32, %c0_i32_0 : i32, i32, i32
  }
  func.func @transform_2(%arg0: i32, %arg1: i32) -> (i32, i32, i32) {
    %c0_i32 = arith.constant 0 : i32
    %c0_i32_0 = arith.constant 0 : i32
    %c0_i32_1 = arith.constant 0 : i32
    return %arg1, %c0_i32, %c0_i32_0 : i32, i32, i32
  }
  func.func @transform_3(%arg0: i32, %arg1: i32) -> (i32, i32, i32) {
    %c0_i32 = arith.constant 0 : i32
    %c0_i32_0 = arith.constant 0 : i32
    %c0_i32_1 = arith.constant 0 : i32
    return %arg1, %c0_i32, %c0_i32_0 : i32, i32, i32
  }
  func.func @transform_4(%arg0: i32, %arg1: i32) -> (i32, i32, i32) {
    %c0_i32 = arith.constant 0 : i32
    %c0_i32_0 = arith.constant 0 : i32
    %c0_i32_1 = arith.constant 0 : i32
    return %arg1, %c0_i32, %c0_i32_0 : i32, i32, i32
  }
  func.func @transform_5(%arg0: i32, %arg1: i32) -> (i32, i32, i32) {
    %c0_i32 = arith.constant 0 : i32
    %c0_i32_0 = arith.constant 0 : i32
    %c0_i32_1 = arith.constant 0 : i32
    return %arg1, %c0_i32, %c0_i32_0 : i32, i32, i32
  }
  func.func @transform_6(%arg0: i32, %arg1: i32) -> (i32, i32, i32) {
    %c0_i32 = arith.constant 0 : i32
    %c0_i32_0 = arith.constant 0 : i32
    %c0_i32_1 = arith.constant 0 : i32
    return %arg1, %c0_i32, %c0_i32_0 : i32, i32, i32
  }
  func.func @transform_7(%arg0: i32, %arg1: i32) -> (i32, i32, i32) {
    %c0_i32 = arith.constant 0 : i32
    %c0_i32_0 = arith.constant 0 : i32
    %c0_i32_1 = arith.constant 0 : i32
    return %arg1, %c0_i32, %c0_i32_0 : i32, i32, i32
  }
  func.func @transform_8(%arg0: i32, %arg1: i32) -> (i32, i32, i32) {
    %c0_i32 = arith.constant 0 : i32
    %c0_i32_0 = arith.constant 0 : i32
    %c0_i32_1 = arith.constant 0 : i32
    return %arg1, %c0_i32, %c0_i32_0 : i32, i32, i32
  }
  func.func @transform_9(%arg0: i32, %arg1: i32) -> (i32, i32, i32) {
    %c0_i32 = arith.constant 0 : i32
    %c0_i32_0 = arith.constant 0 : i32
    %c0_i32_1 = arith.constant 0 : i32
    return %arg1, %c0_i32, %c0_i32_0 : i32, i32, i32
  }
  func.func @transform_10(%arg0: i32, %arg1: i32) -> (i32, i32, i32) {
    %c0_i32 = arith.constant 0 : i32
    %c0_i32_0 = arith.constant 0 : i32
    %c0_i32_1 = arith.constant 0 : i32
    return %arg1, %c0_i32, %c0_i32_0 : i32, i32, i32
  }
  func.func @transform_11(%arg0: i32, %arg1: i32) -> (i32, i32, i32) {
    %c0_i32 = arith.constant 0 : i32
    %c0_i32_0 = arith.constant 0 : i32
    %c0_i32_1 = arith.constant 0 : i32
    return %arg1, %c0_i32, %c0_i32_0 : i32, i32, i32
  }
  func.func @transform_12(%arg0: i32, %arg1: i32) -> (i32, i32, i32) {
    %c0_i32 = arith.constant 0 : i32
    %c0_i32_0 = arith.constant 0 : i32
    %c0_i32_1 = arith.constant 0 : i32
    return %arg1, %c0_i32, %c0_i32_0 : i32, i32, i32
  }
  func.func @transform_13(%arg0: i32, %arg1: i32) -> (i32, i32, i32) {
    %c0_i32 = arith.constant 0 : i32
    %c0_i32_0 = arith.constant 0 : i32
    %c0_i32_1 = arith.constant 0 : i32
    return %arg1, %c0_i32, %c0_i32_0 : i32, i32, i32
  }
  func.func @transform_14(%arg0: i32, %arg1: i32) -> (i32, i32, i32) {
    %c0_i32 = arith.constant 0 : i32
    %c0_i32_0 = arith.constant 0 : i32
    %c0_i32_1 = arith.constant 0 : i32
    return %arg1, %c0_i32, %c0_i32_0 : i32, i32, i32
  }
  func.func @transform_15(%arg0: i32, %arg1: i32) -> (i32, i32, i32) {
    %c0_i32 = arith.constant 0 : i32
    %c0_i32_0 = arith.constant 0 : i32
    %c0_i32_1 = arith.constant 0 : i32
    return %arg1, %c0_i32, %c0_i32_0 : i32, i32, i32
  }
  func.func @transform_16(%arg0: i32, %arg1: i32) -> (i32, i32, i32) {
    %c0_i32 = arith.constant 0 : i32
    %c0_i32_0 = arith.constant 0 : i32
    %c0_i32_1 = arith.constant 0 : i32
    return %arg1, %c0_i32, %c0_i32_0 : i32, i32, i32
  }
  func.func @transform_17(%arg0: i32, %arg1: i32) -> (i32, i32, i32) {
    %c0_i32 = arith.constant 0 : i32
    %c0_i32_0 = arith.constant 0 : i32
    %c0_i32_1 = arith.constant 0 : i32
    return %arg1, %c0_i32, %c0_i32_0 : i32, i32, i32
  }
  func.func @transform_18(%arg0: i32, %arg1: i32) -> (i32, i32) {
    %c0_i32 = arith.constant 0 : i32
    %c0_i32_0 = arith.constant 0 : i32
    %c0_i32_1 = arith.constant 0 : i32
    return %c0_i32, %c0_i32_0 : i32, i32
  }
  func.func @transform_19(%arg0: i32, %arg1: i32) -> (i32, i32) {
    %c0_i32 = arith.constant 0 : i32
    %c0_i32_0 = arith.constant 0 : i32
    %c0_i32_1 = arith.constant 0 : i32
    return %c0_i32, %c0_i32_0 : i32, i32
  }
  func.func @transform_20(%arg0: i32, %arg1: i32) -> (i32, i32) {
    %c0_i32 = arith.constant 0 : i32
    %c0_i32_0 = arith.constant 0 : i32
    %c0_i32_1 = arith.constant 0 : i32
    return %c0_i32, %c0_i32_0 : i32, i32
  }
  func.func @transform_21(%arg0: i32, %arg1: i32) -> (i32, i32) {
    %c0_i32 = arith.constant 0 : i32
    %c0_i32_0 = arith.constant 0 : i32
    %c0_i32_1 = arith.constant 0 : i32
    return %c0_i32, %c0_i32_0 : i32, i32
  }
  func.func @transform_22(%arg0: i32, %arg1: i32) -> (i32, i32, i32) {
    %c0_i32 = arith.constant 0 : i32
    %c0_i32_0 = arith.constant 0 : i32
    %c0_i32_1 = arith.constant 0 : i32
    return %arg0, %c0_i32, %c0_i32_0 : i32, i32, i32
  }
}

</mosaic_0001>

<bundles_post_ra>
// kernel: tpu_custom_call.1
= control target key start
LH: loop header
LB: loop body
LE: loop exit
PB: predicated region body
PF: predicated region fallthrough
CT: control target
= control target key end

     0   :  { %s5795_s0 = inlined_call_operand.hbm [shape: bf16[2,8,32], index: 0, kind: input, shape index: {}]   ;;  %s5796_s1 = inlined_call_operand.hbm [shape: f32[2,1,8], index: 1, kind: input, shape index: {}]   ;;  %s5797_s2 = inlined_call_operand.hbm [shape: bf16[2,32,32], index: 2, kind: input, shape index: {}]   ;;  %s5798_s3 = inlined_call_operand.hbm [shape: f32[2,1,32], index: 3, kind: input, shape index: {}]   ;;  %s5799_s4 = inlined_call_operand.hbm [shape: bf16[2,32,32], index: 4, kind: input, shape index: {}]   ;;  %s5800_s5 = inlined_call_operand.hbm [shape: f32[2,1,32], index: 5, kind: input, shape index: {}]   ;;  %s5801_s6 = inlined_call_operand.hbm [shape: bf16[2,32,32], index: 6, kind: input, shape index: {}]   ;;  %s5802_s7 = inlined_call_operand.hbm [shape: f32[2,1,32], index: 7, kind: input, shape index: {}]   ;;  %s5803_s8 = inlined_call_operand.hbm [shape: bf16[2,32,32], index: 8, kind: input, shape index: {}]   ;;  %s5804_s9 = inlined_call_operand.hbm [shape: f32[2,1,32], index: 9, kind: input, shape index: {}]   ;;  %s5805_s10 = inlined_call_operand.hbm [shape: f32[2,1,32], index: 10, kind: input, shape index: {}]   ;;  %s5806_s11 = inlined_call_operand.hbm [shape: f32[2,1,32], index: 11, kind: input, shape index: {}]   ;;  %s5807_s12 = inlined_call_operand.hbm [shape: bf16[2,32,64], index: 12, kind: input, shape index: {}]   ;;  %s5808_s13 = inlined_call_operand.hbm [shape: f32[2,1,64], index: 13, kind: input, shape index: {}]   ;;  %s5809_s14 = inlined_call_operand.hbm [shape: bf16[2,64,32], index: 14, kind: input, shape index: {}]   ;;  %s5810_s15 = inlined_call_operand.hbm [shape: f32[2,1,32], index: 15, kind: input, shape index: {}]   ;;  %s5811_s16 = inlined_call_operand.hbm [shape: f32[2,1,32], index: 16, kind: input, shape index: {}]   ;;  %s5812_s17 = inlined_call_operand.hbm [shape: f32[2,1,32], index: 17, kind: input, shape index: {}]   ;;  %s5813_s18 = inlined_call_operand.hbm [shape: bf16[96,384], index: 18, kind: input, shape index: {}]   ;;  %s5814_s19 = inlined_call_operand.hbm [shape: f32[1,384], index: 19, kind: input, shape index: {}]   ;;  %s5815_s20 = inlined_call_operand.hbm [shape: bf16[128,128], index: 20, kind: input, shape index: {}]   ;;  %s5816_s21 = inlined_call_operand.hbm [shape: f32[1,128], index: 21, kind: input, shape index: {}]   ;;  %s5817_s22 = inlined_call_operand.hbm [shape: f32[2,8,128], index: 22, kind: output, shape index: {}]  }
   0x1   :  { %5872 = sst [smem:[#allocation69_spill]] %s5795_s0 }
   0x2   :  { %5873 = sst [smem:[#allocation70_spill]] %s5796_s1 }
   0x3   :  { %5874 = sst [smem:[#allocation71_spill]] %s5797_s2 }
   0x4   :  { %5875 = sst [smem:[#allocation72_spill]] %s5798_s3 }
   0x5   :  { %5876 = sst [smem:[#allocation73_spill]] %s5799_s4 }
   0x6   :  { %5877 = sst [smem:[#allocation74_spill]] %s5800_s5 }
   0x7   :  { %5878 = sst [smem:[#allocation75_spill]] %s5801_s6 }
   0x8   :  { %5879 = sst [smem:[#allocation76_spill]] %s5802_s7 }
   0x9   :  { %5880 = sst [smem:[#allocation77_spill]] %s5803_s8 }
   0xa   :  { %5881 = sst [smem:[#allocation78_spill]] %s5804_s9 }
   0xb   :  { %5882 = sst [smem:[#allocation79_spill]] %s5805_s10 }
   0xc   :  { %5883 = sst [smem:[#allocation80_spill]] %s5806_s11 }
   0xd   :  { %5884 = sst [smem:[#allocation81_spill]] %s5807_s12 }
   0xe   :  { %5885 = sst [smem:[#allocation82_spill]] %s5808_s13 }
   0xf   :  { %5886 = sst [smem:[#allocation83_spill]] %s5809_s14 }
  0x10   :  { %5887 = sst [smem:[#allocation84_spill]] %s5810_s15 }
  0x11   :  { %5888 = sst [smem:[#allocation85_spill]] %s5811_s16 }
  0x12   :  { %5889 = sst [smem:[#allocation86_spill]] %s5812_s17 }
  0x13   :  { %5890 = sst [smem:[#allocation87_spill]] %s5813_s18 }
  0x14   :  { %5891 = sst [smem:[#allocation88_spill]] %s5814_s19 }
  0x15   :  { %5892 = sst [smem:[#allocation89_spill]] %s5815_s20 }
  0x16   :  { %5893 = sst [smem:[#allocation90_spill]] %s5816_s21 }
  0x17   :  { %5894 = sst [smem:[#allocation91_spill]] %s5817_s22 }
  0x18   :  { %27 = vsyncpa [#allocation4], 0 }
  0x19   :  { %29 = vsyncpa [#allocation4 + $0x1], 0 }
  0x1a   :  { %30 = vsyncpa [#allocation7], 0 }
  0x1b   :  { %32 = vsyncpa [#allocation7 + $0x1], 0 }
  0x1c   :  { %33 = vsyncpa [#allocation10], 0 }
  0x1d   :  { %35 = vsyncpa [#allocation10 + $0x1], 0 }
  0x1e   :  { %36 = vsyncpa [#allocation13], 0 }
  0x1f   :  { %38 = vsyncpa [#allocation13 + $0x1], 0 }
  0x20   :  { %39 = vsyncpa [#allocation16], 0 }
  0x21   :  { %41 = vsyncpa [#allocation16 + $0x1], 0 }
  0x22   :  { %42 = vsyncpa [#allocation19], 0 }
  0x23   :  { %44 = vsyncpa [#allocation19 + $0x1], 0 }
  0x24   :  { %45 = vsyncpa [#allocation22], 0 }
  0x25   :  { %47 = vsyncpa [#allocation22 + $0x1], 0 }
  0x26   :  { %48 = vsyncpa [#allocation25], 0 }
  0x27   :  { %50 = vsyncpa [#allocation25 + $0x1], 0 }
  0x28   :  { %51 = vsyncpa [#allocation28], 0 }
  0x29   :  { %53 = vsyncpa [#allocation28 + $0x1], 0 }
  0x2a   :  { %54 = vsyncpa [#allocation31], 0 }
  0x2b   :  { %56 = vsyncpa [#allocation31 + $0x1], 0 }
  0x2c   :  { %57 = vsyncpa [#allocation34], 0 }
  0x2d   :  { %58 = vsyncpa [#allocation37], 0 }
  0x2e   :  { %59 = vsyncpa [#allocation5], 0 }
  0x2f   :  { %61 = vsyncpa [#allocation5 + $0x1], 0  ;;  %s4682_s3 = smov 0   ;;  %s4684_s28 = smov 0  }
  0x30   :  { %s4686_s29 = smov 0   ;;  %s4688_s30 = smov 0  }
  0x31   :  { %s4690_s4 = smov 0   ;;  %s4692_s0 = smov 0  }
  0x32   :  { %s4694_s23 = smov 0   ;;  %s4696_s1 = smov 0  }
  0x33   :  { %s4698_s5 = smov 0   ;;  %s4700_s24 = smov 0  }
  0x34   :  { %s4702_s6 = smov 0  }
  0x35 LB: > { %5895 = sst [smem:[#allocation54_spill]] %s4487_s28  ;;  %s4738_s25 = sadd.s32 4294967295, %s4523_s6   ;;  %s4523_s6 = sphi %s4702_s6, %s67_s6   ;;  %s4519_s24 = sphi %s4700_s24, %s6010_s24   ;;  %s4515_s5 = sphi %s4698_s5, %s6009_s5   ;;  %s4511_s1 = sphi %s4696_s1, %s6008_s1   ;;  %s4507_s23 = sphi %s4694_s23, %s6007_s23   ;;  %s4503_s0 = sphi %s4692_s0, %s6006_s0   ;;  %s4499_s4 = sphi %s4690_s4, %s6005_s4   ;;  %s4495_s30 = sphi %s4688_s30, %s5999_s30   ;;  %s4491_s29 = sphi %s4686_s29, %s6004_s29   ;;  %s4487_s28 = sphi %s4684_s28, %s6003_s28   ;;  %s4483_s3 = sphi %s4682_s3, %s5997_s3  }
  0x36   : > { %5896 = sst [smem:[#allocation55_spill]] %s4495_s30  ;;  %s3155_s26 = sadd.s32 4294967294, %s4523_s6  }
  0x37   : > { %5897 = sst [smem:[#allocation56_spill]] %s4499_s4  ;;  %s76_s2 = sadd.s32 1, %s4515_s5 }
  0x38   : > { %5898 = sst [smem:[#allocation57_spill]] %s4507_s23  ;;  %s79_s27 = sadd.s32 1, %s4519_s24 }
  0x39   : > { %5899 = sst [smem:[#allocation58_spill]] %s4511_s1  ;;  %p77_p0 = scmp.ge.s32.totalorder %s76_s2, 2 }
  0x3a   : > { %5900 = sst [smem:[#allocation59_spill]] %s4738_s25  ;;  %s86_s22 = sadd.s32 1, %s4503_s0 }
  0x3b   : > { %p5834_p1 = scmp.ne.s32.totalorder %s4503_s0, %s4499_s4  ;;  %p94_p2 = scmp.eq.s32.totalorder %s4523_s6, 0 }
  0x3c   : > { %s6012_s2 = smov (%p77_p0, %s76_s2), 0  ;;  %s6014_s27 = smov (!%p77_p0, %s79_s27), %s4519_s24 }
  0x3d   : > { %5901 = sst [smem:[#allocation60_spill]] %s6012_s2  ;;  %p4755_p3 = por %p94_p2, %p5834_p1 }
  0x3e   : > { %p5833_p4 = scmp.ne.s32.totalorder %s4499_s4, %s4495_s30  ;;  %p81_p5 = scmp.ge.s32.totalorder %s6014_s27, 2 }
  0x3f   : > { %s5902_s1 = scalar_select %p4755_p3, 1, 0 }
  0x40   : > { %p5847_p6 = scmp.eq.s32.totalorder %s4738_s25, 0  ;;  %s135_s23 = ssub.s32 %s4515_s5, %s6012_s2 }
  0x41   : > { %s138_s17 = sadd.s32 1, %s4491_s29  ;;  %s6016_s27 = smov (%p81_p5, %s6014_s27), 0 }
  0x42   : > { %5903 = sst [smem:[#allocation61_spill]] %s6016_s27  ;;  %p4772_p7 = por %p5847_p6, %p5833_p4 }
  0x43   : > { %p136_p8 = scmp.eq.s32.totalorder %s135_s23, 0  ;;  %s83_s14 = ssub.s32 %s4519_s24, %s6016_s27 }
  0x44   : > { %s5904_s16 = scalar_select %p4772_p7, 1, 0 }
  0x45   : > { %p145_p9 = scmp.ne.s32.totalorder %s4491_s29, %s4487_s28  ;;  %p84_p10 = scmp.eq.s32.totalorder %s83_s14, 0 }
  0x46   : > { %5905 = sst [smem:[#allocation62_spill]] %s5904_s16  ;;  %p151_p11 = scmp.ne.s32.totalorder %s4487_s28, %s4483_s3 }
  0x47   : > { %s4783_s2 = scalar_select %p136_p8, %s4491_s29, %s138_s17  }
  0x48   : > { %s4786_s12 = scalar_select %p84_p10, %s4503_s0, %s86_s22  }
  0x49   : > { %5906 = sst [smem:[#allocation63_spill]] %s4783_s2  ;;  %p4790_p12 = por %p145_p9, %p94_p2 }
  0x4a   : > { %5907 = sst [smem:[#allocation64_spill]] %s4786_s12  ;;  %p4796_p13 = por %p151_p11, %p5847_p6 }
  0x4b   : > { %s5908_s10 = scalar_select %p4790_p12, 1, 0 }
  0x4c   : > { %s5909_s8 = scalar_select %p4796_p13, 1, 0 }
  0x4d   : > { %p649_p0 = scmp.eq.s32.totalorder %s4738_s25, 3  ;;  %p655_p5 = scmp.eq.s32.totalorder %s3155_s26, 3 }
  0x4e   : > { %5910 = sst [smem:[#allocation65_spill]] %s5909_s8  ;;  %p3156_p4 = scmp.ge.s32.totalorder %s4523_s6, 1 }
  0x4f   : > { %p662_p1 = scmp.lt.s32.totalorder %s4523_s6, 5  ;;  %p5911_p7 = scmp.ne.s32.totalorder %s4503_s0, %s4499_s4 }
  0x50   : > { %p5914_p8 = scmp.ne.s32.totalorder %s4499_s4, %s4495_s30  ;;  %s4525_s3 = smov [#allocation33]  }
  0x51   : > { %p4806_p3 = por %p649_p0, %p5911_p7  ;;  %p4817_p2 = pnand %p3156_p4, %p662_p1 }
  0x52   : > { %p4813_p10 = por %p655_p5, %p5914_p8  ;;  %s688_s23 = sshll.u32 %s4525_s3, 4  ;;  %s689_s23 = int_to_ptr.vmem [resolvable:$true] %s688_s23 }
  0x53   : > { %s5912_s14 = scalar_select %p4806_p3, 1, 0 }
  0x54   : > { %s5915_s17 = scalar_select %p4813_p10, 1, 0 }
  0x55   : > { %5913 = sst [smem:[#allocation66_spill]] %s5912_s14  ;;  %p3528_p9 = pneg %p4817_p2 }
  0x56   : > { %5916 = sst [smem:[#allocation67_spill]] %s5915_s17  ;;  %s4526_s27 = smov [#allocation32]  }
  0x57   : > { %s5917_s22 = scalar_select %p4817_p2, 1, 0 }
  0x58   : > { %p4825_p7 = pnand %p3528_p9, %p5847_p6  ;;  %s674_s12 = sshll.u32 %s4526_s27, 4  ;;  %s675_s12 = int_to_ptr.vmem [resolvable:$true] %s674_s12 }
  0x59   : > { %5918 = sst [smem:[#allocation68_spill]] %s5917_s22  ;;  %s5920_s19 = sld [smem:[#allocation88_spill]] }
  0x5a   : > { %p4837_p4 = pneg %p4825_p7 }
  0x5f   : > { %s3733_s30 = scalar_lea.hbm %s5920_s19, 48 }
  0x60   : > { %p3734_p1 = scmp.ne.s32.totalorder %s5920_s19, %s3733_s30  ;;  %p3740_p5 = scmp.lt.u32.totalorder %s3733_s30, %s5920_s19 }
  0x62   : > { %p3736_p11 = pnand %p4837_p4, %p3734_p1 }
  0x64   : > { %p3737_p0 = pneg %p3736_p11 }
  0x66   : > { %p3742_p8 = pnand %p3740_p5, %p3737_p0 }
  0x68   : > { %3745 = shalt.err (!%p3742_p8)
}
  0x69   : > { %s3746_s2 = scalar_lea.vmem %s689_s23, 48  ;;  %s3753_s8 = scalar_lea.vmem %s689_s23, 64 }
  0x6a   : > { %p3747_p9 = scmp.ne.s32.totalorder %s689_s23, %s3746_s2  ;;  %p3754_p3 = scmp.lt.s32.totalorder %s689_s23, %s689_s23 }
  0x6b   : > { %p3755_p13 = scmp.lt.s32.totalorder %s3753_s8, %s3746_s2 }
  0x6c   : > { %p3749_p6 = pnand %p3747_p9, %p4837_p4 }
  0x6d   : > { %p3756_p2 = por %p3755_p13, %p3754_p3 }
  0x6e   : > { %p3750_p10 = pneg %p3749_p6 }
  0x70   : > { %p3757_p12 = pnand %p3756_p2, %p3750_p10 }
  0x72   : > { %3760 = shalt.err (!%p3757_p12)
}
  0x73   : > { %3534 = dma.hbm_to_vmem [thread:$0]  (!%p4825_p7), %s5920_s19, 48, %s689_s23, [#allocation34]  }
  0x74   : > { %s5922_s18 = sld [smem:[#allocation87_spill]] }
  0x7a   : > { %s3761_s25 = scalar_lea.hbm %s5922_s18, 2304 }
  0x7b   : > { %p3762_p6 = scmp.ne.s32.totalorder %s5922_s18, %s3761_s25  ;;  %p3768_p12 = scmp.lt.u32.totalorder %s3761_s25, %s5922_s18 }
  0x7d   : > { %p3764_p3 = pnand %p3762_p6, %p4837_p4 }
  0x7f   : > { %p3765_p13 = pneg %p3764_p3 }
  0x81   : > { %p3770_p10 = pnand %p3768_p12, %p3765_p13 }
  0x83   : > { %3773 = shalt.err (!%p3770_p10)
}
  0x84   : > { %s3774_s27 = scalar_lea.vmem %s675_s12, 2304  ;;  %p3782_p0 = scmp.lt.s32.totalorder %s675_s12, %s675_s12 }
  0x85   : > { %p3775_p2 = scmp.ne.s32.totalorder %s675_s12, %s3774_s27  ;;  %p3783_p5 = scmp.lt.s32.totalorder %s3774_s27, %s3774_s27 }
  0x87   : > { %p3777_p1 = pnand %p3775_p2, %p4837_p4  ;;  %p3784_p8 = por %p3783_p5, %p3782_p0 }
  0x89   : > { %p3778_p11 = pneg %p3777_p1 }
  0x8b   : > { %p3785_p9 = pnand %p3784_p8, %p3778_p11 }
  0x8d   : > { %3788 = shalt.err (!%p3785_p9)
}
  0x8e   : > { %s4527_s16 = smov 192   ;;  %s4528_s23 = smov 12  }
  0x8f   : > { %3531 = dma.hbm_to_vmem [thread:$0]  (!%p4825_p7), %s5922_s18, 2304, %s675_s12, [#allocation31], %s4527_s16, %s4527_s16, %s4528_s23  }
  0x90   : > { %s4529_s30 = smov [#allocation35]   ;;  %s5923_s20 = sld [smem:[#allocation89_spill]] }
  0x91   : > { %s698_s25 = sshll.u32 %s4529_s30, 4  ;;  %s699_s25 = int_to_ptr.vmem [resolvable:$true] %s698_s25 }
  0x96   : > { %s3789_s8 = scalar_lea.hbm %s5923_s20, 1024 }
  0x97   : > { %p3790_p6 = scmp.ne.s32.totalorder %s5923_s20, %s3789_s8  ;;  %p3796_p12 = scmp.lt.u32.totalorder %s3789_s8, %s5923_s20 }
  0x99   : > { %p3792_p3 = pnand %p3790_p6, %p4837_p4 }
  0x9b   : > { %p3793_p13 = pneg %p3792_p3 }
  0x9d   : > { %p3798_p10 = pnand %p3796_p12, %p3793_p13 }
  0x9f   : > { %3801 = shalt.err (!%p3798_p10)
}
  0xa0   : > { %s3802_s12 = scalar_lea.vmem %s699_s25, 1024  ;;  %p3810_p0 = scmp.lt.s32.totalorder %s699_s25, %s699_s25 }
  0xa1   : > { %p3803_p2 = scmp.ne.s32.totalorder %s699_s25, %s3802_s12  ;;  %p3811_p5 = scmp.lt.s32.totalorder %s3802_s12, %s3802_s12 }
  0xa3   : > { %p3805_p1 = pnand %p3803_p2, %p4837_p4  ;;  %p3812_p8 = por %p3811_p5, %p3810_p0 }
  0xa5   : > { %p3806_p11 = pneg %p3805_p1 }
  0xa7   : > { %p3813_p9 = pnand %p3812_p8, %p3806_p11 }
  0xa9   : > { %3816 = shalt.err (!%p3813_p9)
}
  0xaa   : > { %s4530_s19 = smov 64   ;;  %s4531_s16 = smov 4  }
  0xab   : > { %3537 = dma.hbm_to_vmem [thread:$0]  (!%p4825_p7), %s5923_s20, 1024, %s699_s25, [#allocation34], %s4530_s19, %s4530_s19, %s4531_s16  }
  0xac   : > { %s4532_s23 = smov [#allocation36]   ;;  %s5924_s21 = sld [smem:[#allocation90_spill]] }
  0xad   : > { %s712_s14 = sshll.u32 %s4532_s23, 4  ;;  %s713_s14 = int_to_ptr.vmem [resolvable:$true] %s712_s14 }
  0xb2   : > { %s3817_s17 = scalar_lea.hbm %s5924_s21, 16 }
  0xb3   : > { %p3818_p6 = scmp.ne.s32.totalorder %s5924_s21, %s3817_s17  ;;  %p3824_p12 = scmp.lt.u32.totalorder %s3817_s17, %s5924_s21 }
  0xb5   : > { %p3820_p3 = pnand %p3818_p6, %p4837_p4 }
  0xb7   : > { %p3821_p13 = pneg %p3820_p3 }
  0xb9   : > { %p3826_p10 = pnand %p3824_p12, %p3821_p13 }
  0xbb   : > { %3829 = shalt.err (!%p3826_p10)
}
  0xbc   : > { %s3830_s25 = scalar_lea.vmem %s713_s14, 16  ;;  %s3837_s19 = scalar_lea.vmem %s713_s14, 32 }
  0xbd   : > { %p3831_p2 = scmp.ne.s32.totalorder %s713_s14, %s3830_s25  ;;  %p3838_p0 = scmp.lt.s32.totalorder %s713_s14, %s713_s14 }
  0xbe   : > { %p3839_p5 = scmp.lt.s32.totalorder %s3837_s19, %s3830_s25 }
  0xbf   : > { %p3833_p1 = pnand %p3831_p2, %p4837_p4 }
  0xc0   : > { %p3840_p8 = por %p3839_p5, %p3838_p0 }
  0xc1   : > { %p3834_p11 = pneg %p3833_p1 }
  0xc3   : > { %p3841_p9 = pnand %p3840_p8, %p3834_p11 }
  0xc5   : > { %3844 = shalt.err (!%p3841_p9)
}
  0xc6   : > { %3540 = dma.hbm_to_vmem [thread:$0]  (!%p4825_p7), %s5924_s21, 16, %s713_s14, [#allocation37]  }
  0xc7   : > { %p3161_p6 = scmp.ge.s32.totalorder %s4523_s6, 4 }
  0xc8   : > { %s4909_s3 = sand.u32 (!%p3161_p6), 1, %s4503_s0   ;;  %s4912_s22 = sand.u32 (!%p3161_p6), 1, %s4523_s6  }
  0xc9   : > { %719 = sbr.rel (%p3161_p6) target bundleno = 696 (0x2b8), region = 32  ;;  %s3164_s23 = sshll.u32 (!%p3161_p6), %s4519_s24, 4 }
  0xca   : > { %s744_s28 = scalar_lea.vmem (!%p3161_p6), [#allocation6], %s4909_s3  ;;  %s5925_s2 = sld [smem:[#allocation70_spill]] (!%p3161_p6) }
  0xcb   : > { %s751_s26 = sshll.u32 (!%p3161_p6), %s744_s28, 4  ;;  %s5856_s8 = scalar_lea.sflag (!%p3161_p6), [#allocation7], %s4912_s22  ;;  %s752_s26 = int_to_ptr.vmem [resolvable:$true] %s751_s26 }
  0xcc   : > { %p5926_p4 = scmp.ne.s32.totalorder (!%p3161_p6), %s5902_s1, 0 }
  0xd0   : > { %s4919_s14 = scalar_lea.hbm %s5925_s2, %s3164_s23  ;;  %s3849_s19 = scalar_lea.hbm %s5925_s2, 32 }
  0xd1   : > { %s3845_s27 = scalar_lea.hbm %s4919_s14, 16  ;;  %p3850_p12 = scmp.lt.u32.totalorder %s4919_s14, %s5925_s2 }
  0xd2   : > { %p3846_p7 = scmp.ne.s32.totalorder %s4919_s14, %s3845_s27  ;;  %p3851_p10 = scmp.lt.u32.totalorder %s3849_s19, %s3845_s27 }
  0xd3   : > { %p3853_p1 = scmp.lt.u32.totalorder %s3845_s27, %s4919_s14 }
  0xd4   : > { %p3847_p3 = pnand %p3846_p7, %p5926_p4  ;;  %p3852_p2 = por %p3851_p10, %p3850_p12 }
  0xd6   : > { %p3848_p13 = pneg %p3847_p3  ;;  %p3854_p11 = por %p3853_p1, %p3852_p2 }
  0xd8   : > { %p3855_p0 = pnand %p3854_p11, %p3848_p13 }
  0xda   : > { %3858 = shalt.err (!%p3855_p0)
}
  0xdb   : > { %s3859_s23 = scalar_lea.vmem %s752_s26, 16  ;;  %s4533_s28 = smov [#allocation6]  }
  0xdc   : > { %p3860_p5 = scmp.ne.s32.totalorder %s752_s26, %s3859_s23  ;;  %s3863_s30 = sshll.u32 %s4533_s28, 4  ;;  %s3864_s30 = int_to_ptr.vmem [resolvable:$false] %s3863_s30 }
  0xdd   : > { %s3865_s17 = scalar_lea.vmem %s3864_s30, 32  ;;  %p3866_p6 = scmp.lt.s32.totalorder %s752_s26, %s3864_s30 }
  0xde   : > { %p3861_p8 = pnand %p3860_p5, %p5926_p4  ;;  %p3867_p7 = scmp.lt.s32.totalorder %s3865_s17, %s3859_s23 }
  0xe0   : > { %p3862_p9 = pneg %p3861_p8  ;;  %p3868_p3 = por %p3867_p7, %p3866_p6 }
  0xe2   : > { %p3869_p10 = pnand %p3868_p3, %p3862_p9 }
  0xe4   : > { %3872 = shalt.err (!%p3869_p10)
}
  0xe5   : > { %3483 = dma.hbm_to_vmem [thread:$0]  (%p5926_p4), %s4919_s14, 16, %s752_s26, %s5856_s8  }
  0xe6   : > { %s4942_s27 = sand.u32 1, %s4491_s29   ;;  %s4945_s12 = sshll.u32 %s4515_s5, 4 }
  0xe7   : > { %s5927_s16 = sld [smem:[#allocation72_spill]]  ;;  %s782_s23 = scalar_lea.vmem [#allocation9], %s4942_s27 }
  0xe8   : > { %s789_s28 = sshll.u32 %s782_s23, 4  ;;  %p5928_p12 = scmp.ne.s32.totalorder %s5908_s10, 0  ;;  %s790_s28 = int_to_ptr.vmem [resolvable:$true] %s789_s28 }
  0xed   : > { %s4951_s4 = scalar_lea.hbm %s5927_s16, %s4945_s12  ;;  %s3877_s8 = scalar_lea.hbm %s5927_s16, 32 }
  0xee   : > { %s3873_s26 = scalar_lea.hbm %s4951_s4, 16  ;;  %p3878_p11 = scmp.lt.u32.totalorder %s4951_s4, %s5927_s16 }
  0xef   : > { %p3874_p13 = scmp.ne.s32.totalorder %s4951_s4, %s3873_s26  ;;  %p3879_p0 = scmp.lt.u32.totalorder %s3877_s8, %s3873_s26 }
  0xf0   : > { %p3881_p8 = scmp.lt.u32.totalorder %s3873_s26, %s4951_s4 }
  0xf1   : > { %p3875_p2 = pnand %p3874_p13, %p5928_p12  ;;  %p3880_p5 = por %p3879_p0, %p3878_p11 }
  0xf3   : > { %p3876_p1 = pneg %p3875_p2  ;;  %p3882_p9 = por %p3881_p8, %p3880_p5 }
  0xf5   : > { %p3883_p6 = pnand %p3882_p9, %p3876_p1 }
  0xf7   : > { %3886 = shalt.err (!%p3883_p6)
}
  0xf8   : > { %s3887_s23 = scalar_lea.vmem %s790_s28, 16  ;;  %s4534_s30 = smov [#allocation9]  }
  0xf9   : > { %p3888_p7 = scmp.ne.s32.totalorder %s790_s28, %s3887_s23  ;;  %s3891_s2 = sshll.u32 %s4534_s30, 4  ;;  %s3892_s2 = int_to_ptr.vmem [resolvable:$false] %s3891_s2 }
  0xfa   : > { %s3893_s14 = scalar_lea.vmem %s3892_s2, 32  ;;  %p3894_p13 = scmp.lt.s32.totalorder %s790_s28, %s3892_s2 }
  0xfb   : > { %p3889_p3 = pnand %p3888_p7, %p5928_p12  ;;  %p3895_p2 = scmp.lt.s32.totalorder %s3893_s14, %s3887_s23 }
  0xfd   : > { %p3890_p10 = pneg %p3889_p3  ;;  %p3896_p4 = por %p3895_p2, %p3894_p13 }
  0xff   : > { %p3897_p0 = pnand %p3896_p4, %p3890_p10 }
 0x101   : > { %3900 = shalt.err (!%p3897_p0)
}
 0x102   : > { %s5929_s8 = scalar_lea.sflag [#allocation10], %s4912_s22  ;;  %s5930_s30 = sld [smem:[#allocation74_spill]] }
 0x103   : > { %3485 = dma.hbm_to_vmem [thread:$0]  (%p5928_p12), %s4951_s4, 16, %s790_s28, %s5929_s8  }
 0x104   : > { %s820_s2 = scalar_lea.vmem [#allocation12], %s4942_s27  ;;  %s5860_s14 = scalar_lea.sflag [#allocation13], %s4912_s22 }
 0x105   : > { %s827_s23 = sshll.u32 %s820_s2, 4  ;;  %s828_s23 = int_to_ptr.vmem [resolvable:$true] %s827_s23 }
 0x108   : > { %s5931_s25 = smov %s5930_s30  ;;  %s4978_s19 = scalar_lea.hbm %s5930_s30, %s4945_s12 }
 0x109   : > { %s3901_s16 = scalar_lea.hbm %s4978_s19, 16  ;;  %s3905_s28 = scalar_lea.hbm %s5931_s25, 32 }
 0x10a   : > { %p3902_p4 = scmp.ne.s32.totalorder %s4978_s19, %s3901_s16  ;;  %p3906_p5 = scmp.lt.u32.totalorder %s4978_s19, %s5931_s25 }
 0x10b   : > { %p3907_p8 = scmp.lt.u32.totalorder %s3905_s28, %s3901_s16  ;;  %p3909_p6 = scmp.lt.u32.totalorder %s3901_s16, %s4978_s19 }
 0x10c   : > { %p3903_p1 = pnand %p3902_p4, %p5928_p12 }
 0x10d   : > { %p3908_p9 = por %p3907_p8, %p3906_p5 }
 0x10e   : > { %p3904_p11 = pneg %p3903_p1 }
 0x10f   : > { %p3910_p7 = por %p3909_p6, %p3908_p9 }
 0x111   : > { %p3911_p3 = pnand %p3910_p7, %p3904_p11 }
 0x113   : > { %3914 = shalt.err (!%p3911_p3)
}
 0x114   : > { %s3915_s17 = scalar_lea.vmem %s828_s23, 16  ;;  %s4535_s30 = smov [#allocation12]  }
 0x115   : > { %p3916_p10 = scmp.ne.s32.totalorder %s828_s23, %s3915_s17  ;;  %s3919_s2 = sshll.u32 %s4535_s30, 4  ;;  %s3920_s2 = int_to_ptr.vmem [resolvable:$false] %s3919_s2 }
 0x116   : > { %s3921_s18 = scalar_lea.vmem %s3920_s2, 32  ;;  %p3922_p0 = scmp.lt.s32.totalorder %s828_s23, %s3920_s2 }
 0x117   : > { %p3917_p13 = pnand %p3916_p10, %p5928_p12  ;;  %p3923_p4 = scmp.lt.s32.totalorder %s3921_s18, %s3915_s17 }
 0x119   : > { %p3918_p2 = pneg %p3917_p13  ;;  %p3924_p1 = por %p3923_p4, %p3922_p0 }
 0x11b   : > { %p3925_p5 = pnand %p3924_p1, %p3918_p2 }
 0x11d   : > { %3928 = shalt.err (!%p3925_p5)
}
 0x11e   : > { %3487 = dma.hbm_to_vmem [thread:$0]  (%p5928_p12), %s4978_s19, 16, %s828_s23, %s5860_s14  }
 0x11f   : > { %s5932_s7 = sld [smem:[#allocation76_spill]]  ;;  %s858_s8 = scalar_lea.vmem [#allocation15], %s4942_s27 }
 0x120   : > { %s865_s26 = sshll.u32 %s858_s8, 4  ;;  %s5861_s17 = scalar_lea.sflag [#allocation16], %s4912_s22  ;;  %s866_s26 = int_to_ptr.vmem [resolvable:$true] %s865_s26 }
 0x125   : > { %s5005_s28 = scalar_lea.hbm %s5932_s7, %s4945_s12  ;;  %s3933_s23 = scalar_lea.hbm %s5932_s7, 32 }
 0x126   : > { %s3929_s30 = scalar_lea.hbm %s5005_s28, 16  ;;  %p3934_p6 = scmp.lt.u32.totalorder %s5005_s28, %s5932_s7 }
 0x127   : > { %p3930_p11 = scmp.ne.s32.totalorder %s5005_s28, %s3929_s30  ;;  %p3935_p7 = scmp.lt.u32.totalorder %s3933_s23, %s3929_s30 }
 0x128   : > { %p3937_p10 = scmp.lt.u32.totalorder %s3929_s30, %s5005_s28 }
 0x129   : > { %p3931_p8 = pnand %p3930_p11, %p5928_p12  ;;  %p3936_p3 = por %p3935_p7, %p3934_p6 }
 0x12b   : > { %p3932_p9 = pneg %p3931_p8  ;;  %p3938_p13 = por %p3937_p10, %p3936_p3 }
 0x12d   : > { %p3939_p2 = pnand %p3938_p13, %p3932_p9 }
 0x12f   : > { %3942 = shalt.err (!%p3939_p2)
}
 0x130   : > { %s3943_s4 = scalar_lea.vmem %s866_s26, 16  ;;  %s4536_s8 = smov [#allocation15]  }
 0x131   : > { %p3944_p0 = scmp.ne.s32.totalorder %s866_s26, %s3943_s4  ;;  %s3947_s14 = sshll.u32 %s4536_s8, 4  ;;  %s3948_s14 = int_to_ptr.vmem [resolvable:$false] %s3947_s14 }
 0x132   : > { %s3949_s2 = scalar_lea.vmem %s3948_s14, 32  ;;  %p3950_p5 = scmp.lt.s32.totalorder %s866_s26, %s3948_s14 }
 0x133   : > { %p3945_p4 = pnand %p3944_p0, %p5928_p12  ;;  %p3951_p11 = scmp.lt.s32.totalorder %s3949_s2, %s3943_s4 }
 0x135   : > { %p3946_p1 = pneg %p3945_p4  ;;  %p3952_p8 = por %p3951_p11, %p3950_p5 }
 0x137   : > { %p3953_p6 = pnand %p3952_p8, %p3946_p1 }
 0x139   : > { %3956 = shalt.err (!%p3953_p6)
}
 0x13a   : > { %3489 = dma.hbm_to_vmem [thread:$0]  (%p5928_p12), %s5005_s28, 16, %s866_s26, %s5861_s17  }
 0x13b   : > { %s5933_s9 = sld [smem:[#allocation78_spill]]  ;;  %s896_s14 = scalar_lea.vmem [#allocation18], %s4942_s27 }
 0x13c   : > { %s903_s18 = sshll.u32 %s896_s14, 4  ;;  %s5862_s16 = scalar_lea.sflag [#allocation19], %s4912_s22  ;;  %s904_s18 = int_to_ptr.vmem [resolvable:$true] %s903_s18 }
 0x141   : > { %s5032_s23 = scalar_lea.hbm %s5933_s9, %s4945_s12  ;;  %s3961_s26 = scalar_lea.hbm %s5933_s9, 32 }
 0x142   : > { %s3957_s4 = scalar_lea.hbm %s5032_s23, 16  ;;  %p3962_p10 = scmp.lt.u32.totalorder %s5032_s23, %s5933_s9 }
 0x143   : > { %p3958_p9 = scmp.ne.s32.totalorder %s5032_s23, %s3957_s4  ;;  %p3963_p13 = scmp.lt.u32.totalorder %s3961_s26, %s3957_s4 }
 0x144   : > { %p3965_p0 = scmp.lt.u32.totalorder %s3957_s4, %s5032_s23 }
 0x145   : > { %p3959_p7 = pnand %p3958_p9, %p5928_p12  ;;  %p3964_p2 = por %p3963_p13, %p3962_p10 }
 0x147   : > { %p3960_p3 = pneg %p3959_p7  ;;  %p3966_p4 = por %p3965_p0, %p3964_p2 }
 0x149   : > { %p3967_p1 = pnand %p3966_p4, %p3960_p3 }
 0x14b   : > { %3970 = shalt.err (!%p3967_p1)
}
 0x14c   : > { %s3971_s19 = scalar_lea.vmem %s904_s18, 16  ;;  %s4537_s14 = smov [#allocation18]  }
 0x14d   : > { %p3972_p5 = scmp.ne.s32.totalorder %s904_s18, %s3971_s19  ;;  %s3975_s17 = sshll.u32 %s4537_s14, 4  ;;  %s3976_s17 = int_to_ptr.vmem [resolvable:$false] %s3975_s17 }
 0x14e   : > { %s3977_s8 = scalar_lea.vmem %s3976_s17, 32  ;;  %p3978_p6 = scmp.lt.s32.totalorder %s904_s18, %s3976_s17 }
 0x14f   : > { %p3973_p11 = pnand %p3972_p5, %p5928_p12  ;;  %p3979_p9 = scmp.lt.s32.totalorder %s3977_s8, %s3971_s19 }
 0x151   : > { %p3974_p8 = pneg %p3973_p11  ;;  %p3980_p7 = por %p3979_p9, %p3978_p6 }
 0x153   : > { %p3981_p10 = pnand %p3980_p7, %p3974_p8 }
 0x155   : > { %3984 = shalt.err (!%p3981_p10)
}
 0x156   : > { %3491 = dma.hbm_to_vmem [thread:$0]  (%p5928_p12), %s5032_s23, 16, %s904_s18, %s5862_s16  }
 0x157   : > { %s5934_s11 = sld [smem:[#allocation80_spill]]  ;;  %s930_s17 = scalar_lea.vmem [#allocation21], %s4942_s27 }
 0x158   : > { %s937_s2 = sshll.u32 %s930_s17, 4  ;;  %s5863_s30 = scalar_lea.sflag [#allocation22], %s4912_s22  ;;  %s938_s2 = int_to_ptr.vmem [resolvable:$true] %s937_s2 }
 0x15d   : > { %s5059_s26 = scalar_lea.hbm %s5934_s11, %s4945_s12  ;;  %s3989_s18 = scalar_lea.hbm %s5934_s11, 32 }
 0x15e   : > { %s3985_s19 = scalar_lea.hbm %s5059_s26, 16  ;;  %p3990_p0 = scmp.lt.u32.totalorder %s5059_s26, %s5934_s11 }
 0x15f   : > { %p3986_p3 = scmp.ne.s32.totalorder %s5059_s26, %s3985_s19  ;;  %p3991_p4 = scmp.lt.u32.totalorder %s3989_s18, %s3985_s19 }
 0x160   : > { %p3993_p5 = scmp.lt.u32.totalorder %s3985_s19, %s5059_s26 }
 0x161   : > { %p3987_p13 = pnand %p3986_p3, %p5928_p12  ;;  %p3992_p1 = por %p3991_p4, %p3990_p0 }
 0x163   : > { %p3988_p2 = pneg %p3987_p13  ;;  %p3994_p11 = por %p3993_p5, %p3992_p1 }
 0x165   : > { %p3995_p8 = pnand %p3994_p11, %p3988_p2 }
 0x167   : > { %3998 = shalt.err (!%p3995_p8)
}
 0x168   : > { %s3999_s28 = scalar_lea.vmem %s938_s2, 16  ;;  %s4538_s17 = smov [#allocation21]  }
 0x169   : > { %p4000_p6 = scmp.ne.s32.totalorder %s938_s2, %s3999_s28  ;;  %s4003_s16 = sshll.u32 %s4538_s17, 4  ;;  %s4004_s16 = int_to_ptr.vmem [resolvable:$false] %s4003_s16 }
 0x16a   : > { %s4005_s14 = scalar_lea.vmem %s4004_s16, 32  ;;  %p4006_p10 = scmp.lt.s32.totalorder %s938_s2, %s4004_s16 }
 0x16b   : > { %p4001_p9 = pnand %p4000_p6, %p5928_p12  ;;  %p4007_p3 = scmp.lt.s32.totalorder %s4005_s14, %s3999_s28 }
 0x16d   : > { %p4002_p7 = pneg %p4001_p9  ;;  %p4008_p13 = por %p4007_p3, %p4006_p10 }
 0x16f   : > { %p4009_p0 = pnand %p4008_p13, %p4002_p7 }
 0x171   : > { %4012 = shalt.err (!%p4009_p0)
}
 0x172   : > { %3493 = dma.hbm_to_vmem [thread:$0]  (%p5928_p12), %s5059_s26, 16, %s938_s2, %s5863_s30  }
 0x173   : > { %s5935_s13 = sld [smem:[#allocation82_spill]]  ;;  %s968_s16 = scalar_lea.vmem [#allocation24], %s4942_s27 }
 0x174   : > { %s975_s8 = sshll.u32 %s968_s16, 4  ;;  %s5864_s4 = scalar_lea.sflag [#allocation25], %s4912_s22  ;;  %s976_s8 = int_to_ptr.vmem [resolvable:$true] %s975_s8 }
 0x179   : > { %s5086_s18 = scalar_lea.hbm %s5935_s13, %s4945_s12  ;;  %s4017_s2 = scalar_lea.hbm %s5935_s13, 32 }
 0x17a   : > { %s4013_s28 = scalar_lea.hbm %s5086_s18, 16  ;;  %p4018_p5 = scmp.lt.u32.totalorder %s5086_s18, %s5935_s13 }
 0x17b   : > { %p4014_p2 = scmp.ne.s32.totalorder %s5086_s18, %s4013_s28  ;;  %p4019_p11 = scmp.lt.u32.totalorder %s4017_s2, %s4013_s28 }
 0x17c   : > { %p4021_p6 = scmp.lt.u32.totalorder %s4013_s28, %s5086_s18 }
 0x17d   : > { %p4015_p4 = pnand %p4014_p2, %p5928_p12  ;;  %p4020_p8 = por %p4019_p11, %p4018_p5 }
 0x17f   : > { %p4016_p1 = pneg %p4015_p4  ;;  %p4022_p9 = por %p4021_p6, %p4020_p8 }
 0x181   : > { %p4023_p7 = pnand %p4022_p9, %p4016_p1 }
 0x183   : > { %4026 = shalt.err (!%p4023_p7)
}
 0x184   : > { %s4027_s23 = scalar_lea.vmem %s976_s8, 16  ;;  %s4539_s16 = smov [#allocation24]  }
 0x185   : > { %p4028_p10 = scmp.ne.s32.totalorder %s976_s8, %s4027_s23  ;;  %s4031_s30 = sshll.u32 %s4539_s16, 4  ;;  %s4032_s30 = int_to_ptr.vmem [resolvable:$false] %s4031_s30 }
 0x186   : > { %s4033_s17 = scalar_lea.vmem %s4032_s30, 32  ;;  %p4034_p0 = scmp.lt.s32.totalorder %s976_s8, %s4032_s30 }
 0x187   : > { %p4029_p3 = pnand %p4028_p10, %p5928_p12  ;;  %p4035_p2 = scmp.lt.s32.totalorder %s4033_s17, %s4027_s23 }
 0x189   : > { %p4030_p13 = pneg %p4029_p3  ;;  %p4036_p4 = por %p4035_p2, %p4034_p0 }
 0x18b   : > { %p4037_p5 = pnand %p4036_p4, %p4030_p13 }
 0x18d   : > { %4040 = shalt.err (!%p4037_p5)
}
 0x18e   : > { %3495 = dma.hbm_to_vmem [thread:$0]  (%p5928_p12), %s5086_s18, 16, %s976_s8, %s5864_s4  }
 0x18f   : > { %s5936_s15 = sld [smem:[#allocation84_spill]]  ;;  %s1006_s30 = scalar_lea.vmem [#allocation27], %s4942_s27 }
 0x190   : > { %s1013_s14 = sshll.u32 %s1006_s30, 4  ;;  %s5866_s19 = scalar_lea.sflag [#allocation28], %s4912_s22  ;;  %s1014_s14 = int_to_ptr.vmem [resolvable:$true] %s1013_s14 }
 0x195   : > { %s5113_s2 = scalar_lea.hbm %s5936_s15, %s4945_s12  ;;  %s4045_s8 = scalar_lea.hbm %s5936_s15, 32 }
 0x196   : > { %s4041_s23 = scalar_lea.hbm %s5113_s2, 16  ;;  %p4046_p6 = scmp.lt.u32.totalorder %s5113_s2, %s5936_s15 }
 0x197   : > { %p4042_p1 = scmp.ne.s32.totalorder %s5113_s2, %s4041_s23  ;;  %p4047_p9 = scmp.lt.u32.totalorder %s4045_s8, %s4041_s23 }
 0x198   : > { %p4049_p10 = scmp.lt.u32.totalorder %s4041_s23, %s5113_s2 }
 0x199   : > { %p4043_p11 = pnand %p4042_p1, %p5928_p12  ;;  %p4048_p7 = por %p4047_p9, %p4046_p6 }
 0x19b   : > { %p4044_p8 = pneg %p4043_p11  ;;  %p4050_p3 = por %p4049_p10, %p4048_p7 }
 0x19d   : > { %p4051_p13 = pnand %p4050_p3, %p4044_p8 }
 0x19f   : > { %4054 = shalt.err (!%p4051_p13)
}
 0x1a0   : > { %s4055_s26 = scalar_lea.vmem %s1014_s14, 16  ;;  %s4540_s30 = smov [#allocation27]  }
 0x1a1   : > { %p4056_p0 = scmp.ne.s32.totalorder %s1014_s14, %s4055_s26  ;;  %s4059_s4 = sshll.u32 %s4540_s30, 4  ;;  %s4060_s4 = int_to_ptr.vmem [resolvable:$false] %s4059_s4 }
 0x1a2   : > { %s4061_s16 = scalar_lea.vmem %s4060_s4, 32  ;;  %p4062_p5 = scmp.lt.s32.totalorder %s1014_s14, %s4060_s4 }
 0x1a3   : > { %p4057_p2 = pnand %p4056_p0, %p5928_p12  ;;  %p4063_p1 = scmp.lt.s32.totalorder %s4061_s16, %s4055_s26 }
 0x1a5   : > { %p4058_p4 = pneg %p4057_p2  ;;  %p4064_p11 = por %p4063_p1, %p4062_p5 }
 0x1a7   : > { %p4065_p6 = pnand %p4064_p11, %p4058_p4 }
 0x1a9   : > { %4068 = shalt.err (!%p4065_p6)
}
 0x1aa   : > { %3497 = dma.hbm_to_vmem [thread:$0]  (%p5928_p12), %s5113_s2, 16, %s1014_s14, %s5866_s19  }
 0x1ab   : > { %s3162_s23 = sshll.u32 %s4909_s3, 2  ;;  %s3163_s18 = sshll.u32 %s4519_s24, 6 }
 0x1ac   : > { %s5937_s4 = sld [smem:[#allocation69_spill]]  ;;  %s727_s26 = scalar_lea.vmem [#allocation3], %s3162_s23 }
 0x1ad   : > { %s734_s30 = sshll.u32 %s727_s26, 4  ;;  %s5144_s16 = sshll.u32 %s4942_s27, 4  ;;  %s735_s30 = int_to_ptr.vmem [resolvable:$true] %s734_s30 }
 0x1ae   : > { %s724_s9 = scalar_lea.sflag [#allocation4], %s4909_s3  ;;  %p5939_p9 = scmp.ne.s32.totalorder %s5902_s1, 0 }
 0x1b2   : > { %s5938_s7 = smov %s5937_s4  ;;  %s5141_s28 = scalar_lea.hbm %s5937_s4, %s3163_s18 }
 0x1b3   : > { %s4069_s11 = scalar_lea.hbm %s5141_s28, 64  ;;  %s4073_s18 = scalar_lea.hbm %s5938_s7, 128 }
 0x1b4   : > { %p4070_p8 = scmp.ne.s32.totalorder %s5141_s28, %s4069_s11  ;;  %p4074_p3 = scmp.lt.u32.totalorder %s5141_s28, %s5938_s7 }
 0x1b5   : > { %p4075_p13 = scmp.lt.u32.totalorder %s4073_s18, %s4069_s11  ;;  %p4077_p2 = scmp.lt.u32.totalorder %s4069_s11, %s5141_s28 }
 0x1b6   : > { %p4071_p7 = pnand %p4070_p8, %p5939_p9 }
 0x1b7   : > { %p4076_p0 = por %p4075_p13, %p4074_p3 }
 0x1b8   : > { %p4072_p10 = pneg %p4071_p7 }
 0x1b9   : > { %p4078_p4 = por %p4077_p2, %p4076_p0 }
 0x1bb   : > { %p4079_p5 = pnand %p4078_p4, %p4072_p10 }
 0x1bd   : > { %4082 = shalt.err (!%p4079_p5)
}
 0x1be   : > { %s4083_s3 = scalar_lea.vmem %s735_s30, 64  ;;  %s4541_s23 = smov [#allocation3]  }
 0x1bf   : > { %p4084_p1 = scmp.ne.s32.totalorder %s735_s30, %s4083_s3  ;;  %s4087_s4 = sshll.u32 %s4541_s23, 4  ;;  %s4088_s4 = int_to_ptr.vmem [resolvable:$false] %s4087_s4 }
 0x1c0   : > { %s4089_s26 = scalar_lea.vmem %s4088_s4, 128  ;;  %p4090_p8 = scmp.lt.s32.totalorder %s735_s30, %s4088_s4 }
 0x1c1   : > { %p4085_p11 = pnand %p4084_p1, %p5939_p9  ;;  %p4091_p7 = scmp.lt.s32.totalorder %s4089_s26, %s4083_s3 }
 0x1c3   : > { %p4086_p6 = pneg %p4085_p11  ;;  %p4092_p12 = por %p4091_p7, %p4090_p8 }
 0x1c5   : > { %p4093_p3 = pnand %p4092_p12, %p4086_p6 }
 0x1c7   : > { %4096 = shalt.err (!%p4093_p3)
}
 0x1c8   : > { %3482 = dma.hbm_to_vmem [thread:$0]  (%p5939_p9), %s5141_s28, 64, %s735_s30, %s724_s9  }
 0x1c9   : > { %s5165_s11 = sshll.u32 %s4515_s5, 8  ;;  %s762_s2 = scalar_lea.vmem [#allocation8], %s5144_s16 }
 0x1ca   : > { %s769_s14 = sshll.u32 %s762_s2, 4  ;;  %s5940_s17 = sld [smem:[#allocation71_spill]]  ;;  %s5174_s14 = int_to_ptr.vmem [resolvable:$true] %s769_s14 }
 0x1cb   : > { %p5941_p10 = scmp.ne.s32.totalorder %s5908_s10, 0 }
 0x1d0   : > { %s5172_s23 = scalar_lea.hbm %s5940_s17, %s5165_s11  ;;  %s4101_s30 = scalar_lea.hbm %s5940_s17, 512 }
 0x1d1   : > { %s4097_s1 = scalar_lea.hbm %s5172_s23, 256  ;;  %p4102_p0 = scmp.lt.u32.totalorder %s5172_s23, %s5940_s17 }
 0x1d2   : > { %p4098_p12 = scmp.ne.s32.totalorder %s5172_s23, %s4097_s1  ;;  %p4103_p2 = scmp.lt.u32.totalorder %s4101_s30, %s4097_s1 }
 0x1d3   : > { %p4105_p5 = scmp.lt.u32.totalorder %s4097_s1, %s5172_s23 }
 0x1d4   : > { %p4099_p9 = pnand %p4098_p12, %p5941_p10  ;;  %p4104_p4 = por %p4103_p2, %p4102_p0 }
 0x1d6   : > { %p4100_p13 = pneg %p4099_p9  ;;  %p4106_p1 = por %p4105_p5, %p4104_p4 }
 0x1d8   : > { %p4107_p11 = pnand %p4106_p1, %p4100_p13 }
 0x1da   : > { %4110 = shalt.err (!%p4107_p11)
}
 0x1db   : > { %s4111_s26 = scalar_lea.vmem %s5174_s14, 256  ;;  %s4542_s2 = smov [#allocation8]  }
 0x1dc   : > { %p4112_p6 = scmp.ne.s32.totalorder %s5174_s14, %s4111_s26  ;;  %s4115_s18 = sshll.u32 %s4542_s2, 4  ;;  %s4116_s18 = int_to_ptr.vmem [resolvable:$false] %s4115_s18 }
 0x1dd   : > { %s4117_s8 = scalar_lea.vmem %s4116_s18, 512  ;;  %p4118_p3 = scmp.lt.s32.totalorder %s5174_s14, %s4116_s18 }
 0x1de   : > { %p4113_p8 = pnand %p4112_p6, %p5941_p10  ;;  %p4119_p12 = scmp.lt.s32.totalorder %s4117_s8, %s4111_s26 }
 0x1e0   : > { %p4114_p7 = pneg %p4113_p8  ;;  %p4120_p9 = por %p4119_p12, %p4118_p3 }
 0x1e2   : > { %p4121_p0 = pnand %p4120_p9, %p4114_p7 }
 0x1e4   : > { %4124 = shalt.err (!%p4121_p0)
}
 0x1e5   : > { %s4543_s1 = smov 64   ;;  %s4544_s9 = smov 4  }
 0x1e6   : > { %s5942_s28 = scalar_lea.sflag [#allocation7], %s4912_s22  ;;  %s5943_s4 = sld [smem:[#allocation73_spill]] }
 0x1e7   : > { %3484 = dma.hbm_to_vmem [thread:$0]  (%p5941_p10), %s5172_s23, 256, %s5174_s14, %s5942_s28, %s4543_s1, %s4543_s1, %s4544_s9  }
 0x1e8   : > { %s800_s18 = scalar_lea.vmem [#allocation11], %s5144_s16  ;;  %s5945_s13 = sld [smem:[#allocation75_spill]] }
 0x1e9   : > { %s807_s8 = sshll.u32 %s800_s18, 4  ;;  %s5209_s8 = int_to_ptr.vmem [resolvable:$true] %s807_s8 }
 0x1ec   : > { %s5944_s26 = smov %s5943_s4  ;;  %s5206_s2 = scalar_lea.hbm %s5943_s4, %s5165_s11 }
 0x1ed   : > { %s4125_s17 = scalar_lea.hbm %s5206_s2, 256  ;;  %s4129_s28 = scalar_lea.hbm %s5944_s26, 512 }
 0x1ee   : > { %s5215_s15 = scalar_lea.hbm %s5945_s13, %s5165_s11  ;;  %p4126_p13 = scmp.ne.s32.totalorder %s5206_s2, %s4125_s17 }
 0x1ef   : > { %p4130_p5 = scmp.lt.u32.totalorder %s5206_s2, %s5944_s26  ;;  %p4131_p1 = scmp.lt.u32.totalorder %s4129_s28, %s4125_s17 }
 0x1f0   : > { %p4127_p2 = pnand %p4126_p13, %p5941_p10  ;;  %p4133_p6 = scmp.lt.u32.totalorder %s4125_s17, %s5206_s2 }
 0x1f1   : > { %p4132_p11 = por %p4131_p1, %p4130_p5 }
 0x1f2   : > { %p4128_p4 = pneg %p4127_p2 }
 0x1f3   : > { %p4134_p8 = por %p4133_p6, %p4132_p11 }
 0x1f5   : > { %p4135_p7 = pnand %p4134_p8, %p4128_p4 }
 0x1f7   : > { %4138 = shalt.err (!%p4135_p7)
}
 0x1f8   : > { %s4139_s7 = scalar_lea.vmem %s5209_s8, 256  ;;  %s4545_s19 = smov [#allocation11]  }
 0x1f9   : > { %p4140_p3 = scmp.ne.s32.totalorder %s5209_s8, %s4139_s7  ;;  %s4143_s4 = sshll.u32 %s4545_s19, 4  ;;  %s4144_s4 = int_to_ptr.vmem [resolvable:$false] %s4143_s4 }
 0x1fa   : > { %s4145_s18 = scalar_lea.vmem %s4144_s4, 512  ;;  %p4146_p0 = scmp.lt.s32.totalorder %s5209_s8, %s4144_s4 }
 0x1fb   : > { %p4141_p12 = pnand %p4140_p3, %p5941_p10  ;;  %p4147_p13 = scmp.lt.s32.totalorder %s4145_s18, %s4139_s7 }
 0x1fd   : > { %p4142_p9 = pneg %p4141_p12  ;;  %p4148_p2 = por %p4147_p13, %p4146_p0 }
 0x1ff   : > { %p4149_p5 = pnand %p4148_p2, %p4142_p9 }
 0x201   : > { %4152 = shalt.err (!%p4149_p5)
}
 0x202   : > { %s5946_s17 = scalar_lea.sflag [#allocation10], %s4912_s22  ;;  %s838_s14 = scalar_lea.vmem [#allocation14], %s5144_s16 }
 0x203   : > { %3486 = dma.hbm_to_vmem [thread:$0]  (%p5941_p10), %s5206_s2, 256, %s5209_s8, %s5946_s17, %s4543_s1, %s4543_s1, %s4544_s9  }
 0x204   : > { %s845_s23 = sshll.u32 %s838_s14, 4  ;;  %s5947_s3 = sld [smem:[#allocation77_spill]]  ;;  %s5244_s23 = int_to_ptr.vmem [resolvable:$true] %s845_s23 }
 0x205   : > { %s4153_s4 = scalar_lea.hbm %s5215_s15, 256  ;;  %s4157_s21 = scalar_lea.hbm %s5945_s13, 512 }
 0x206   : > { %p4154_p4 = scmp.ne.s32.totalorder %s5215_s15, %s4153_s4  ;;  %p4158_p6 = scmp.lt.u32.totalorder %s5215_s15, %s5945_s13 }
 0x207   : > { %p4159_p8 = scmp.lt.u32.totalorder %s4157_s21, %s4153_s4  ;;  %p4161_p3 = scmp.lt.u32.totalorder %s4153_s4, %s5215_s15 }
 0x208   : > { %p4155_p1 = pnand %p4154_p4, %p5941_p10 }
 0x209   : > { %p4160_p7 = por %p4159_p8, %p4158_p6 }
 0x20a   : > { %s5948_s7 = smov %s5947_s3  ;;  %s5250_s19 = scalar_lea.hbm %s5947_s3, %s5165_s11 }
 0x20b   : > { %p4156_p11 = pneg %p4155_p1  ;;  %p4162_p12 = por %p4161_p3, %p4160_p7 }
 0x20d   : > { %p4163_p9 = pnand %p4162_p12, %p4156_p11 }
 0x20f   : > { %4166 = shalt.err (!%p4163_p9)
}
 0x210   : > { %s4167_s8 = scalar_lea.vmem %s5244_s23, 256  ;;  %s4546_s20 = smov [#allocation14]  }
 0x211   : > { %p4168_p0 = scmp.ne.s32.totalorder %s5244_s23, %s4167_s8  ;;  %s4171_s17 = sshll.u32 %s4546_s20, 4  ;;  %s4172_s17 = int_to_ptr.vmem [resolvable:$false] %s4171_s17 }
 0x212   : > { %s4173_s25 = scalar_lea.vmem %s4172_s17, 512  ;;  %p4174_p5 = scmp.lt.s32.totalorder %s5244_s23, %s4172_s17 }
 0x213   : > { %p4169_p13 = pnand %p4168_p0, %p5941_p10  ;;  %p4175_p4 = scmp.lt.s32.totalorder %s4173_s25, %s4167_s8 }
 0x215   : > { %p4170_p2 = pneg %p4169_p13  ;;  %p4176_p1 = por %p4175_p4, %p4174_p5 }
 0x217   : > { %p4177_p6 = pnand %p4176_p1, %p4170_p2 }
 0x219   : > { %4180 = shalt.err (!%p4177_p6)
}
 0x21a   : > { %s5949_s21 = scalar_lea.sflag [#allocation13], %s4912_s22  ;;  %s876_s14 = scalar_lea.vmem [#allocation17], %s5144_s16 }
 0x21b   : > { %3488 = dma.hbm_to_vmem [thread:$0]  (%p5941_p10), %s5215_s15, 256, %s5244_s23, %s5949_s21, %s4543_s1, %s4543_s1, %s4544_s9  }
 0x21c   : > { %s883_s28 = sshll.u32 %s876_s14, 4  ;;  %s5950_s4 = sld [smem:[#allocation79_spill]]  ;;  %s5279_s28 = int_to_ptr.vmem [resolvable:$true] %s883_s28 }
 0x21d   : > { %s4181_s8 = scalar_lea.hbm %s5250_s19, 256  ;;  %s4185_s25 = scalar_lea.hbm %s5948_s7, 512 }
 0x21e   : > { %p4182_p11 = scmp.ne.s32.totalorder %s5250_s19, %s4181_s8  ;;  %p4186_p3 = scmp.lt.u32.totalorder %s5250_s19, %s5948_s7 }
 0x21f   : > { %p4187_p12 = scmp.lt.u32.totalorder %s4185_s25, %s4181_s8  ;;  %p4189_p0 = scmp.lt.u32.totalorder %s4181_s8, %s5250_s19 }
 0x220   : > { %p4183_p8 = pnand %p4182_p11, %p5941_p10 }
 0x221   : > { %p4188_p9 = por %p4187_p12, %p4186_p3 }
 0x222   : > { %s5951_s18 = smov %s5950_s4  ;;  %s5285_s2 = scalar_lea.hbm %s5950_s4, %s4945_s12 }
 0x223   : > { %p4184_p7 = pneg %p4183_p8  ;;  %p4190_p13 = por %p4189_p0, %p4188_p9 }
 0x225   : > { %p4191_p2 = pnand %p4190_p13, %p4184_p7 }
 0x227   : > { %4194 = shalt.err (!%p4191_p2)
}
 0x228   : > { %s4195_s23 = scalar_lea.vmem %s5279_s28, 256  ;;  %s4547_s21 = smov [#allocation17]  }
 0x229   : > { %p4196_p5 = scmp.ne.s32.totalorder %s5279_s28, %s4195_s23  ;;  %s4199_s14 = sshll.u32 %s4547_s21, 4  ;;  %s4200_s14 = int_to_ptr.vmem [resolvable:$false] %s4199_s14 }
 0x22a   : > { %s4201_s13 = scalar_lea.vmem %s4200_s14, 512  ;;  %p4202_p6 = scmp.lt.s32.totalorder %s5279_s28, %s4200_s14 }
 0x22b   : > { %p4197_p4 = pnand %p4196_p5, %p5941_p10  ;;  %p4203_p11 = scmp.lt.s32.totalorder %s4201_s13, %s4195_s23 }
 0x22d   : > { %p4198_p1 = pneg %p4197_p4  ;;  %p4204_p8 = por %p4203_p11, %p4202_p6 }
 0x22f   : > { %p4205_p3 = pnand %p4204_p8, %p4198_p1 }
 0x231   : > { %4208 = shalt.err (!%p4205_p3)
}
 0x232   : > { %s5952_s30 = scalar_lea.sflag [#allocation16], %s4912_s22  ;;  %s913_s3 = scalar_lea.vmem [#allocation20], %s4942_s27 }
 0x233   : > { %3490 = dma.hbm_to_vmem [thread:$0]  (%p5941_p10), %s5250_s19, 256, %s5279_s28, %s5952_s30, %s4543_s1, %s4543_s1, %s4544_s9  }
 0x234   : > { %s920_s4 = sshll.u32 %s913_s3, 4  ;;  %s5953_s17 = sld [smem:[#allocation81_spill]]  ;;  %s921_s4 = int_to_ptr.vmem [resolvable:$true] %s920_s4 }
 0x235   : > { %s4209_s15 = scalar_lea.hbm %s5285_s2, 16  ;;  %s4213_s14 = scalar_lea.hbm %s5951_s18, 32 }
 0x236   : > { %p4210_p7 = scmp.ne.s32.totalorder %s5285_s2, %s4209_s15  ;;  %p4214_p0 = scmp.lt.u32.totalorder %s5285_s2, %s5951_s18 }
 0x237   : > { %p4215_p13 = scmp.lt.u32.totalorder %s4213_s14, %s4209_s15  ;;  %p4217_p5 = scmp.lt.u32.totalorder %s4209_s15, %s5285_s2 }
 0x238   : > { %p4211_p12 = pnand %p4210_p7, %p5941_p10 }
 0x239   : > { %p4216_p2 = por %p4215_p13, %p4214_p0 }
 0x23a   : > { %s5318_s25 = scalar_lea.hbm %s5953_s17, %s5165_s11  ;;  %p4212_p9 = pneg %p4211_p12 }
 0x23b   : > { %p4218_p4 = por %p4217_p5, %p4216_p2 }
 0x23d   : > { %p4219_p1 = pnand %p4218_p4, %p4212_p9 }
 0x23f   : > { %4222 = shalt.err (!%p4219_p1)
}
 0x240   : > { %s4223_s11 = scalar_lea.vmem %s921_s4, 16  ;;  %s4548_s19 = smov [#allocation20]  }
 0x241   : > { %p4224_p6 = scmp.ne.s32.totalorder %s921_s4, %s4223_s11  ;;  %s4227_s28 = sshll.u32 %s4548_s19, 4  ;;  %s4228_s28 = int_to_ptr.vmem [resolvable:$false] %s4227_s28 }
 0x242   : > { %s4229_s30 = scalar_lea.vmem %s4228_s28, 32  ;;  %p4230_p3 = scmp.lt.s32.totalorder %s921_s4, %s4228_s28 }
 0x243   : > { %p4225_p11 = pnand %p4224_p6, %p5941_p10  ;;  %p4231_p7 = scmp.lt.s32.totalorder %s4229_s30, %s4223_s11 }
 0x245   : > { %p4226_p8 = pneg %p4225_p11  ;;  %p4232_p12 = por %p4231_p7, %p4230_p3 }
 0x247   : > { %p4233_p0 = pnand %p4232_p12, %p4226_p8 }
 0x249   : > { %4236 = shalt.err (!%p4233_p0)
}
 0x24a   : > { %s5954_s7 = scalar_lea.sflag [#allocation19], %s4912_s22  ;;  %s948_s3 = scalar_lea.vmem [#allocation23], %s5144_s16 }
 0x24b   : > { %3492 = dma.hbm_to_vmem [thread:$0]  (%p5941_p10), %s5285_s2, 16, %s921_s4, %s5954_s7  }
 0x24c   : > { %s955_s8 = sshll.u32 %s948_s3, 4  ;;  %s3187_s20 = sshll.u32 %s4942_s27, 5  ;;  %s5341_s8 = int_to_ptr.vmem [resolvable:$true] %s955_s8 }
 0x24d   : > { %s4237_s15 = scalar_lea.hbm %s5318_s25, 256  ;;  %s4241_s14 = scalar_lea.hbm %s5953_s17, 512 }
 0x24e   : > { %p4238_p9 = scmp.ne.s32.totalorder %s5318_s25, %s4237_s15  ;;  %p4242_p5 = scmp.lt.u32.totalorder %s5318_s25, %s5953_s17 }
 0x24f   : > { %p4243_p4 = scmp.lt.u32.totalorder %s4241_s14, %s4237_s15  ;;  %p4245_p6 = scmp.lt.u32.totalorder %s4237_s15, %s5318_s25 }
 0x250   : > { %p4239_p13 = pnand %p4238_p9, %p5941_p10 }
 0x251   : > { %p4244_p1 = por %p4243_p4, %p4242_p5 }
 0x252   : > { %p4240_p2 = pneg %p4239_p13 }
 0x253   : > { %p4246_p11 = por %p4245_p6, %p4244_p1 }
 0x255   : > { %p4247_p8 = pnand %p4246_p11, %p4240_p2 }
 0x257   : > { %4250 = shalt.err (!%p4247_p8)
}
 0x258   : > { %s4251_s16 = scalar_lea.vmem %s5341_s8, 256  ;;  %s4549_s2 = smov [#allocation23]  }
 0x259   : > { %p4252_p3 = scmp.ne.s32.totalorder %s5341_s8, %s4251_s16  ;;  %s4255_s4 = sshll.u32 %s4549_s2, 4  ;;  %s4256_s4 = int_to_ptr.vmem [resolvable:$false] %s4255_s4 }
 0x25a   : > { %s4257_s19 = scalar_lea.vmem %s4256_s4, 512  ;;  %p4258_p0 = scmp.lt.s32.totalorder %s5341_s8, %s4256_s4 }
 0x25b   : > { %p4253_p7 = pnand %p4252_p3, %p5941_p10  ;;  %p4259_p9 = scmp.lt.s32.totalorder %s4257_s19, %s4251_s16 }
 0x25d   : > { %p4254_p12 = pneg %p4253_p7  ;;  %p4260_p13 = por %p4259_p9, %p4258_p0 }
 0x25f   : > { %p4261_p5 = pnand %p4260_p13, %p4254_p12 }
 0x261   : > { %4264 = shalt.err (!%p4261_p5)
}
 0x262   : > { %s5955_s28 = scalar_lea.sflag [#allocation22], %s4912_s22  ;;  %s3285_s30 = sshll.u32 %s4515_s5, 9 }
 0x263   : > { %3494 = dma.hbm_to_vmem [thread:$0]  (%p5941_p10), %s5318_s25, 256, %s5341_s8, %s5955_s28, %s4543_s1, %s4543_s1, %s4544_s9  }
 0x264   : > { %s986_s7 = scalar_lea.vmem [#allocation26], %s3187_s20  ;;  %s5956_s21 = sld [smem:[#allocation83_spill]] }
 0x265   : > { %s993_s3 = sshll.u32 %s986_s7, 4  ;;  %s5377_s3 = int_to_ptr.vmem [resolvable:$true] %s993_s3 }
 0x26a   : > { %s5375_s14 = scalar_lea.hbm %s5956_s21, %s3285_s30  ;;  %s4269_s20 = scalar_lea.hbm %s5956_s21, 1024 }
 0x26b   : > { %s4265_s13 = scalar_lea.hbm %s5375_s14, 512  ;;  %p4270_p6 = scmp.lt.u32.totalorder %s5375_s14, %s5956_s21 }
 0x26c   : > { %p4266_p2 = scmp.ne.s32.totalorder %s5375_s14, %s4265_s13  ;;  %p4271_p11 = scmp.lt.u32.totalorder %s4269_s20, %s4265_s13 }
 0x26d   : > { %p4273_p3 = scmp.lt.u32.totalorder %s4265_s13, %s5375_s14 }
 0x26e   : > { %p4267_p4 = pnand %p4266_p2, %p5941_p10  ;;  %p4272_p8 = por %p4271_p11, %p4270_p6 }
 0x270   : > { %p4268_p1 = pneg %p4267_p4  ;;  %p4274_p7 = por %p4273_p3, %p4272_p8 }
 0x272   : > { %p4275_p12 = pnand %p4274_p7, %p4268_p1 }
 0x274   : > { %4278 = shalt.err (!%p4275_p12)
}
 0x275   : > { %s4279_s2 = scalar_lea.vmem %s5377_s3, 512  ;;  %s4550_s4 = smov [#allocation26]  }
 0x276   : > { %p4280_p0 = scmp.ne.s32.totalorder %s5377_s3, %s4279_s2  ;;  %s4283_s19 = sshll.u32 %s4550_s4, 4  ;;  %s4284_s19 = int_to_ptr.vmem [resolvable:$false] %s4283_s19 }
 0x277   : > { %s4285_s28 = scalar_lea.vmem %s4284_s19, 1024  ;;  %p4286_p5 = scmp.lt.s32.totalorder %s5377_s3, %s4284_s19 }
 0x278   : > { %p4281_p9 = pnand %p4280_p0, %p5941_p10  ;;  %p4287_p2 = scmp.lt.s32.totalorder %s4285_s28, %s4279_s2 }
 0x27a   : > { %p4282_p13 = pneg %p4281_p9  ;;  %p4288_p4 = por %p4287_p2, %p4286_p5 }
 0x27c   : > { %p4289_p6 = pnand %p4288_p4, %p4282_p13 }
 0x27e   : > { %4292 = shalt.err (!%p4289_p6)
}
 0x27f   : > { %s5957_s30 = scalar_lea.sflag [#allocation25], %s4912_s22  ;;  %s5958_s23 = sld [smem:[#allocation85_spill]] }
 0x280   : > { %3496 = dma.hbm_to_vmem [thread:$0]  (%p5941_p10), %s5375_s14, 512, %s5377_s3, %s5957_s30, %s4543_s1, %s4543_s1, %s4544_s9  }
 0x281   : > { %s1023_s8 = scalar_lea.vmem [#allocation29], %s4942_s27 }
 0x282   : > { %s1030_s20 = sshll.u32 %s1023_s8, 4  ;;  %s1031_s20 = int_to_ptr.vmem [resolvable:$true] %s1030_s20 }
 0x285   : > { %s5959_s13 = smov %s5958_s23  ;;  %s5409_s25 = scalar_lea.hbm %s5958_s23, %s4945_s12 }
 0x286   : > { %s4293_s11 = scalar_lea.hbm %s5409_s25, 16  ;;  %s4297_s1 = scalar_lea.hbm %s5959_s13, 32 }
 0x287   : > { %p4294_p1 = scmp.ne.s32.totalorder %s5409_s25, %s4293_s11  ;;  %p4298_p3 = scmp.lt.u32.totalorder %s5409_s25, %s5959_s13 }
 0x288   : > { %p4299_p7 = scmp.lt.u32.totalorder %s4297_s1, %s4293_s11  ;;  %p4301_p0 = scmp.lt.u32.totalorder %s4293_s11, %s5409_s25 }
 0x289   : > { %p4295_p11 = pnand %p4294_p1, %p5941_p10 }
 0x28a   : > { %p4300_p12 = por %p4299_p7, %p4298_p3 }
 0x28b   : > { %p4296_p8 = pneg %p4295_p11 }
 0x28c   : > { %p4302_p9 = por %p4301_p0, %p4300_p12 }
 0x28e   : > { %p4303_p13 = pnand %p4302_p9, %p4296_p8 }
 0x290   : > { %4306 = shalt.err (!%p4303_p13)
}
 0x291   : > { %s4307_s14 = scalar_lea.vmem %s1031_s20, 16  ;;  %s4551_s4 = smov [#allocation29]  }
 0x292   : > { %p4308_p5 = scmp.ne.s32.totalorder %s1031_s20, %s4307_s14  ;;  %s4311_s19 = sshll.u32 %s4551_s4, 4  ;;  %s4312_s19 = int_to_ptr.vmem [resolvable:$false] %s4311_s19 }
 0x293   : > { %s4313_s28 = scalar_lea.vmem %s4312_s19, 32  ;;  %p4314_p6 = scmp.lt.s32.totalorder %s1031_s20, %s4312_s19 }
 0x294   : > { %p4309_p2 = pnand %p4308_p5, %p5941_p10  ;;  %p4315_p1 = scmp.lt.s32.totalorder %s4313_s28, %s4307_s14 }
 0x296   : > { %p4310_p4 = pneg %p4309_p2  ;;  %p4316_p11 = por %p4315_p1, %p4314_p6 }
 0x298   : > { %p4317_p3 = pnand %p4316_p11, %p4310_p4 }
 0x29a   : > { %4320 = shalt.err (!%p4317_p3)
}
 0x29b   : > { %s5960_s30 = scalar_lea.sflag [#allocation28], %s4912_s22  ;;  %s5961_s23 = sld [smem:[#allocation86_spill]] }
 0x29c   : > { %3498 = dma.hbm_to_vmem [thread:$0]  (%p5941_p10), %s5409_s25, 16, %s1031_s20, %s5960_s30  }
 0x29d   : > { %s1040_s16 = scalar_lea.vmem [#allocation30], %s4942_s27  ;;  %s1038_s1 = scalar_lea.sflag [#allocation31], %s4912_s22 }
 0x29e   : > { %s1047_s2 = sshll.u32 %s1040_s16, 4  ;;  %s1048_s2 = int_to_ptr.vmem [resolvable:$true] %s1047_s2 }
 0x2a1   : > { %s5962_s8 = smov %s5961_s23  ;;  %s5435_s11 = scalar_lea.hbm %s5961_s23, %s4945_s12 }
 0x2a2   : > { %s4321_s9 = scalar_lea.hbm %s5435_s11, 16  ;;  %s4325_s20 = scalar_lea.hbm %s5962_s8, 32 }
 0x2a3   : > { %p4322_p8 = scmp.ne.s32.totalorder %s5435_s11, %s4321_s9  ;;  %p4326_p0 = scmp.lt.u32.totalorder %s5435_s11, %s5962_s8 }
 0x2a4   : > { %p4327_p9 = scmp.lt.u32.totalorder %s4325_s20, %s4321_s9  ;;  %p4329_p5 = scmp.lt.u32.totalorder %s4321_s9, %s5435_s11 }
 0x2a5   : > { %p4323_p7 = pnand %p4322_p8, %p5941_p10 }
 0x2a6   : > { %p4328_p13 = por %p4327_p9, %p4326_p0 }
 0x2a7   : > { %p4324_p12 = pneg %p4323_p7 }
 0x2a8   : > { %p4330_p2 = por %p4329_p5, %p4328_p13 }
 0x2aa   : > { %p4331_p4 = pnand %p4330_p2, %p4324_p12 }
 0x2ac   : > { %4334 = shalt.err (!%p4331_p4)
}
 0x2ad   : > { %s4335_s22 = scalar_lea.vmem %s1048_s2, 16  ;;  %s4552_s27 = smov [#allocation30]  }
 0x2ae   : > { %p4336_p6 = scmp.ne.s32.totalorder %s1048_s2, %s4335_s22  ;;  %s4339_s4 = sshll.u32 %s4552_s27, 4  ;;  %s4340_s4 = int_to_ptr.vmem [resolvable:$false] %s4339_s4 }
 0x2af   : > { %s4341_s19 = scalar_lea.vmem %s4340_s4, 32  ;;  %p4342_p3 = scmp.lt.s32.totalorder %s1048_s2, %s4340_s4 }
 0x2b0   : > { %p4337_p1 = pnand %p4336_p6, %p5941_p10  ;;  %p4343_p8 = scmp.lt.s32.totalorder %s4341_s19, %s4335_s22 }
 0x2b2   : > { %p4338_p11 = pneg %p4337_p1  ;;  %p4344_p7 = por %p4343_p8, %p4342_p3 }
 0x2b4   : > { %p4345_p0 = pnand %p4344_p7, %p4338_p11 }
 0x2b6   : > { %4348 = shalt.err (!%p4345_p0)
}
 0x2b7   : > { %3499 = dma.hbm_to_vmem [thread:$0]  (%p5941_p10), %s5435_s11, 16, %s1048_s2, %s1038_s1  }
 0x2b8 PF: > { %s5963_s28 = sld [smem:[#allocation68_spill]] }
 0x2be   : > { %p5964_p12 = scmp.ne.s32.totalorder %s5963_s28, 0 }
 0x2bf   : > { %s5965_s30 = sld [smem:[#allocation56_spill]] (!%p5964_p12)  ;;  %s5966_s7 = sld [smem:[#allocation62_spill]] (!%p5964_p12) }
 0x2c0   : > { %1056 = sbr.rel (%p5964_p12) target bundleno = 3632 (0xe30), region = 108 }
 0x2c5   : > { %s5459_s15 = sand.u32 (!%p5964_p12), 1, %s5965_s30   ;;  %p5967_p9 = scmp.ne.s32.totalorder (!%p5964_p12), %s5966_s7, 0 }
 0x2c6   : > { %s3194_s23 = sshll.u32 (!%p5964_p12), %s5459_s15, 2  ;;  %s1059_s16 = scalar_lea.sflag (!%p5964_p12), [#allocation4], %s5459_s15 }
 0x2c7   : > { %s5463_s9 = scalar_lea.vmem [#allocation3], %s3194_s23 }
 0x2c8   : > { %4422 = dma.done.wait (%p5967_p9), %s1059_s16, 64  }
 0x2c9   : > { %4424 = vsyncadd (%p5967_p9), %s1059_s16, 4294967232  ;;  %s5968_s10 = sld [smem:[#allocation59_spill]]  ;;  %s1070_s1 = scalar_lea.vmem [#allocation6], %s5459_s15 }
 0x2cf   : > { %s5470_s11 = sand.u32 1, %s5968_s10  }
 0x2d0   : > { %s1068_s2 = scalar_lea.sflag [#allocation7], %s5470_s11 }
 0x2d1   : > { %4426 = dma.done.wait (%p5967_p9), %s1068_s2, 16  }
 0x2d2   : > { %4428 = vsyncadd (%p5967_p9), %s1068_s2, 4294967280  ;;  %s5969_s3 = sld [smem:[#allocation54_spill]]  ;;  %s5970_s25 = sld [smem:[#allocation65_spill]] }
 0x2d8   : > { %s5479_s20 = sand.u32 1, %s5969_s3   ;;  %p5971_p10 = scmp.ne.s32.totalorder %s5970_s25, 0 }
 0x2d9   : > { %s5482_s14 = sshll.u32 %s5479_s20, 4 }
 0x2da   : > { %s1079_s12 = scalar_lea.vmem [#allocation8], %s5482_s14 }
 0x2db   : > { %4430 = dma.done.wait (%p5971_p10), %s1068_s2, 256  }
 0x2dc   : > { %4432 = vsyncadd (%p5971_p10), %s1068_s2, 4294967040  ;;  %s1085_s22 = scalar_lea.sflag [#allocation10], %s5470_s11  ;;  %s1087_s27 = scalar_lea.vmem [#allocation9], %s5479_s20 }
 0x2dd   : > { %4434 = dma.done.wait (%p5971_p10), %s1085_s22, 272  }
 0x2de   : > { %4436 = vsyncadd (%p5971_p10), %s1085_s22, 4294967024  ;;  %s1096_s4 = scalar_lea.vmem [#allocation11], %s5482_s14  ;;  %s1102_s19 = scalar_lea.sflag [#allocation13], %s5470_s11 }
 0x2df   : > { %s1104_s28 = scalar_lea.vmem [#allocation12], %s5479_s20 }
 0x2e0   : > { %4438 = dma.done.wait (%p5971_p10), %s1102_s19, 272  }
 0x2e1   : > { %4440 = vsyncadd (%p5971_p10), %s1102_s19, 4294967024  ;;  %s1113_s30 = scalar_lea.vmem [#allocation14], %s5482_s14  ;;  %s1119_s7 = scalar_lea.sflag [#allocation16], %s5470_s11 }
 0x2e2   : > { %4442 = dma.done.wait (%p5971_p10), %s1119_s7, 272  }
 0x2e3   : > { %4444 = vsyncadd (%p5971_p10), %s1119_s7, 4294967024  ;;  %s1136_s2 = scalar_lea.sflag [#allocation19], %s5470_s11 }
 0x2e4   : > { %4446 = dma.done.wait (%p5971_p10), %s1136_s2, 32  }
 0x2e5   : > { %4448 = vsyncadd (%p5971_p10), %s1136_s2, 4294967264  ;;  %s1152_s19 = scalar_lea.sflag [#allocation22], %s5470_s11 }
 0x2e6   : > { %4450 = dma.done.wait (%p5971_p10), %s1152_s19, 272  }
 0x2e7   : > { %4452 = vsyncadd (%p5971_p10), %s1152_s19, 4294967024  ;;  %s1169_s3 = scalar_lea.sflag [#allocation25], %s5470_s11 }
 0x2e8   : > { %4454 = dma.done.wait (%p5971_p10), %s1169_s3, 528  }
 0x2e9   : > { %4456 = vsyncadd (%p5971_p10), %s1169_s3, 4294966768  ;;  %s3200_s2 = sshll.u32 %s5479_s20, 5  ;;  %s1186_s19 = scalar_lea.sflag [#allocation28], %s5470_s11 }
 0x2ea   : > { %s5531_s23 = scalar_lea.vmem [#allocation26], %s3200_s2  ;;  %s1188_s22 = scalar_lea.vmem [#allocation27], %s5479_s20 }
 0x2eb   : > { %4458 = dma.done.wait (%p5971_p10), %s1186_s19, 32  }
 0x2ec   : > { %4460 = vsyncadd (%p5971_p10), %s1186_s19, 4294967264  ;;  %s1196_s16 = scalar_lea.vmem [#allocation29], %s5479_s20  ;;  %s1202_s3 = scalar_lea.sflag [#allocation31], %s5470_s11 }
 0x2ed   : > { %s1204_s7 = scalar_lea.vmem [#allocation30], %s5479_s20 }
 0x2ee   : > { %4462 = dma.done.wait (%p5971_p10), %s1202_s3, 16  }
 0x2ef   : > { %4464 = vsyncadd (%p5971_p10), %s1202_s3, 4294967280  ;;  %p5972_p13 = scmp.eq.s32.totalorder %s5968_s10, 0 }
 0x2f1   : > { %4466 = dma.done.wait (%p5972_p13), [#allocation31], 2304   ;;  %p5973_p5 = pmov %p5972_p13 }
 0x2f3   : > { %4468 = vsyncadd (%p5973_p5), [#allocation31], 4294964992  ;;  %p5974_p2 = pmov %p5973_p5 }
 0x2f5   : > { %4470 = dma.done.wait (%p5974_p2), [#allocation34], 1072   ;;  %p5975_p4 = pmov %p5974_p2 }
 0x2f6   : > { %p5976_p6 = pmov %p5974_p2 }
 0x2f7   : > { %4472 = vsyncadd (%p5975_p4), [#allocation34], 4294966224 }
 0x2f8   : > { %4474 = dma.done.wait (%p5976_p6), [#allocation37], 16   ;;  %p5977_p1 = pmov %p5974_p2 }
 0x2f9   : > { %s3205_s11 = sshll.u32 %s5459_s15, 3  ;;  %s5978_s2 = sld [smem:[#allocation57_spill]] }
 0x2fa   : > { %4476 = vsyncadd (%p5977_p1), [#allocation37], 4294967280  ;;  %s5559_s25 = scalar_lea.vmem [#allocation38], %s3205_s11 }
 0x2ff   : > { %p3206_p11 = scmp.ne.s32.totalorder %s5978_s2, 0 }
 0x300   : > { %v1360_v0 = vld [vmem:[%s5463_s9] sm:$0xf] (!%p3206_p11)  ;;  %vm1362_vm0 = vcmask (!%p3206_p11), 261120  }
 0x301   : > { %1359 = sbr.rel (%p3206_p11) target bundleno = 776 (0x308), region = 200  ;;  %v1361_v1 = vunpack.c.l.bf16 (!%p3206_p11), %v1360_v0 }
 0x303   : > { %1363 = vst.msk [vmem:[#allocation2] sm:$0xff] (!%p3206_p11), %vm1362_vm0, %v1361_v1 }
 0x308 PF: > { %v3665_v2 = vld [vmem:[%s1096_s4] sm:$0xff]   ;;  %v4553_v3 = vmov 0.0   ;;  %v3667_v5 = vld [vmem:[%s1096_s4 + $0x8] sm:$0xff]   ;;  %vm4554_vm1 = vmmov 0   ;;  %vm1389_vm2 = vcmask 261120   ;;  %vm1570_vm3 = vcmask 64512  }
 0x309   : > { %3346 = vmatprep.subr.bf16.mxu1 %v4553_v3  ;;  %3338 = vmatprep.subr.bf16.mxu0 %v4553_v3  ;;  %v3666_v4 = vld [vmem:[%s1079_s12] sm:$0xff]   ;;  %v3668_v6 = vld [vmem:[%s1079_s12 + $0x8] sm:$0xff]   ;;  %s4555_s9 = smov 112   ;;  %s4556_s10 = smov 120   ;;  %vm1632_vm4 = vcmask 1043456   ;;  %vm2025_vm5 = vcmask 130048  }
 0x30a   : > { %3347 = vmatpush3.bf16.msra.mxu1 %v3665_v2  ;;  %3350 = vmatprep.mubr.msk.bf16.mxu1 %vm4554_vm1, %v4553_v3  ;;  %v5577_v7 = vld [vmem:[#allocation2] sm:$0xff]  ;;  %s4557_s12 = smov 104   ;;  %s4560_s19 = smov 24   ;;  %vm2028_vm6 = vcmask 195584   ;;  %vm2246_vm7 = vcmask 523264  }
 0x30b   : > { %3339 = vmatpush3.bf16.msra.mxu0 %v3666_v4  ;;  %3348 = vmatprep.subr.bf16.mxu1 %v4553_v3  ;;  %v1365_v8 = vpack.c.bf16 %v5577_v7, %v5577_v7  ;;  %v3211_v9 = vld [vmem:[%s1104_s28] ss:$0 sm:$0xff]  ;;  %v3669_v25 = vld [vmem:[%s1113_s30] sm:$0xff]   ;;  %s4558_s28 = smov 8   ;;  %s5982_s3 = scalar_lea.vmem [#allocation18], %s5479_s20 }
 0x30c   : > { %3340 = vmatprep.subr.bf16.mxu0 %v4553_v3  ;;  %3342 = vmatprep.mubr.msk.bf16.mxu0 %vm4554_vm1, %v4553_v3  ;;  %v3207_v10 = vld [vmem:[%s1087_s27] ss:$0 sm:$0xff]  ;;  %s5979_s27 = scalar_lea.vmem [#allocation15], %s5479_s20  ;;  %s5983_s11 = scalar_lea.vmem [#allocation23], %s5482_s14 }
 0x30d   : > { %v3670_v26 = vld [vmem:[%s1113_s30 + $0x8] sm:$0xff]   ;;  %s4559_s30 = smov 16   ;;  %s5984_s2 = smov %s5983_s11 }
 0x30e   : > { %3349 = vmatpush3.bf16.msra.mxu1 %v3667_v5  ;;  %v3219_v36 = vld [vmem:[%s1070_s1] ss:$0 sm:$0xff]  ;;  %s5980_s1 = scalar_lea.vmem [#allocation17], %s5482_s14  ;;  %s5986_s14 = scalar_lea.vmem [#allocation21], %s5479_s20 }
 0x30f   : > { %3341 = vmatpush3.bf16.msra.mxu0 %v3668_v6  ;;  %3362 = vmatprep.subr.bf16.mxu1 %v4553_v3  ;;  %v3215_v43 = vld [vmem:[%s5979_s27] ss:$0 sm:$0xff]  ;;  %s5981_s4 = smov %s5980_s1 }
 0x310   : > { %3354 = vmatprep.subr.bf16.mxu0 %v4553_v3 }
 0x311   : > { %3351 = vmatmul.mubr.msk.bf16.vlgmr.msra.gmra.mrb[0].mxu1 %vm1389_vm2, %v1365_v8 }
 0x312   : > { %3343 = vmatmul.mubr.msk.bf16.vlgmr.msra.gmra.mrb[0].mxu0 %vm1389_vm2, %v1365_v8  ;;  %3364 = vmatprep.mubr.msk.bf16.mxu1 %vm4554_vm1, %v4553_v3 }
 0x313   : > { %3358 = vmatprep.mubr.msk.bf16.mxu0 %vm4554_vm1, %v4553_v3  ;;  %3355 = vmatpush3.bf16.msra.mxu0 %v3669_v25 }
 0x314   : > { %3356 = vmatprep.subr.bf16.mxu0 %v4553_v3 }
 0x317   : > { %3357 = vmatpush3.bf16.msra.mxu0 %v3670_v26 }
 0x318   : > { %3368 = vmatprep.subr.bf16.mxu0 %v4553_v3 }
 0x31a   : > { %3359 = vmatmul.mubr.msk.bf16.vlgmr.msra.gmra.mrb[4].mxu0 %vm1389_vm2, %v1365_v8 }
 0x31b   : > { %3370 = vmatprep.mubr.msk.bf16.mxu0 %vm4554_vm1, %v4553_v3 }
 0x3e4   : > { %v1490_v11 = vpop.f32.mrb[0].mxu1 }
 0x3e5   : > { %v1491_v12 = vadd.f32 %v3211_v9, %v1490_v11  ;;  %v3352_v13 = vpop.f32.mrb[1].mxu1  ;;  %v1427_v14 = vpop.f32.mrb[0].mxu0 }
 0x3e6   : > { %v1428_v15 = vadd.f32 %v3207_v10, %v1427_v14  ;;  %v1493_v16 = vpop.f32.mrb[2].mxu1  ;;  %v3344_v17 = vpop.f32.mrb[1].mxu0 }
 0x3e7   : > { %v1561_v18 = vpack.c.bf16 %v1491_v12, %v1491_v12  ;;  %v3353_v19 = vpop.f32.mrb[3].mxu1  ;;  %v1430_v20 = vpop.f32.mrb[2].mxu0 }
 0x3e8   : > { %v1559_v21 = vmul.f32 0.35355338, %v1428_v15  ;;  %v3345_v22 = vpop.f32.mrb[3].mxu0 }
 0x3e9   : > { %1793 = vrot.lane.b32.xlu1 %v1561_v18, %s4555_s9  ;;  %1681 = vrot.lane.b32.xlu0 %v1561_v18, %s4556_s10  ;;  %v1575_v23 = vsel %vm1570_vm3, %v1561_v18, 0 }
 0x3ea   : > { %v1560_v24 = vpack.c.bf16 %v1559_v21, %v1559_v21  ;;  %3363 = vmatpush3.bf16.xpose.msra.mxu1 %v1575_v23 }
 0x3eb   : > { %3374 = vmatprep.subr.bf16.mxu1 %v4553_v3 }
 0x3ed   : > { %1791 = vrot.lane.b32.xlu1 %v1560_v24, %s4555_s9  ;;  %1678 = vrot.lane.b32.xlu0 %v1560_v24, %s4556_s10  ;;  %v1553_v44 = vpop.f32.mrb[4].mxu0 }
 0x3ee   : > { %v1554_v45 = vadd.f32 %v3215_v43, %v1553_v44  ;;  %v3360_v46 = vpop.f32.mrb[5].mxu0 }
 0x3ef   : > { %v1556_v47 = vpop.f32.mrb[6].mxu0 }
 0x3f0   : > { %v1562_v48 = vpack.c.bf16 %v1554_v45, %v1554_v45  ;;  %v3361_v49 = vpop.f32.mrb[7].mxu0 }
 0x3f1   : > { %1902 = vrot.lane.b32.xlu1 %v1560_v24, %s4557_s12  ;;  %1904 = vrot.lane.b32.xlu0 %v1561_v18, %s4557_s12 }
 0x3f2   : > { %3365 = vmatmul.mubr.msk.bf16.vlgmr.msra.gmra.mrb[4].mxu1 %vm1570_vm3, %v1560_v24  ;;  %v1634_v50 = vsel %vm1632_vm4, %v1562_v48, 0 }
 0x3f3   : > { %3376 = vmatprep.mubr.msk.bf16.mxu1 %vm4554_vm1, %v4553_v3  ;;  %3369 = vmatpush3.bf16.msra.mxu0 %v1634_v50 }
 0x3f4   : > { %3380 = vmatprep.subr.bf16.mxu0 %v4553_v3 }
 0x45b   : > { %v1682_v27 = vpop.permute.xlu0 %1681  ;;  %v1794_v29 = vpop.permute.xlu1 %1793 }
 0x45c   : > { %v1687_v28 = vsel %vm1570_vm3, %v1682_v27, 0  ;;  %v1799_v31 = vsel %vm1570_vm3, %v1794_v29, 0 }
 0x45d   : > { %3375 = vmatpush3.bf16.xpose.msra.mxu1 %v1687_v28 }
 0x45e   : > { %3386 = vmatprep.subr.bf16.mxu1 %v4553_v3 }
 0x45f   : > { %v1679_v30 = vpop.permute.xlu0 %1678  ;;  %v1792_v33 = vpop.permute.xlu1 %1791 }
 0x463   : > { %v1905_v32 = vpop.permute.xlu0 %1904  ;;  %v1903_v35 = vpop.permute.xlu1 %1902 }
 0x464   : > { %3377 = vmatmul.mubr.msk.bf16.vlgmr.msra.gmra.mrb[8].mxu1 %vm1570_vm3, %v1679_v30  ;;  %v1910_v34 = vsel %vm1570_vm3, %v1905_v32, 0 }
 0x465   : > { %3387 = vmatpush3.bf16.xpose.msra.mxu1 %v1799_v31  ;;  %3388 = vmatprep.mubr.msk.bf16.mxu1 %vm4554_vm1, %v4553_v3 }
 0x466   : > { %3398 = vmatprep.subr.bf16.mxu1 %v4553_v3 }
 0x46c   : > { %3389 = vmatmul.mubr.msk.bf16.vlgmr.msra.gmra.mrb[12].mxu1 %vm1570_vm3, %v1792_v33 }
 0x46d   : > { %3399 = vmatpush3.bf16.xpose.msra.mxu1 %v1910_v34  ;;  %3400 = vmatprep.mubr.msk.bf16.mxu1 %vm4554_vm1, %v4553_v3 }
 0x46e   : > { %3410 = vmatprep.subr.bf16.mxu1 %v4553_v3 }
 0x474   : > { %3401 = vmatmul.mubr.msk.bf16.vlgmr.msra.gmra.mrb[16].mxu1 %vm1570_vm3, %v1903_v35 }
 0x475   : > { %3414 = vmatprep.mubr.msk.bf16.mxu1 %vm4554_vm1, %v4553_v3 }
 0x4c5   : > { %v1611_v37 = vpop.f32.mrb[4].mxu1 }
 0x4c6   : > { %v1612_v38 = vadd.f32 %v3219_v36, %v1611_v37  ;;  %v3366_v39 = vpop.f32.mrb[5].mxu1 }
 0x4c7   : > { %v1614_v40 = vpop.f32.mrb[6].mxu1 }
 0x4c8   : > { %v3367_v41 = vpop.f32.mrb[7].mxu1  ;;  %v1617_v42 = vsel %vm1570_vm3, %v1612_v38, -inf }
 0x4c9   : > { %1618 = vmax.xlane.f32.xlu0 %v1617_v42 }
 0x537   : > { %v1723_v51 = vpop.f32.mrb[8].mxu1 }
 0x538   : > { %v1724_v52 = vadd.f32 %v3219_v36, %v1723_v51  ;;  %v3378_v53 = vpop.f32.mrb[9].mxu1 }
 0x539   : > { %v1726_v54 = vpop.f32.mrb[10].mxu1  ;;  %v3671_v53 = vld [vmem:[%s5980_s1] sm:$0xff]  }
 0x53a   : > { %v3379_v55 = vpop.f32.mrb[11].mxu1  ;;  %v1729_v56 = vsel %vm1570_vm3, %v1724_v52, -inf  ;;  %3411 = vmatpush3.bf16.msra.mxu1 %v3671_v53 }
 0x53b   : > { %1730 = vmax.xlane.f32.xlu1 %v1729_v56  ;;  %3412 = vmatprep.subr.bf16.mxu1 %v4553_v3 }
 0x53f   : > { %v1835_v57 = vpop.f32.mrb[12].mxu1 }
 0x540   : > { %v1836_v58 = vadd.f32 %v3219_v36, %v1835_v57  ;;  %v3390_v59 = vpop.f32.mrb[13].mxu1  ;;  %v3672_v57 = vld [vmem:[%s5981_s4 + $0x8] sm:$0xff]  }
 0x541   : > { %v1838_v60 = vpop.f32.mrb[14].mxu1  ;;  %3413 = vmatpush3.bf16.msra.mxu1 %v3672_v57 }
 0x542   : > { %v3391_v61 = vpop.f32.mrb[15].mxu1  ;;  %v1841_v62 = vsel %vm1570_vm3, %v1836_v58, -inf  ;;  %3426 = vmatprep.subr.bf16.mxu1 %v4553_v3 }
 0x543   : > { %1842 = vmax.xlane.f32.xlu0 %v1841_v62 }
 0x547   : > { %v1946_v63 = vpop.f32.mrb[16].mxu1 }
 0x548   : > { %v1947_v0 = vadd.f32 %v3219_v36, %v1946_v63  ;;  %v3402_v1 = vpop.f32.mrb[17].mxu1 }
 0x549   : > { %v1949_v2 = vpop.f32.mrb[18].mxu1 }
 0x54a   : > { %v3403_v4 = vpop.f32.mrb[19].mxu1  ;;  %v1952_v5 = vsel %vm1570_vm3, %v1947_v0, -inf }
 0x54b   : > { %1953 = vmax.xlane.f32.xlu0 %v1952_v5 }
 0x556   : > { %v1619_v6 = vpop.xlane.xlu0 %1618 }
 0x557   : > { %v1620_v8 = vsub.f32 %v1612_v38, %v1619_v6 }
 0x559   : > { %v1621_v9 = vmul.f32 1.442695, %v1620_v8 }
 0x55b   : > { %3679 = vpow2.f32 %v1621_v9 }
 0x565   : > { %v3680_v10 = vpop.eup %3679 }
 0x566   : > { %v1623_v11 = vsel %vm1570_vm3, %v3680_v10, 0.0 }
 0x567   : > { %1624 = vadd.xlane.f32.xlu1 %v1623_v11 }
 0x578   : > { %1742 = vrot.lane.b32.xlu1 %v1562_v48, %s4556_s10  ;;  %s5987_s10 = scalar_lea.vmem [#allocation24], %s5479_s20 }
 0x5c8   : > { %v1731_v12 = vpop.xlane.xlu1 %1730 }
 0x5c9   : > { %v1732_v13 = vsub.f32 %v1724_v52, %v1731_v12 }
 0x5cb   : > { %v1733_v14 = vmul.f32 1.442695, %v1732_v13 }
 0x5cd   : > { %3681 = vpow2.f32 %v1733_v14 }
 0x5d0   : > { %v1843_v15 = vpop.xlane.xlu0 %1842 }
 0x5d1   : > { %v1844_v16 = vsub.f32 %v1836_v58, %v1843_v15 }
 0x5d3   : > { %v1845_v17 = vmul.f32 1.442695, %v1844_v16  ;;  %v3231_v16 = vld [vmem:[%s5982_s3] ss:$0 sm:$0xff] }
 0x5d5   : > { %3683 = vpow2.f32 %v1845_v17 }
 0x5d7   : > { %v3682_v18 = vpop.eup %3681 }
 0x5d8   : > { %v1954_v19 = vpop.xlane.xlu0 %1953  ;;  %v1735_v20 = vsel %vm1570_vm3, %v3682_v18, 0.0 }
 0x5d9   : > { %v1955_v21 = vsub.f32 %v1947_v0, %v1954_v19  ;;  %1736 = vadd.xlane.f32.xlu0 %v1735_v20 }
 0x5db   : > { %v1956_v22 = vmul.f32 1.442695, %v1955_v21 }
 0x5dd   : > { %3685 = vpow2.f32 %v1956_v22 }
 0x5df   : > { %v3684_v23 = vpop.eup %3683 }
 0x5e0   : > { %v1847_v24 = vsel %vm1570_vm3, %v3684_v23, 0.0 }
 0x5e1   : > { %1848 = vadd.xlane.f32.xlu1 %v1847_v24 }
 0x5e7   : > { %v3686_v25 = vpop.eup %3685 }
 0x5e8   : > { %v1958_v26 = vsel %vm1570_vm3, %v3686_v25, 0.0 }
 0x5e9   : > { %1959 = vadd.xlane.f32.xlu0 %v1958_v26  ;;  %v3674_v26 = vld [vmem:[%s5984_s2 + $0x8] sm:$0xff]  }
 0x5f2   : > { %1964 = vrot.lane.b32.xlu1 %v1562_v48, %s4557_s12 }
 0x5f4   : > { %v1625_v27 = vpop.xlane.xlu1 %1624 }
 0x5f5   : > { %3687 = vrcp.f32 %v1625_v27 }
 0x5f8   : > { %v1743_v29 = vpop.permute.xlu1 %1742 }
 0x5f9   : > { %v1748_v32 = vsel %vm1632_vm4, %v1743_v29, 0 }
 0x5ff   : > { %v3688_v28 = vpop.eup %3687  ;;  %1853 = vrot.lane.b32.xlu0 %v1562_v48, %s4555_s9  ;;  %s5985_s9 = scalar_lea.vmem [#allocation20], %s5479_s20 }
 0x600   : > { %v1627_v30 = vmul.f32 %v3688_v28, %v3680_v10 }
 0x602   : > { %v1628_v31 = vpack.c.bf16 %v1627_v30, %v1627_v30 }
 0x604   : > { %3371 = vmatmul.mubr.msk.bf16.vlgmr.msra.gmra.mrb[8].mxu0 %vm1570_vm3, %v1628_v31 }
 0x605   : > { %3381 = vmatpush3.bf16.msra.mxu0 %v1748_v32  ;;  %3382 = vmatprep.mubr.msk.bf16.mxu0 %vm4554_vm1, %v4553_v3 }
 0x606   : > { %3392 = vmatprep.subr.bf16.mxu0 %v4553_v3 }
 0x666   : > { %v1737_v33 = vpop.xlane.xlu0 %1736 }
 0x667   : > { %3689 = vrcp.f32 %v1737_v33 }
 0x66e   : > { %v1849_v34 = vpop.xlane.xlu1 %1848 }
 0x66f   : > { %3691 = vrcp.f32 %v1849_v34 }
 0x671   : > { %v3690_v35 = vpop.eup %3689 }
 0x672   : > { %v1739_v36 = vmul.f32 %v3690_v35, %v3682_v18  ;;  %v1965_v43 = vpop.permute.xlu1 %1964  ;;  %v3232_v35 = vld [vmem:[%s5985_s9] ss:$0 sm:$0xff] }
 0x673   : > { %v1970_v45 = vsel %vm1632_vm4, %v1965_v43, 0  ;;  %v3677_v43 = vld [vmem:[%s5531_s23 + $0x10] sm:$0xff]  }
 0x674   : > { %v1740_v37 = vpack.c.bf16 %v1739_v36, %v1739_v36 }
 0x676   : > { %v1960_v38 = vpop.xlane.xlu0 %1959  ;;  %3383 = vmatmul.mubr.msk.bf16.vlgmr.msra.gmra.mrb[12].mxu0 %vm1570_vm3, %v1740_v37  ;;  %v3233_v37 = vld [vmem:[%s5986_s14] ss:$0 sm:$0xff] }
 0x677   : > { %3693 = vrcp.f32 %v1960_v38  ;;  %3394 = vmatprep.mubr.msk.bf16.mxu0 %vm4554_vm1, %v4553_v3 }
 0x679   : > { %v3692_v39 = vpop.eup %3691 }
 0x67a   : > { %v1851_v40 = vmul.f32 %v3692_v39, %v3684_v23  ;;  %v1854_v41 = vpop.permute.xlu0 %1853 }
 0x67b   : > { %v1859_v42 = vsel %vm1632_vm4, %v1854_v41, 0  ;;  %v3675_v41 = vld [vmem:[%s5531_s23] sm:$0xff]  }
 0x67c   : > { %3393 = vmatpush3.bf16.msra.mxu0 %v1859_v42  ;;  %v1852_v44 = vpack.c.bf16 %v1851_v40, %v1851_v40  ;;  %v3676_v42 = vld [vmem:[%s5531_s23 + $0x8] sm:$0xff]  }
 0x67d   : > { %3404 = vmatprep.subr.bf16.mxu0 %v4553_v3 }
 0x67f   : > { %3395 = vmatmul.mubr.msk.bf16.vlgmr.msra.gmra.mrb[16].mxu0 %vm1570_vm3, %v1852_v44  ;;  %v3678_v44 = vld [vmem:[%s5531_s23 + $0x18] sm:$0xff]   ;;  %s5988_s23 = sld [smem:[#allocation57_spill]] }
 0x680   : > { %3405 = vmatpush3.bf16.msra.mxu0 %v1970_v45  ;;  %3406 = vmatprep.mubr.msk.bf16.mxu0 %vm4554_vm1, %v4553_v3  ;;  %v3234_v45 = vld [vmem:[%s5987_s10] ss:$0 sm:$0xff] }
 0x681   : > { %v3694_v46 = vpop.eup %3693  ;;  %3418 = vmatprep.subr.bf16.mxu0 %v4553_v3 }
 0x682   : > { %v1962_v47 = vmul.f32 %v3694_v46, %v3686_v25  ;;  %v3673_v25 = vld [vmem:[%s5983_s11] sm:$0xff]  }
 0x684   : > { %v1963_v48 = vpack.c.bf16 %v1962_v47, %v1962_v47 }
 0x685   : > { %p3246_p3 = scmp.ne.s32.totalorder %s5988_s23, 1 }
 0x686   : > { %vm2335_vm8 = vcmask (!%p3246_p3), 1046528   ;;  %s4562_s20 = smov (!%p3246_p3), 64   ;;  %vm4565_vm9 = vmmov (!%p3246_p3), 0   ;;  %vm2331_vm10 = vcmask (!%p3246_p3), 1040384   ;;  %vm2484_vm11 = vcmask (!%p3246_p3), 785408  }
 0x687   : > { %3407 = vmatmul.mubr.msk.bf16.vlgmr.msra.gmra.mrb[20].mxu0 %vm1570_vm3, %v1963_v48 }
 0x688   : > { %3422 = vmatprep.mubr.msk.bf16.mxu0 %vm4554_vm1, %v4553_v3  ;;  %3419 = vmatpush3.bf16.msra.mxu0 %v3673_v25  ;;  %v3703_v25 = vld [vmem:[#allocation32] ss:$12 sps:$4 sm:$0xff] (!%p3246_p3)  }
 0x689   : > { %3420 = vmatprep.subr.bf16.mxu0 %v4553_v3 }
 0x68c   : > { %3421 = vmatpush3.bf16.msra.mxu0 %v3674_v26  ;;  %v3704_v26 = vld [vmem:[#allocation32 + $0x1c] ss:$12 sps:$4 sm:$0xff] (!%p3246_p3)  }
 0x6d7   : > { %v1670_v49 = vpop.f32.mrb[8].mxu0 }
 0x6d8   : > { %v3372_v50 = vpop.f32.mrb[9].mxu0  ;;  %v1676_v9 = vpack.c.bf16 %v1670_v49, %v1670_v49 }
 0x6d9   : > { %v1673_v51 = vpop.f32.mrb[10].mxu0 }
 0x6da   : > { %v3373_v52 = vpop.f32.mrb[11].mxu0 }
 0x749   : > { %v1784_v54 = vpop.f32.mrb[12].mxu0 }
 0x74a   : > { %v1790_v55 = vpack.c.bf16 %v1784_v54, %v1784_v54  ;;  %v3384_v56 = vpop.f32.mrb[13].mxu0 }
 0x74b   : > { %v1787_v58 = vpop.f32.mrb[14].mxu0 }
 0x74c   : > { %2014 = vrot.lane.b32.xlu1 %v1790_v55, %s4558_s28  ;;  %v3385_v59 = vpop.f32.mrb[15].mxu0 }
 0x752   : > { %v1895_v60 = vpop.f32.mrb[16].mxu0 }
 0x753   : > { %v1901_v61 = vpack.c.bf16 %v1895_v60, %v1895_v60  ;;  %v3396_v62 = vpop.f32.mrb[17].mxu0  ;;  %v3238_v60 = vld [vmem:[%s1188_s22] ss:$0 sm:$0xff]  ;;  %s4561_s22 = smov (!%p3246_p3), 32  }
 0x754   : > { %v1898_v63 = vpop.f32.mrb[18].mxu0 }
 0x755   : > { %2017 = vrot.lane.b32.xlu0 %v1901_v61, %s4559_s30  ;;  %v3397_v0 = vpop.f32.mrb[19].mxu0 }
 0x75a   : > { %v2006_v1 = vpop.f32.mrb[20].mxu0 }
 0x75b   : > { %v2012_v2 = vpack.c.bf16 %v2006_v1, %v2006_v1  ;;  %v3408_v4 = vpop.f32.mrb[21].mxu0 }
 0x75c   : > { %v2009_v5 = vpop.f32.mrb[22].mxu0 }
 0x75d   : > { %2020 = vrot.lane.b32.xlu1 %v2012_v2, %s4560_s19  ;;  %v3409_v6 = vpop.f32.mrb[23].mxu0 }
 0x7be   : > { %v2015_v8 = vpop.permute.xlu1 %2014 }
 0x7bf   : > { %v2024_v11 = vsel %vm1570_vm3, %v1676_v9, %v2015_v8 }
 0x7c7   : > { %v2018_v10 = vpop.permute.xlu0 %2017 }
 0x7c8   : > { %v2027_v12 = vsel %vm2025_vm5, %v2024_v11, %v2018_v10 }
 0x7cf   : > { %v2021_v13 = vpop.permute.xlu1 %2020 }
 0x7d0   : > { %v2030_v14 = vsel %vm2028_vm6, %v2027_v12, %v2021_v13 }
 0x7d1   : > { %3415 = vmatmul.mubr.msk.bf16.vlgmr.msra.gmra.mrb[20].mxu1 %vm1389_vm2, %v2030_v14 }
 0x7d2   : > { %3434 = vmatprep.mubr.msk.bf16.mxu1 %vm4554_vm1, %v4553_v3  ;;  %3427 = vmatpush3.bf16.msra.mxu1 %v3675_v41 }
 0x7d3   : > { %3428 = vmatprep.subr.bf16.mxu1 %v4553_v3 }
 0x7d6   : > { %3429 = vmatpush3.bf16.msra.mxu1 %v3676_v42 }
 0x7d7   : > { %3430 = vmatprep.subr.bf16.mxu1 %v4553_v3 }
 0x7da   : > { %3431 = vmatpush3.bf16.msra.mxu1 %v3677_v43 }
 0x7db   : > { %3432 = vmatprep.subr.bf16.mxu1 %v4553_v3 }
 0x7de   : > { %3433 = vmatpush3.bf16.msra.mxu1 %v3678_v44  ;;  %v3719_v44 = vld [vmem:[#allocation32 + $0x8] ss:$12 sps:$4 sm:$0xff] (!%p3246_p3)  }
 0x8a4   : > { %v2083_v15 = vpop.f32.mrb[20].mxu1 }
 0x8a5   : > { %v2089_v17 = vadd.f32 %v2083_v15, %v5577_v7  ;;  %v3416_v18 = vpop.f32.mrb[21].mxu1 }
 0x8a6   : > { %v2086_v19 = vpop.f32.mrb[22].mxu1 }
 0x8a7   : > { %v2097_v20 = vadd.f32 %v3231_v16, %v2089_v17  ;;  %v3417_v21 = vpop.f32.mrb[23].mxu1  ;;  %v3244_v17 = vld [vmem:[%s1196_s16] ss:$0 sm:$0xff] }
 0x8a8   : > { %v3245_v19 = vld [vmem:[%s1204_s7] ss:$0 sm:$0xff] }
 0x8a9   : > { %v2100_v22 = vsel %vm1389_vm2, %v2097_v20, 0.0  ;;  %v2105_v23 = vmul.f32 %v2097_v20, %v2097_v20 }
 0x8aa   : > { %2101 = vadd.xlane.f32.xlu0 %v2100_v22 }
 0x8ab   : > { %v2106_v24 = vsel %vm1389_vm2, %v2105_v23, 0.0 }
 0x8ac   : > { %2107 = vadd.xlane.f32.xlu1 %v2106_v24  ;;  %v3701_v24 = vld [vmem:[#allocation32 + $0x4] ss:$12 sps:$4 sm:$0xff] (!%p3246_p3)  }
 0x8ad   : > { %2488 = vmatprep.subr.bf16.mxu1 (!%p3246_p3), %v3701_v24 }
 0x937   : > { %v2102_v7 = vpop.xlane.xlu0 %2101 }
 0x938   : > { %v2104_v27 = vmul.f32 0.03125, %v2102_v7 }
 0x939   : > { %v2108_v28 = vpop.xlane.xlu1 %2107 }
 0x93a   : > { %v2110_v29 = vmul.f32 %v2104_v27, %v2104_v27  ;;  %v2109_v30 = vmul.f32 0.03125, %v2108_v28  ;;  %v2112_v33 = vsub.f32 %v2097_v20, %v2104_v27  ;;  %v3706_v27 = vld [vmem:[#allocation32 + $0x18] ss:$12 sps:$4 sm:$0xff] (!%p3246_p3)   ;;  %v3707_v28 = vld [vmem:[#allocation32 + $0x34] ss:$12 sps:$4 sm:$0xff] (!%p3246_p3)  }
 0x93c   : > { %v2111_v31 = vsub.f32 %v2109_v30, %v2110_v29  ;;  %v4563_v29 = vmov (!%p3246_p3), 0   ;;  %v4564_v30 = vmov (!%p3246_p3), 0.0  }
 0x93d   : > { %3454 = vmatprep.subr.bf16.mxu0 (!%p3246_p3), %v4564_v30 }
 0x93e   : > { %v2113_v32 = vadd.f32 1e-12, %v2111_v31  ;;  %v3709_v31 = vld [vmem:[#allocation32 + $0x30] ss:$12 sps:$4 sm:$0xff] (!%p3246_p3)  }
 0x940   : > { %3695 = vrsqrt.f32 %v2113_v32  ;;  %v3710_v32 = vld [vmem:[#allocation32 + $0x4c] ss:$12 sps:$4 sm:$0xff] (!%p3246_p3)  }
 0x94a   : > { %v3696_v34 = vpop.eup %3695 }
 0x94b   : > { %v2115_v36 = vmul.f32 %v3696_v34, %v2112_v33  ;;  %v3712_v33 = vld [vmem:[#allocation32 + $0x48] ss:$12 sps:$4 sm:$0xff] (!%p3246_p3)   ;;  %v3713_v34 = vld [vmem:[#allocation32 + $0x64] ss:$12 sps:$4 sm:$0xff] (!%p3246_p3)  }
 0x94d   : > { %v2122_v38 = vmul.f32 %v3232_v35, %v2115_v36  ;;  %v3715_v35 = vld [vmem:[#allocation32 + $0x60] ss:$12 sps:$4 sm:$0xff] (!%p3246_p3)   ;;  %v3716_v36 = vld [vmem:[#allocation32 + $0x7c] ss:$12 sps:$4 sm:$0xff] (!%p3246_p3)  }
 0x94f   : > { %v2129_v39 = vadd.f32 %v3233_v37, %v2122_v38  ;;  %v3718_v37 = vld [vmem:[#allocation32 + $0x78] ss:$12 sps:$4 sm:$0xff] (!%p3246_p3)  }
 0x951   : > { %v2130_v40 = vpack.c.bf16 %v2129_v39, %v2129_v39 }
 0x953   : > { %3423 = vmatmul.mubr.msk.bf16.vlgmr.msra.gmra.mrb[24].mxu0 %vm1389_vm2, %v2130_v40 }
 0x954   : > { %3470 = vmatprep.mubr.msk.bf16.mxu0 (!%p3246_p3), %vm4565_vm9, %v4564_v30 }
 0xa26   : > { %v2191_v46 = vpop.f32.mrb[24].mxu0 }
 0xa27   : > { %v2192_v47 = vadd.f32 %v3234_v45, %v2191_v46  ;;  %v3424_v48 = vpop.f32.mrb[25].mxu0  ;;  %v3720_v46 = vld [vmem:[#allocation32 + $0x20] ss:$12 sps:$4 sm:$0xff] (!%p3246_p3)  }
 0xa28   : > { %v2194_v49 = vpop.f32.mrb[26].mxu0  ;;  %v3722_v48 = vld [vmem:[#allocation32 + $0x50] ss:$12 sps:$4 sm:$0xff] (!%p3246_p3)  }
 0xa29   : > { %v2197_v50 = vmul.f32 %v2192_v47, %v2192_v47  ;;  %v3425_v51 = vpop.f32.mrb[27].mxu0  ;;  %v3723_v49 = vld [vmem:[#allocation32 + $0x68] ss:$12 sps:$4 sm:$0xff] (!%p3246_p3)  }
 0xa2a   : > { %v3725_v51 = vld [vmem:[#allocation35] sm:$0xff] (!%p3246_p3)  }
 0xa2b   : > { %v2198_v52 = vmul.f32 %v2197_v50, %v2192_v47  ;;  %v3724_v50 = vld [vmem:[#allocation32 + $0x80] ss:$12 sps:$4 sm:$0xff] (!%p3246_p3)   ;;  %3455 = vmatpush3.bf16.msra.mxu0 (!%p3246_p3), %v3725_v51 }
 0xa2c   : > { %3456 = vmatprep.subr.bf16.mxu0 (!%p3246_p3), %v4564_v30 }
 0xa2d   : > { %v2199_v53 = vmul.f32 0.044715, %v2198_v52  ;;  %v3726_v52 = vld [vmem:[#allocation35 + $0x8] sm:$0xff] (!%p3246_p3)  }
 0xa2f   : > { %v2200_v54 = vadd.f32 %v2199_v53, %v2192_v47  ;;  %3457 = vmatpush3.bf16.msra.mxu0 (!%p3246_p3), %v3726_v52  ;;  %v3727_v53 = vld [vmem:[#allocation35 + $0x10] sm:$0xff] (!%p3246_p3)  }
 0xa30   : > { %3458 = vmatprep.subr.bf16.mxu0 (!%p3246_p3), %v4564_v30 }
 0xa31   : > { %v2201_v55 = vmul.f32 0.7978846, %v2200_v54  ;;  %v3728_v54 = vld [vmem:[#allocation35 + $0x18] sm:$0xff] (!%p3246_p3)  }
 0xa33   : > { %3697 = vtanh.f32 %v2201_v55  ;;  %3459 = vmatpush3.bf16.msra.mxu0 (!%p3246_p3), %v3727_v53  ;;  %v3729_v55 = vld [vmem:[#allocation35 + $0x20] sm:$0xff] (!%p3246_p3)  }
 0xa34   : > { %3460 = vmatprep.subr.bf16.mxu0 (!%p3246_p3), %v4564_v30 }
 0xa37   : > { %3461 = vmatpush3.bf16.msra.mxu0 (!%p3246_p3), %v3728_v54 }
 0xa38   : > { %3462 = vmatprep.subr.bf16.mxu0 (!%p3246_p3), %v4564_v30 }
 0xa3b   : > { %3463 = vmatpush3.bf16.msra.mxu0 (!%p3246_p3), %v3729_v55 }
 0xa3c   : > { %3464 = vmatprep.subr.bf16.mxu0 (!%p3246_p3), %v4564_v30 }
 0xa3d   : > { %v3698_v56 = vpop.eup %3697 }
 0xa3e   : > { %v2203_v57 = vadd.f32 1.0, %v3698_v56  ;;  %v3730_v56 = vld [vmem:[#allocation35 + $0x28] sm:$0xff] (!%p3246_p3)  }
 0xa3f   : > { %3465 = vmatpush3.bf16.msra.mxu0 (!%p3246_p3), %v3730_v56 }
 0xa40   : > { %v2204_v58 = vmul.f32 0.5, %v2203_v57  ;;  %3466 = vmatprep.subr.bf16.mxu0 (!%p3246_p3), %v4564_v30  ;;  %v3731_v57 = vld [vmem:[#allocation35 + $0x30] sm:$0xff] (!%p3246_p3)  }
 0xa42   : > { %v2205_v3 = vmul.f32 %v2204_v58, %v2192_v47  ;;  %v3721_v47 = vld [vmem:[#allocation32 + $0x38] ss:$12 sps:$4 sm:$0xff] (!%p3246_p3)   ;;  %v3732_v58 = vld [vmem:[#allocation35 + $0x38] sm:$0xff] (!%p3246_p3)  }
 0xa43   : > { %3467 = vmatpush3.bf16.msra.mxu0 (!%p3246_p3), %v3731_v57 }
 0xa44   : > { %v2206_v59 = vpack.c.bf16 %v2205_v3, %v2205_v3  ;;  %3468 = vmatprep.subr.bf16.mxu0 (!%p3246_p3), %v4564_v30  ;;  %v2373_v3 = vlaneseq (!%p3246_p3) }
 0xa46   : > { %3435 = vmatmul.mubr.msk.bf16.vlgmr.msra.gmra.mrb[24].mxu1 %vm2246_vm7, %v2206_v59  ;;  %v2374_v59 = vshrl.u32 (!%p3246_p3), %v2373_v3, 7 }
 0xa47   : > { %2489 = vmatpush1.bf16.msra.mxu1 (!%p3246_p3), %v3703_v25  ;;  %2520 = vmatprep.mubr.bf16.mxu1 (!%p3246_p3), %v4563_v29 }
 0xa48   : > { %2490 = vmatprep.subr.bf16.mxu1 (!%p3246_p3), %v3704_v26  ;;  %3469 = vmatpush3.bf16.msra.mxu0 (!%p3246_p3), %v3732_v58 }
 0xa4b   : > { %2491 = vmatpush1.bf16.msra.mxu1 (!%p3246_p3), %v3706_v27 }
 0xa4c   : > { %2492 = vmatprep.subr.bf16.mxu1 (!%p3246_p3), %v3707_v28 }
 0xa4f   : > { %2493 = vmatpush1.bf16.msra.mxu1 (!%p3246_p3), %v3709_v31 }
 0xa50   : > { %2494 = vmatprep.subr.bf16.mxu1 (!%p3246_p3), %v3710_v32 }
 0xa53   : > { %2495 = vmatpush1.bf16.msra.mxu1 (!%p3246_p3), %v3712_v33 }
 0xa54   : > { %2496 = vmatprep.subr.bf16.mxu1 (!%p3246_p3), %v3713_v34 }
 0xa57   : > { %2497 = vmatpush1.bf16.msra.mxu1 (!%p3246_p3), %v3715_v35 }
 0xa58   : > { %2498 = vmatprep.subr.bf16.mxu1 (!%p3246_p3), %v3716_v36 }
 0xa5b   : > { %2499 = vmatpush1.bf16.msra.mxu1 (!%p3246_p3), %v3718_v37 }
 0xa5c   : > { %3438 = vmatprep.subr.bf16.mxu1 (!%p3246_p3), %v4564_v30 }
 0xb19   : > { %v2284_v61 = vpop.f32.mrb[24].mxu1 }
 0xb1a   : > { %v2285_v62 = vadd.f32 %v3238_v60, %v2284_v61  ;;  %v3436_v63 = vpop.f32.mrb[25].mxu1  ;;  %v2375_v60 = vsub.s32 (!%p3246_p3), 0, %v2374_v59  ;;  %v2371_v61 = vld [vmem:[#allocation33] sm:$0x7] (!%p3246_p3) }
 0xb1b   : > { %v2287_v0 = vpop.f32.mrb[26].mxu1 }
 0xb1c   : > { %v2290_v1 = vadd.f32 %v2285_v62, %v2129_v39  ;;  %v3437_v2 = vpop.f32.mrb[27].mxu1  ;;  %v2379_v62 = vsub.s32 (!%p3246_p3), 1, %v2374_v59  ;;  %v2376_v63 = vrot.slane (!%p3246_p3), %v2371_v61, %v2375_v60 }
 0xb1e   : > { %v2293_v4 = vsel %vm1389_vm2, %v2290_v1, 0.0  ;;  %v2297_v5 = vmul.f32 %v2290_v1, %v2290_v1  ;;  %v2380_v0 = vrot.slane (!%p3246_p3), %v2371_v61, %v2379_v62 }
 0xb1f   : > { %2294 = vadd.xlane.f32.xlu0 %v2293_v4 }
 0xb20   : > { %v2298_v6 = vsel %vm1389_vm2, %v2297_v5, 0.0 }
 0xb23   : > { %2299 = vadd.xlane.f32.xlu0 %v2298_v6 }
 0xbac   : > { %v2295_v8 = vpop.xlane.xlu0 %2294 }
 0xbad   : > { %v2296_v9 = vmul.f32 0.03125, %v2295_v8 }
 0xbaf   : > { %v2302_v11 = vmul.f32 %v2296_v9, %v2296_v9  ;;  %v2304_v15 = vsub.f32 %v2290_v1, %v2296_v9 }
 0xbb0   : > { %v2300_v10 = vpop.xlane.xlu0 %2299 }
 0xbb1   : > { %v2301_v12 = vmul.f32 0.03125, %v2300_v10 }
 0xbb3   : > { %v2303_v13 = vsub.f32 %v2301_v12, %v2302_v11  ;;  %v2383_v12 = vsub.s32 (!%p3246_p3), 2, %v2374_v59 }
 0xbb5   : > { %v2305_v14 = vadd.f32 1e-12, %v2303_v13  ;;  %v2384_v13 = vrot.slane (!%p3246_p3), %v2371_v61, %v2383_v12 }
 0xbb7   : > { %3699 = vrsqrt.f32 %v2305_v14 }
 0xbc1   : > { %v3700_v16 = vpop.eup %3699 }
 0xbc2   : > { %v2307_v18 = vmul.f32 %v3700_v16, %v2304_v15  ;;  %2326 = sbr.rel (%p3246_p3) target bundleno = 3605 (0xe15), region = 204 }
 0xbc4   : > { %v2314_v20 = vmul.f32 %v3244_v17, %v2307_v18 }
 0xbc6   : > { %v2321_v21 = vadd.f32 %v3245_v19, %v2314_v20 }
 0xbc8   : > { %2322 = vst.msk [vmem:[#allocation2] sm:$0xff] %vm1389_vm2, %v2321_v21 }
 0xbcf   : > { %v2327_v22 = vld [vmem:[#allocation2] sm:$0xff] }
 0xbd0   : > { %2337 = vrot.lane.b32.xlu0 %v2327_v22, %s4561_s22  ;;  %v2333_v23 = vrot.slane %v2327_v22, 1  ;;  %v2329_v38 = vrot.slane %v2327_v22, 7  ;;  %v3267_v22 = vld [vmem:[#allocation36] ss:$0 sm:$0xff] }
 0xbd2   : > { %v2336_v7 = vsel %vm2335_vm8, %v2333_v23, 0.0  ;;  %v2332_v40 = vsel %vm2331_vm10, 0.0, %v2329_v38 }
 0xbd4   : > { %2341 = vrot.lane.b32.xlu0 %v2336_v7, %s4562_s20 }
 0xc42   : > { %v2338_v39 = vpop.permute.xlu0 %2337 }
 0xc43   : > { %v2344_v41 = vsel %vm1389_vm2, %v2332_v40, %v2338_v39 }
 0xc46   : > { %v2342_v42 = vpop.permute.xlu0 %2341 }
 0xc47   : > { %v2345_v43 = vsel %vm2246_vm7, %v2344_v41, %v2342_v42 }
 0xc48   : > { %v2346_v45 = vpack.c.bf16 %v2345_v43, %v2345_v43 }
 0xc4a   : > { %3265 = vmatmul.mubr.msk.bf16.vlgmr.msra.gmra.mrb[0].mxu1 %vm2484_vm11, %v2346_v45 }
 0xc4b   : > { %3439 = vmatpush3.bf16.msra.mxu1 %v3719_v44  ;;  %3450 = vmatprep.mubr.msk.bf16.mxu1 %vm4565_vm9, %v4564_v30 }
 0xc4c   : > { %3440 = vmatprep.subr.bf16.mxu1 %v4564_v30 }
 0xc4f   : > { %3441 = vmatpush3.bf16.msra.mxu1 %v3720_v46 }
 0xc50   : > { %3442 = vmatprep.subr.bf16.mxu1 %v4564_v30 }
 0xc53   : > { %3443 = vmatpush3.bf16.msra.mxu1 %v3721_v47 }
 0xc54   : > { %3444 = vmatprep.subr.bf16.mxu1 %v4564_v30 }
 0xc57   : > { %3445 = vmatpush3.bf16.msra.mxu1 %v3722_v48 }
 0xc58   : > { %3446 = vmatprep.subr.bf16.mxu1 %v4564_v30 }
 0xc5b   : > { %3447 = vmatpush3.bf16.msra.mxu1 %v3723_v49 }
 0xc5c   : > { %3448 = vmatprep.subr.bf16.mxu1 %v4564_v30 }
 0xc5f   : > { %3449 = vmatpush3.bf16.msra.mxu1 %v3724_v50 }
 0xc62   : > { %3451 = vmatmul.mubr.msk.bf16.vlgmr.msra.gmra.mrb[4].mxu1 %vm2484_vm11, %v2346_v45 }
 0xd1d   : > { %v2522_v1 = vpop.f32.mrb[0].mxu1 }
 0xd1e   : > { %v2523_v2 = vadd.f32 %v2522_v1, %v2376_v63  ;;  %v2524_v4 = vpop.f32.mrb[1].mxu1 }
 0xd1f   : > { %v2525_v5 = vadd.f32 %v2524_v4, %v2380_v0  ;;  %v2526_v6 = vpop.f32.mrb[2].mxu1 }
 0xd20   : > { %v2569_v8 = vmax.f32 %v2523_v2, 0.0  ;;  %v2527_v9 = vpop.f32.mrb[3].mxu1 }
 0xd21   : > { %v2570_v10 = vmax.f32 %v2525_v5, 0.0 }
 0xd23   : > { %v2572_v11 = vadd.f32 %v2570_v10, %v2569_v8 }
 0xd35   : > { %v2563_v14 = vpop.f32.mrb[4].mxu1 }
 0xd36   : > { %v2564_v15 = vadd.f32 %v2563_v14, %v2384_v13  ;;  %v3452_v16 = vpop.f32.mrb[5].mxu1 }
 0xd37   : > { %v2566_v17 = vpop.f32.mrb[6].mxu1 }
 0xd38   : > { %v2571_v18 = vmax.f32 %v2564_v15, 0.0  ;;  %v3453_v19 = vpop.f32.mrb[7].mxu1 }
 0xd3a   : > { %v2573_v20 = vadd.f32 %v2572_v11, %v2571_v18 }
 0xd3c   : > { %v2574_v21 = vpack.c.bf16 %v2573_v20, %v2573_v20 }
 0xd3e   : > { %3471 = vmatmul.mubr.bf16.vlgmr.msra.gmra.mrb[0].mxu0 %v2574_v21 }
 0xe11   : > { %v2680_v23 = vpop.f32.mrb[0].mxu0 }
 0xe12   : > { %v2681_v24 = vadd.f32 %v3267_v22, %v2680_v23  ;;  %v3472_v25 = vpop.f32.mrb[1].mxu0 }
 0xe13   : > { %v2683_v26 = vpop.f32.mrb[2].mxu0 }
 0xe14   : > { %2686 = vst [vmem:[%s5559_s25] sm:$0xff] %v2681_v24  ;;  %v3473_v7 = vpop.f32.mrb[3].mxu0 }
 0xe15 PF: > { %s5989_s16 = sld [smem:[#allocation58_spill]]  ;;  %s5990_s7 = sld [smem:[#allocation66_spill]] }
 0xe16   : > { %s5991_s4 = sld [smem:[#allocation91_spill]]  ;;  %s2701_s30 = sshll.u32 %s5559_s25, 4  ;;  %s2702_s30 = int_to_ptr.vmem [resolvable:$true] %s2701_s30 }
 0xe17   : > { %s2688_s3 = scalar_lea.sflag [#allocation5], %s5459_s15  ;;  %s4349_s11 = scalar_lea.vmem %s2702_s30, 128 }
 0xe18   : > { %p4350_p8 = scmp.ne.s32.totalorder %s2702_s30, %s4349_s11  ;;  %s4566_s2 = smov [#allocation38]  }
 0xe19   : > { %s4353_s9 = sshll.u32 %s4566_s2, 4  ;;  %s4354_s9 = int_to_ptr.vmem [resolvable:$false] %s4353_s9 }
 0xe1a   : > { %s4355_s14 = scalar_lea.vmem %s4354_s9, 256  ;;  %p4356_p9 = scmp.lt.s32.totalorder %s2702_s30, %s4354_s9 }
 0xe1b   : > { %s3277_s12 = sshll.u32 %s5989_s16, 7  ;;  %p5993_p7 = scmp.ne.s32.totalorder %s5990_s7, 0 }
 0xe1c   : > { %s5992_s19 = smov %s5991_s4  ;;  %s5737_s28 = scalar_lea.hbm %s5991_s4, %s3277_s12 }
 0xe1d   : > { %p4351_p0 = pnand %p4350_p8, %p5993_p7  ;;  %p4357_p10 = scmp.lt.s32.totalorder %s4355_s14, %s4349_s11 }
 0xe1f   : > { %p4352_p12 = pneg %p4351_p0  ;;  %p4358_p13 = por %p4357_p10, %p4356_p9 }
 0xe21   : > { %p4359_p5 = pnand %p4358_p13, %p4352_p12 }
 0xe23   : > { %4362 = shalt.err (!%p4359_p5)
}
 0xe24   : > { %s4363_s15 = scalar_lea.hbm %s5737_s28, 128  ;;  %s4367_s23 = scalar_lea.hbm %s5992_s19, 256 }
 0xe25   : > { %p4364_p2 = scmp.ne.s32.totalorder %s5737_s28, %s4363_s15  ;;  %p4368_p1 = scmp.lt.u32.totalorder %s5737_s28, %s5992_s19 }
 0xe26   : > { %p4369_p11 = scmp.lt.u32.totalorder %s4367_s23, %s4363_s15  ;;  %p4371_p8 = scmp.lt.u32.totalorder %s4363_s15, %s5737_s28 }
 0xe27   : > { %p4365_p4 = pnand %p4364_p2, %p5993_p7 }
 0xe28   : > { %p4370_p3 = por %p4369_p11, %p4368_p1 }
 0xe29   : > { %p4366_p6 = pneg %p4365_p4 }
 0xe2a   : > { %p4372_p0 = por %p4371_p8, %p4370_p3 }
 0xe2c   : > { %p4373_p12 = pnand %p4372_p0, %p4366_p6 }
 0xe2e   : > { %4376 = shalt.err (!%p4373_p12)
}
 0xe2f   : > { %3526 = dma.vmem_to_hbm [thread:$0]  (%p5993_p7), %s2702_s30, 128, %s5737_s28, %s2688_s3  }
 0xe30 PF: > { %s5994_s16 = sld [smem:[#allocation55_spill]]  ;;  %s5995_s12 = sld [smem:[#allocation67_spill]] }
 0xe31   : > { %p3553_p9 = scmp.ge.s32.totalorder %s4523_s6, 2 }
 0xe36   : > { %s2713_s27 = sand.u32 1, %s5994_s16   ;;  %p5996_p10 = scmp.ne.s32.totalorder %s5995_s12, 0 }
 0xe37   : > { %s2714_s1 = scalar_lea.sflag [#allocation5], %s2713_s27 }
 0xe38   : > { %p3542_p13 = pnand %p3553_p9, %p5996_p10 }
 0xe3a   : > { %4478 = dma.done.wait (!%p3542_p13), %s2714_s1, 128  }
 0xe3b   : > { %4480 = vsyncadd (!%p3542_p13), %s2714_s1, 4294967168  ;;  %s67_s6 = sadd.s32 1, %s4523_s6   ;;  %s5997_s3 = sld [smem:[#allocation54_spill]] }
 0xe3c   : > { %p64_p5 = scmp.ge.s32.totalorder %s67_s6, 6   ;;  %s5998_s4 = sld [smem:[#allocation63_spill]] }
 0xe3d   : > { %s5999_s30 = sld [smem:[#allocation56_spill]]  ;;  %s6000_s7 = sld [smem:[#allocation64_spill]] }
 0xe3e   : > { %s6001_s11 = sld [smem:[#allocation60_spill]]  ;;  %s6002_s2 = sld [smem:[#allocation61_spill]] }
 0xe3f   : > { %s6003_s28 = smov %s4491_s29  ;;  %s6007_s23 = smov %s4515_s5 }
 0xe40   : > { %s6008_s1 = smov %s4519_s24  ;;  %66 = sbr.rel (!%p64_p5) target bundleno = 53 (0x35), region = 382 }
 0xe42   : > { %s6004_s29 = smov %s5998_s4  ;;  %s6005_s4 = smov %s4503_s0 }
 0xe43   : > { %s6006_s0 = smov %s6000_s7 }
 0xe44   : > { %s6009_s5 = smov %s6001_s11  ;;  %s6010_s24 = smov %s6002_s2 }
 0xe47   :  { %2719 = vsyncpa [#allocation4], 1 }
 0xe48   :  { %2721 = vsyncpa [#allocation4 + $0x1], 1 }
 0xe49   :  { %2722 = vsyncpa [#allocation7], 1 }
 0xe4a   :  { %2724 = vsyncpa [#allocation7 + $0x1], 1 }
 0xe4b   :  { %2725 = vsyncpa [#allocation10], 1 }
 0xe4c   :  { %2727 = vsyncpa [#allocation10 + $0x1], 1 }
 0xe4d   :  { %2728 = vsyncpa [#allocation13], 1 }
 0xe4e   :  { %2730 = vsyncpa [#allocation13 + $0x1], 1 }
 0xe4f   :  { %2731 = vsyncpa [#allocation16], 1 }
 0xe50   :  { %2733 = vsyncpa [#allocation16 + $0x1], 1 }
 0xe51   :  { %2734 = vsyncpa [#allocation19], 1 }
 0xe52   :  { %2736 = vsyncpa [#allocation19 + $0x1], 1 }
 0xe53   :  { %2737 = vsyncpa [#allocation22], 1 }
 0xe54   :  { %2739 = vsyncpa [#allocation22 + $0x1], 1 }
 0xe55   :  { %2740 = vsyncpa [#allocation25], 1 }
 0xe56   :  { %2742 = vsyncpa [#allocation25 + $0x1], 1 }
 0xe57   :  { %2743 = vsyncpa [#allocation28], 1 }
 0xe58   :  { %2745 = vsyncpa [#allocation28 + $0x1], 1 }
 0xe59   :  { %2746 = vsyncpa [#allocation31], 1 }
 0xe5a   :  { %2748 = vsyncpa [#allocation31 + $0x1], 1 }
 0xe5b   :  { %2749 = vsyncpa [#allocation34], 1 }
 0xe5c   :  { %2750 = vsyncpa [#allocation37], 1 }
 0xe5d   :  { %2751 = vsyncpa [#allocation5], 1 }
 0xe5e   :  { %2753 = vsyncpa [#allocation5 + $0x1], 1 }

</bundles_post_ra>
